<compile_context>
chip_gen: v6e
topology: v6e:2x2x1
jax: 0.10.0
libtpu: 0.0.40
codegen_flags: <defaults>
</compile_context>

<pallas_src>
import jax
import jax.numpy as jnp
from jax.experimental import pallas as pl
from jax.experimental.pallas import tpu as pltpu

_LANE = 128


def _round_up(x, m):
    return ((x + m - 1) // m) * m


def _choose_block(batch):
    """Pick (bt, num_steps) for the batch-blocked grid.

    bt is always a multiple of 128 so every in-kernel tile (x block, its
    transpose, the (C, bt) output block) is lane/sublane aligned.
    """
    if batch <= 2048:
        # Single block; padding a tiny batch up to one lane tile costs a few KiB.
        return _round_up(batch, _LANE), 1
    # Large batches: ~1 MiB of HBM per x block and >= ~16 grid steps so the
    # BlockSpec pipeline overlaps DMA with compute (>= 8 steps per TensorCore
    # on a 2-TC v7x chip).  Prefer a block that divides B exactly so the
    # (large) input is never re-copied through HBM for padding.
    bt = max(_LANE, min(4096, _round_up(-(-batch // 16), _LANE)))
    for cand in range(bt, _LANE - 1, -_LANE):
        if batch % cand == 0:
            return cand, batch // cand
    # TODO(synk): divisor-free huge batches fall back to a zero-padding copy of
    # the tail; a masked last grid step would avoid that extra HBM pass.
    return bt, -(-batch // bt)


def _pointnet_kernel(w_ref, shift_ref, x_ref, o_ref):
    """One batch block of MiniPointNet.

    w_ref    : SMEM (C*F,)   BN-scale-folded 1x1-conv weights, index = c*F + f
    shift_ref: SMEM (C,)     folded conv-bias + BN shift (applied after the max)
    x_ref    : VMEM (bt, F*P) NCHW rows, lane index = f*P + p
    o_ref    : VMEM (C, bt)  max-pooled pre-output, batch on the lane axis
    """
    bt, fp = x_ref.shape
    c_out = o_ref.shape[0]
    f_in = w_ref.shape[0] // c_out
    p_pts = fp // f_in

    # Batch -> lane axis (one cheap XLU transpose per block); afterwards all
    # VPU work runs at full 128-lane utilization with batch on the lanes.
    xt = jnp.transpose(x_ref[...], (1, 0))                        # (F*P, bt)
    # Per-feature slabs (sublane-aligned static slices), reused by every channel.
    xf = [xt[f * p_pts:(f + 1) * p_pts, :] for f in range(f_in)]  # each (P, bt)

    for c in range(c_out):
        # y[p, b] = sum_f W'[c, f] * x[b, f, p]   (BN scale already inside W')
        acc = w_ref[c * f_in] * xf[0]
        for f in range(1, f_in):
            acc = acc + w_ref[c * f_in + f] * xf[f]               # (P, bt)
        # Max over points, then folded bias/BN shift + ReLU (both commute with
        # the max, so they run once per (batch, channel)).  Lane-dense row store.
        m = jnp.max(acc, axis=0, keepdims=True)                   # (1, bt)
        o_ref[c:c + 1, :] = jnp.maximum(m + shift_ref[c], 0.0)


def mini_pointnet_forward(x_nchw, params):
    """x_nchw: (B, F, P, 1) float32  ->  (B, C, 1, 1) float32 (eval-mode BN)."""
    w, b = params["w"], params["b"]
    gamma, beta = params["gamma"], params["beta"]
    run_mean, run_var, eps = (
        params["running_mean"], params["running_var"], params["eps"])

    B, F, P, W1 = x_nchw.shape
    assert W1 == 1, "MiniPointNet expects width-1 input (B, F, P, 1)"
    C = w.shape[1]

    # Fold conv bias + eval-mode BN:
    #   bn(x@w + b) = (x@w) * scale + shift,   scale = gamma / sqrt(var + eps)
    # scale is folded into w (exact: applied per point, before the max); only a
    # per-channel +shift remains, applied after the max together with the ReLU.
    scale = gamma / jnp.sqrt(run_var + eps)                              # (C,)
    w_folded = (w * scale[None, :]).T.reshape(-1).astype(jnp.float32)    # (C*F,)
    shift = ((b - run_mean) * scale + beta).astype(jnp.float32)          # (C,)

    # NCHW stays in place: (B, F, P, 1) -> (B, F*P) is a free reshape; rows are
    # contiguous in HBM and lane-dense in VMEM (no (4,16)->(8,128) tile blowup).
    x2d = jnp.reshape(x_nchw, (B, F * P)).astype(jnp.float32)

    bt, num_steps = _choose_block(B)
    padded_b = bt * num_steps
    if padded_b != B:
        # Only tiny batches (or divisor-free huge ones) take this copy.
        x2d = jnp.pad(x2d, ((0, padded_b - B), (0, 0)))

    # TODO(synk): training-mode BatchNorm (batch statistics / momentum update)
    # is not implemented; eval-mode running-stats semantics are used.
    # TODO(synk): an MXU formulation (W(C,F) @ X(F, B*P)) would free the VPU
    # entirely but needs feature-major input upstream or bf16 rounding; kept on
    # the VPU to preserve float32 numerics.
    out_cb = pl.pallas_call(
        _pointnet_kernel,
        out_shape=jax.ShapeDtypeStruct((C, padded_b), jnp.float32),
        grid=(num_steps,),
        in_specs=[
            pl.BlockSpec(memory_space=pltpu.MemorySpace.SMEM),   # folded weights
            pl.BlockSpec(memory_space=pltpu.MemorySpace.SMEM),   # folded shift
            pl.BlockSpec((bt, F * P), lambda i: (i, 0)),         # x batch block
        ],
        out_specs=pl.BlockSpec((C, bt), lambda i: (0, i)),       # lane-dense out
        compiler_params=pltpu.CompilerParams(
            dimension_semantics=("parallel",),
            vmem_limit_bytes=32 * 1024 * 1024,
        ),
    )(w_folded, shift, x2d)

    # Kernel emits (C, B) with batch on lanes (dense stores); transposing the
    # small pooled result back to NCHW is one tiny XLA op (C floats per point
    # cloud), cheaper than masked 32-lane stores inside the kernel.
    return jnp.transpose(out_cb[:, :B], (1, 0))[:, :, None, None]


def _reference_forward(x_nchw, params):
    """Plain-JAX reference (eval-mode BN) for correctness checking."""
    w, b = params["w"], params["b"]
    gamma, beta = params["gamma"], params["beta"]
    mean, var, eps = params["running_mean"], params["running_var"], params["eps"]
    x = jnp.transpose(x_nchw[:, :, :, 0], (0, 2, 1))          # (B, P, F)
    y = jnp.einsum("bpf,fc->bpc", x, w) + b                    # 1x1 conv
    y = (y - mean) / jnp.sqrt(var + eps) * gamma + beta        # BN (eval)
    y = jnp.maximum(y, 0.0)                                    # ReLU
    y = jnp.max(y, axis=1)                                     # max over points
    return y[:, :, None, None]                                 # (B, C, 1, 1)


if __name__ == "__main__":
    # Small shapes consistent with the module:
    #   nb_features=4, nb_channels=32, max_points=16, batch=2
    B, F, P, C = 2, 4, 16, 32

    key = jax.random.PRNGKey(0)
    kx, kw, kb, kg, kbe, km, kv, kx2 = jax.random.split(key, 8)

    x = jax.random.normal(kx, (B, F, P, 1), dtype=jnp.float32)

    params = {
        # Conv2d(F, C, 1) weight stored as (F, C) for the matmul fold.
        "w": 0.1 * jax.random.normal(kw, (F, C), dtype=jnp.float32),
        "b": 0.1 * jax.random.normal(kb, (C,), dtype=jnp.float32),
        # BatchNorm2d(C, eps=0.001) parameters + running stats (eval-mode BN).
        "gamma": 1.0 + 0.1 * jax.random.normal(kg, (C,), dtype=jnp.float32),
        "beta": 0.1 * jax.random.normal(kbe, (C,), dtype=jnp.float32),
        "running_mean": 0.1 * jax.random.normal(km, (C,), dtype=jnp.float32),
        "running_var": 0.5 + jnp.abs(jax.random.normal(kv, (C,), dtype=jnp.float32)),
        "eps": 0.001,
    }

    # Small-batch (single-block) path.
    out = jax.block_until_ready(mini_pointnet_forward(x, params))
    ref = jax.block_until_ready(_reference_forward(x, params))
    assert out.shape == (B, C, 1, 1), out.shape
    assert jnp.allclose(out, ref, atol=1e-5, rtol=1e-4), "mismatch vs reference"

    # Larger batch exercising the multi-step, pipelined grid path (bt | B, so
    # no padding copy is made).
    B2 = 2560
    x2 = jax.random.normal(kx2, (B2, F, P, 1), dtype=jnp.float32)
    out2 = jax.block_until_ready(mini_pointnet_forward(x2, params))
    ref2 = jax.block_until_ready(_reference_forward(x2, params))
    assert out2.shape == (B2, C, 1, 1), out2.shape
    assert jnp.allclose(out2, ref2, atol=1e-5, rtol=1e-4), "mismatch vs reference (large batch)"

    print("KERNEL_OK")
</pallas_src>

<mosaic_0001>
module attributes {stable_mosaic.version = 11 : i64} {
  func.func @_pointnet_kernel(%arg0: i32, %arg1: memref<128xf32, #tpu.memory_space<smem>>, %arg2: memref<32xf32, #tpu.memory_space<smem>>, %arg3: memref<128x64xf32, #tpu.memory_space<vmem>>, %arg4: memref<32x128xf32, #tpu.memory_space<vmem>>) attributes {dimension_semantics = [#tpu.dimension_semantics<parallel>], iteration_bounds = array<i64: 1>, scalar_prefetch = 0 : i64, scratch_operands = 0 : i64, tpu.core_type = #tpu.core_type<tc>, window_params = [{transform_indices = @transform_0, window_bounds = array<i64: 128>}, {transform_indices = @transform_1, window_bounds = array<i64: 32>}, {transform_indices = @transform_2, window_bounds = array<i64: 128, 64>}, {transform_indices = @transform_3, window_bounds = array<i64: 32, 128>}]} {
    %c0 = arith.constant 0 : index
    %c0_0 = arith.constant 0 : index
    %0 = vector.load %arg3[%c0, %c0_0] : memref<128x64xf32, #tpu.memory_space<vmem>>, vector<128x64xf32>
    %1 = tpu.transpose %0, [1, 0] : vector<128x64xf32> -> vector<64x128xf32>
    %2 = vector.extract_strided_slice %1 {offsets = [0, 0], sizes = [16, 128], strides = [1, 1]} : vector<64x128xf32> to vector<16x128xf32>
    %3 = vector.extract_strided_slice %1 {offsets = [16, 0], sizes = [16, 128], strides = [1, 1]} : vector<64x128xf32> to vector<16x128xf32>
    %4 = vector.extract_strided_slice %1 {offsets = [32, 0], sizes = [16, 128], strides = [1, 1]} : vector<64x128xf32> to vector<16x128xf32>
    %5 = vector.extract_strided_slice %1 {offsets = [48, 0], sizes = [16, 128], strides = [1, 1]} : vector<64x128xf32> to vector<16x128xf32>
    %c0_1 = arith.constant 0 : index
    %6 = memref.load %arg1[%c0_1] : memref<128xf32, #tpu.memory_space<smem>>
    %7 = vector.broadcast %6 : f32 to vector<16x128xf32>
    %8 = arith.mulf %7, %2 : vector<16x128xf32>
    %c1 = arith.constant 1 : index
    %9 = memref.load %arg1[%c1] : memref<128xf32, #tpu.memory_space<smem>>
    %10 = vector.broadcast %9 : f32 to vector<16x128xf32>
    %11 = arith.mulf %10, %3 : vector<16x128xf32>
    %12 = arith.addf %8, %11 : vector<16x128xf32>
    %c2 = arith.constant 2 : index
    %13 = memref.load %arg1[%c2] : memref<128xf32, #tpu.memory_space<smem>>
    %14 = vector.broadcast %13 : f32 to vector<16x128xf32>
    %15 = arith.mulf %14, %4 : vector<16x128xf32>
    %16 = arith.addf %12, %15 : vector<16x128xf32>
    %c3 = arith.constant 3 : index
    %17 = memref.load %arg1[%c3] : memref<128xf32, #tpu.memory_space<smem>>
    %18 = vector.broadcast %17 : f32 to vector<16x128xf32>
    %19 = arith.mulf %18, %5 : vector<16x128xf32>
    %20 = arith.addf %16, %19 : vector<16x128xf32>
    %cst = arith.constant dense<0xFF800000> : vector<128xf32>
    %21 = vector.multi_reduction <maximumf>, %20, %cst [0] : vector<16x128xf32> to vector<128xf32>
    %22 = vector.shape_cast %21 : vector<128xf32> to vector<1x128xf32>
    %c0_2 = arith.constant 0 : index
    %23 = memref.load %arg2[%c0_2] : memref<32xf32, #tpu.memory_space<smem>>
    %24 = vector.broadcast %23 : f32 to vector<1x128xf32>
    %25 = arith.addf %22, %24 : vector<1x128xf32>
    %cst_3 = arith.constant 0.000000e+00 : f32
    %26 = vector.broadcast %cst_3 : f32 to vector<1x128xf32>
    %27 = arith.maximumf %25, %26 : vector<1x128xf32>
    %c0_4 = arith.constant 0 : index
    %c0_5 = arith.constant 0 : index
    %28 = vector.load %arg4[%c0_4, %c0_5] : memref<32x128xf32, #tpu.memory_space<vmem>>, vector<1x128xf32>
    tpu.vector_store %arg4[%c0_4, %c0_5], %27 {strides = array<i32>} : memref<32x128xf32, #tpu.memory_space<vmem>>, vector<1x128xf32>,
    %c4 = arith.constant 4 : index
    %29 = memref.load %arg1[%c4] : memref<128xf32, #tpu.memory_space<smem>>
    %30 = vector.broadcast %29 : f32 to vector<16x128xf32>
    %31 = arith.mulf %30, %2 : vector<16x128xf32>
    %c5 = arith.constant 5 : index
    %32 = memref.load %arg1[%c5] : memref<128xf32, #tpu.memory_space<smem>>
    %33 = vector.broadcast %32 : f32 to vector<16x128xf32>
    %34 = arith.mulf %33, %3 : vector<16x128xf32>
    %35 = arith.addf %31, %34 : vector<16x128xf32>
    %c6 = arith.constant 6 : index
    %36 = memref.load %arg1[%c6] : memref<128xf32, #tpu.memory_space<smem>>
    %37 = vector.broadcast %36 : f32 to vector<16x128xf32>
    %38 = arith.mulf %37, %4 : vector<16x128xf32>
    %39 = arith.addf %35, %38 : vector<16x128xf32>
    %c7 = arith.constant 7 : index
    %40 = memref.load %arg1[%c7] : memref<128xf32, #tpu.memory_space<smem>>
    %41 = vector.broadcast %40 : f32 to vector<16x128xf32>
    %42 = arith.mulf %41, %5 : vector<16x128xf32>
    %43 = arith.addf %39, %42 : vector<16x128xf32>
    %cst_6 = arith.constant dense<0xFF800000> : vector<128xf32>
    %44 = vector.multi_reduction <maximumf>, %43, %cst_6 [0] : vector<16x128xf32> to vector<128xf32>
    %45 = vector.shape_cast %44 : vector<128xf32> to vector<1x128xf32>
    %c1_7 = arith.constant 1 : index
    %46 = memref.load %arg2[%c1_7] : memref<32xf32, #tpu.memory_space<smem>>
    %47 = vector.broadcast %46 : f32 to vector<1x128xf32>
    %48 = arith.addf %45, %47 : vector<1x128xf32>
    %cst_8 = arith.constant 0.000000e+00 : f32
    %49 = vector.broadcast %cst_8 : f32 to vector<1x128xf32>
    %50 = arith.maximumf %48, %49 : vector<1x128xf32>
    %c1_9 = arith.constant 1 : index
    %c0_10 = arith.constant 0 : index
    %51 = vector.load %arg4[%c1_9, %c0_10] : memref<32x128xf32, #tpu.memory_space<vmem>>, vector<1x128xf32>
    tpu.vector_store %arg4[%c1_9, %c0_10], %50 {strides = array<i32>} : memref<32x128xf32, #tpu.memory_space<vmem>>, vector<1x128xf32>,
    %c8 = arith.constant 8 : index
    %52 = memref.load %arg1[%c8] : memref<128xf32, #tpu.memory_space<smem>>
    %53 = vector.broadcast %52 : f32 to vector<16x128xf32>
    %54 = arith.mulf %53, %2 : vector<16x128xf32>
    %c9 = arith.constant 9 : index
    %55 = memref.load %arg1[%c9] : memref<128xf32, #tpu.memory_space<smem>>
    %56 = vector.broadcast %55 : f32 to vector<16x128xf32>
    %57 = arith.mulf %56, %3 : vector<16x128xf32>
    %58 = arith.addf %54, %57 : vector<16x128xf32>
    %c10 = arith.constant 10 : index
    %59 = memref.load %arg1[%c10] : memref<128xf32, #tpu.memory_space<smem>>
    %60 = vector.broadcast %59 : f32 to vector<16x128xf32>
    %61 = arith.mulf %60, %4 : vector<16x128xf32>
    %62 = arith.addf %58, %61 : vector<16x128xf32>
    %c11 = arith.constant 11 : index
    %63 = memref.load %arg1[%c11] : memref<128xf32, #tpu.memory_space<smem>>
    %64 = vector.broadcast %63 : f32 to vector<16x128xf32>
    %65 = arith.mulf %64, %5 : vector<16x128xf32>
    %66 = arith.addf %62, %65 : vector<16x128xf32>
    %cst_11 = arith.constant dense<0xFF800000> : vector<128xf32>
    %67 = vector.multi_reduction <maximumf>, %66, %cst_11 [0] : vector<16x128xf32> to vector<128xf32>
    %68 = vector.shape_cast %67 : vector<128xf32> to vector<1x128xf32>
    %c2_12 = arith.constant 2 : index
    %69 = memref.load %arg2[%c2_12] : memref<32xf32, #tpu.memory_space<smem>>
    %70 = vector.broadcast %69 : f32 to vector<1x128xf32>
    %71 = arith.addf %68, %70 : vector<1x128xf32>
    %cst_13 = arith.constant 0.000000e+00 : f32
    %72 = vector.broadcast %cst_13 : f32 to vector<1x128xf32>
    %73 = arith.maximumf %71, %72 : vector<1x128xf32>
    %c2_14 = arith.constant 2 : index
    %c0_15 = arith.constant 0 : index
    %74 = vector.load %arg4[%c2_14, %c0_15] : memref<32x128xf32, #tpu.memory_space<vmem>>, vector<1x128xf32>
    tpu.vector_store %arg4[%c2_14, %c0_15], %73 {strides = array<i32>} : memref<32x128xf32, #tpu.memory_space<vmem>>, vector<1x128xf32>,
    %c12 = arith.constant 12 : index
    %75 = memref.load %arg1[%c12] : memref<128xf32, #tpu.memory_space<smem>>
    %76 = vector.broadcast %75 : f32 to vector<16x128xf32>
    %77 = arith.mulf %76, %2 : vector<16x128xf32>
    %c13 = arith.constant 13 : index
    %78 = memref.load %arg1[%c13] : memref<128xf32, #tpu.memory_space<smem>>
    %79 = vector.broadcast %78 : f32 to vector<16x128xf32>
    %80 = arith.mulf %79, %3 : vector<16x128xf32>
    %81 = arith.addf %77, %80 : vector<16x128xf32>
    %c14 = arith.constant 14 : index
    %82 = memref.load %arg1[%c14] : memref<128xf32, #tpu.memory_space<smem>>
    %83 = vector.broadcast %82 : f32 to vector<16x128xf32>
    %84 = arith.mulf %83, %4 : vector<16x128xf32>
    %85 = arith.addf %81, %84 : vector<16x128xf32>
    %c15 = arith.constant 15 : index
    %86 = memref.load %arg1[%c15] : memref<128xf32, #tpu.memory_space<smem>>
    %87 = vector.broadcast %86 : f32 to vector<16x128xf32>
    %88 = arith.mulf %87, %5 : vector<16x128xf32>
    %89 = arith.addf %85, %88 : vector<16x128xf32>
    %cst_16 = arith.constant dense<0xFF800000> : vector<128xf32>
    %90 = vector.multi_reduction <maximumf>, %89, %cst_16 [0] : vector<16x128xf32> to vector<128xf32>
    %91 = vector.shape_cast %90 : vector<128xf32> to vector<1x128xf32>
    %c3_17 = arith.constant 3 : index
    %92 = memref.load %arg2[%c3_17] : memref<32xf32, #tpu.memory_space<smem>>
    %93 = vector.broadcast %92 : f32 to vector<1x128xf32>
    %94 = arith.addf %91, %93 : vector<1x128xf32>
    %cst_18 = arith.constant 0.000000e+00 : f32
    %95 = vector.broadcast %cst_18 : f32 to vector<1x128xf32>
    %96 = arith.maximumf %94, %95 : vector<1x128xf32>
    %c3_19 = arith.constant 3 : index
    %c0_20 = arith.constant 0 : index
    %97 = vector.load %arg4[%c3_19, %c0_20] : memref<32x128xf32, #tpu.memory_space<vmem>>, vector<1x128xf32>
    tpu.vector_store %arg4[%c3_19, %c0_20], %96 {strides = array<i32>} : memref<32x128xf32, #tpu.memory_space<vmem>>, vector<1x128xf32>,
    %c16 = arith.constant 16 : index
    %98 = memref.load %arg1[%c16] : memref<128xf32, #tpu.memory_space<smem>>
    %99 = vector.broadcast %98 : f32 to vector<16x128xf32>
    %100 = arith.mulf %99, %2 : vector<16x128xf32>
    %c17 = arith.constant 17 : index
    %101 = memref.load %arg1[%c17] : memref<128xf32, #tpu.memory_space<smem>>
    %102 = vector.broadcast %101 : f32 to vector<16x128xf32>
    %103 = arith.mulf %102, %3 : vector<16x128xf32>
    %104 = arith.addf %100, %103 : vector<16x128xf32>
    %c18 = arith.constant 18 : index
    %105 = memref.load %arg1[%c18] : memref<128xf32, #tpu.memory_space<smem>>
    %106 = vector.broadcast %105 : f32 to vector<16x128xf32>
    %107 = arith.mulf %106, %4 : vector<16x128xf32>
    %108 = arith.addf %104, %107 : vector<16x128xf32>
    %c19 = arith.constant 19 : index
    %109 = memref.load %arg1[%c19] : memref<128xf32, #tpu.memory_space<smem>>
    %110 = vector.broadcast %109 : f32 to vector<16x128xf32>
    %111 = arith.mulf %110, %5 : vector<16x128xf32>
    %112 = arith.addf %108, %111 : vector<16x128xf32>
    %cst_21 = arith.constant dense<0xFF800000> : vector<128xf32>
    %113 = vector.multi_reduction <maximumf>, %112, %cst_21 [0] : vector<16x128xf32> to vector<128xf32>
    %114 = vector.shape_cast %113 : vector<128xf32> to vector<1x128xf32>
    %c4_22 = arith.constant 4 : index
    %115 = memref.load %arg2[%c4_22] : memref<32xf32, #tpu.memory_space<smem>>
    %116 = vector.broadcast %115 : f32 to vector<1x128xf32>
    %117 = arith.addf %114, %116 : vector<1x128xf32>
    %cst_23 = arith.constant 0.000000e+00 : f32
    %118 = vector.broadcast %cst_23 : f32 to vector<1x128xf32>
    %119 = arith.maximumf %117, %118 : vector<1x128xf32>
    %c4_24 = arith.constant 4 : index
    %c0_25 = arith.constant 0 : index
    %120 = vector.load %arg4[%c4_24, %c0_25] : memref<32x128xf32, #tpu.memory_space<vmem>>, vector<1x128xf32>
    tpu.vector_store %arg4[%c4_24, %c0_25], %119 {strides = array<i32>} : memref<32x128xf32, #tpu.memory_space<vmem>>, vector<1x128xf32>,
    %c20 = arith.constant 20 : index
    %121 = memref.load %arg1[%c20] : memref<128xf32, #tpu.memory_space<smem>>
    %122 = vector.broadcast %121 : f32 to vector<16x128xf32>
    %123 = arith.mulf %122, %2 : vector<16x128xf32>
    %c21 = arith.constant 21 : index
    %124 = memref.load %arg1[%c21] : memref<128xf32, #tpu.memory_space<smem>>
    %125 = vector.broadcast %124 : f32 to vector<16x128xf32>
    %126 = arith.mulf %125, %3 : vector<16x128xf32>
    %127 = arith.addf %123, %126 : vector<16x128xf32>
    %c22 = arith.constant 22 : index
    %128 = memref.load %arg1[%c22] : memref<128xf32, #tpu.memory_space<smem>>
    %129 = vector.broadcast %128 : f32 to vector<16x128xf32>
    %130 = arith.mulf %129, %4 : vector<16x128xf32>
    %131 = arith.addf %127, %130 : vector<16x128xf32>
    %c23 = arith.constant 23 : index
    %132 = memref.load %arg1[%c23] : memref<128xf32, #tpu.memory_space<smem>>
    %133 = vector.broadcast %132 : f32 to vector<16x128xf32>
    %134 = arith.mulf %133, %5 : vector<16x128xf32>
    %135 = arith.addf %131, %134 : vector<16x128xf32>
    %cst_26 = arith.constant dense<0xFF800000> : vector<128xf32>
    %136 = vector.multi_reduction <maximumf>, %135, %cst_26 [0] : vector<16x128xf32> to vector<128xf32>
    %137 = vector.shape_cast %136 : vector<128xf32> to vector<1x128xf32>
    %c5_27 = arith.constant 5 : index
    %138 = memref.load %arg2[%c5_27] : memref<32xf32, #tpu.memory_space<smem>>
    %139 = vector.broadcast %138 : f32 to vector<1x128xf32>
    %140 = arith.addf %137, %139 : vector<1x128xf32>
    %cst_28 = arith.constant 0.000000e+00 : f32
    %141 = vector.broadcast %cst_28 : f32 to vector<1x128xf32>
    %142 = arith.maximumf %140, %141 : vector<1x128xf32>
    %c5_29 = arith.constant 5 : index
    %c0_30 = arith.constant 0 : index
    %143 = vector.load %arg4[%c5_29, %c0_30] : memref<32x128xf32, #tpu.memory_space<vmem>>, vector<1x128xf32>
    tpu.vector_store %arg4[%c5_29, %c0_30], %142 {strides = array<i32>} : memref<32x128xf32, #tpu.memory_space<vmem>>, vector<1x128xf32>,
    %c24 = arith.constant 24 : index
    %144 = memref.load %arg1[%c24] : memref<128xf32, #tpu.memory_space<smem>>
    %145 = vector.broadcast %144 : f32 to vector<16x128xf32>
    %146 = arith.mulf %145, %2 : vector<16x128xf32>
    %c25 = arith.constant 25 : index
    %147 = memref.load %arg1[%c25] : memref<128xf32, #tpu.memory_space<smem>>
    %148 = vector.broadcast %147 : f32 to vector<16x128xf32>
    %149 = arith.mulf %148, %3 : vector<16x128xf32>
    %150 = arith.addf %146, %149 : vector<16x128xf32>
    %c26 = arith.constant 26 : index
    %151 = memref.load %arg1[%c26] : memref<128xf32, #tpu.memory_space<smem>>
    %152 = vector.broadcast %151 : f32 to vector<16x128xf32>
    %153 = arith.mulf %152, %4 : vector<16x128xf32>
    %154 = arith.addf %150, %153 : vector<16x128xf32>
    %c27 = arith.constant 27 : index
    %155 = memref.load %arg1[%c27] : memref<128xf32, #tpu.memory_space<smem>>
    %156 = vector.broadcast %155 : f32 to vector<16x128xf32>
    %157 = arith.mulf %156, %5 : vector<16x128xf32>
    %158 = arith.addf %154, %157 : vector<16x128xf32>
    %cst_31 = arith.constant dense<0xFF800000> : vector<128xf32>
    %159 = vector.multi_reduction <maximumf>, %158, %cst_31 [0] : vector<16x128xf32> to vector<128xf32>
    %160 = vector.shape_cast %159 : vector<128xf32> to vector<1x128xf32>
    %c6_32 = arith.constant 6 : index
    %161 = memref.load %arg2[%c6_32] : memref<32xf32, #tpu.memory_space<smem>>
    %162 = vector.broadcast %161 : f32 to vector<1x128xf32>
    %163 = arith.addf %160, %162 : vector<1x128xf32>
    %cst_33 = arith.constant 0.000000e+00 : f32
    %164 = vector.broadcast %cst_33 : f32 to vector<1x128xf32>
    %165 = arith.maximumf %163, %164 : vector<1x128xf32>
    %c6_34 = arith.constant 6 : index
    %c0_35 = arith.constant 0 : index
    %166 = vector.load %arg4[%c6_34, %c0_35] : memref<32x128xf32, #tpu.memory_space<vmem>>, vector<1x128xf32>
    tpu.vector_store %arg4[%c6_34, %c0_35], %165 {strides = array<i32>} : memref<32x128xf32, #tpu.memory_space<vmem>>, vector<1x128xf32>,
    %c28 = arith.constant 28 : index
    %167 = memref.load %arg1[%c28] : memref<128xf32, #tpu.memory_space<smem>>
    %168 = vector.broadcast %167 : f32 to vector<16x128xf32>
    %169 = arith.mulf %168, %2 : vector<16x128xf32>
    %c29 = arith.constant 29 : index
    %170 = memref.load %arg1[%c29] : memref<128xf32, #tpu.memory_space<smem>>
    %171 = vector.broadcast %170 : f32 to vector<16x128xf32>
    %172 = arith.mulf %171, %3 : vector<16x128xf32>
    %173 = arith.addf %169, %172 : vector<16x128xf32>
    %c30 = arith.constant 30 : index
    %174 = memref.load %arg1[%c30] : memref<128xf32, #tpu.memory_space<smem>>
    %175 = vector.broadcast %174 : f32 to vector<16x128xf32>
    %176 = arith.mulf %175, %4 : vector<16x128xf32>
    %177 = arith.addf %173, %176 : vector<16x128xf32>
    %c31 = arith.constant 31 : index
    %178 = memref.load %arg1[%c31] : memref<128xf32, #tpu.memory_space<smem>>
    %179 = vector.broadcast %178 : f32 to vector<16x128xf32>
    %180 = arith.mulf %179, %5 : vector<16x128xf32>
    %181 = arith.addf %177, %180 : vector<16x128xf32>
    %cst_36 = arith.constant dense<0xFF800000> : vector<128xf32>
    %182 = vector.multi_reduction <maximumf>, %181, %cst_36 [0] : vector<16x128xf32> to vector<128xf32>
    %183 = vector.shape_cast %182 : vector<128xf32> to vector<1x128xf32>
    %c7_37 = arith.constant 7 : index
    %184 = memref.load %arg2[%c7_37] : memref<32xf32, #tpu.memory_space<smem>>
    %185 = vector.broadcast %184 : f32 to vector<1x128xf32>
    %186 = arith.addf %183, %185 : vector<1x128xf32>
    %cst_38 = arith.constant 0.000000e+00 : f32
    %187 = vector.broadcast %cst_38 : f32 to vector<1x128xf32>
    %188 = arith.maximumf %186, %187 : vector<1x128xf32>
    %c7_39 = arith.constant 7 : index
    %c0_40 = arith.constant 0 : index
    %189 = vector.load %arg4[%c7_39, %c0_40] : memref<32x128xf32, #tpu.memory_space<vmem>>, vector<1x128xf32>
    tpu.vector_store %arg4[%c7_39, %c0_40], %188 {strides = array<i32>} : memref<32x128xf32, #tpu.memory_space<vmem>>, vector<1x128xf32>,
    %c32 = arith.constant 32 : index
    %190 = memref.load %arg1[%c32] : memref<128xf32, #tpu.memory_space<smem>>
    %191 = vector.broadcast %190 : f32 to vector<16x128xf32>
    %192 = arith.mulf %191, %2 : vector<16x128xf32>
    %c33 = arith.constant 33 : index
    %193 = memref.load %arg1[%c33] : memref<128xf32, #tpu.memory_space<smem>>
    %194 = vector.broadcast %193 : f32 to vector<16x128xf32>
    %195 = arith.mulf %194, %3 : vector<16x128xf32>
    %196 = arith.addf %192, %195 : vector<16x128xf32>
    %c34 = arith.constant 34 : index
    %197 = memref.load %arg1[%c34] : memref<128xf32, #tpu.memory_space<smem>>
    %198 = vector.broadcast %197 : f32 to vector<16x128xf32>
    %199 = arith.mulf %198, %4 : vector<16x128xf32>
    %200 = arith.addf %196, %199 : vector<16x128xf32>
    %c35 = arith.constant 35 : index
    %201 = memref.load %arg1[%c35] : memref<128xf32, #tpu.memory_space<smem>>
    %202 = vector.broadcast %201 : f32 to vector<16x128xf32>
    %203 = arith.mulf %202, %5 : vector<16x128xf32>
    %204 = arith.addf %200, %203 : vector<16x128xf32>
    %cst_41 = arith.constant dense<0xFF800000> : vector<128xf32>
    %205 = vector.multi_reduction <maximumf>, %204, %cst_41 [0] : vector<16x128xf32> to vector<128xf32>
    %206 = vector.shape_cast %205 : vector<128xf32> to vector<1x128xf32>
    %c8_42 = arith.constant 8 : index
    %207 = memref.load %arg2[%c8_42] : memref<32xf32, #tpu.memory_space<smem>>
    %208 = vector.broadcast %207 : f32 to vector<1x128xf32>
    %209 = arith.addf %206, %208 : vector<1x128xf32>
    %cst_43 = arith.constant 0.000000e+00 : f32
    %210 = vector.broadcast %cst_43 : f32 to vector<1x128xf32>
    %211 = arith.maximumf %209, %210 : vector<1x128xf32>
    %c8_44 = arith.constant 8 : index
    %c0_45 = arith.constant 0 : index
    %212 = vector.load %arg4[%c8_44, %c0_45] : memref<32x128xf32, #tpu.memory_space<vmem>>, vector<1x128xf32>
    tpu.vector_store %arg4[%c8_44, %c0_45], %211 {strides = array<i32>} : memref<32x128xf32, #tpu.memory_space<vmem>>, vector<1x128xf32>,
    %c36 = arith.constant 36 : index
    %213 = memref.load %arg1[%c36] : memref<128xf32, #tpu.memory_space<smem>>
    %214 = vector.broadcast %213 : f32 to vector<16x128xf32>
    %215 = arith.mulf %214, %2 : vector<16x128xf32>
    %c37 = arith.constant 37 : index
    %216 = memref.load %arg1[%c37] : memref<128xf32, #tpu.memory_space<smem>>
    %217 = vector.broadcast %216 : f32 to vector<16x128xf32>
    %218 = arith.mulf %217, %3 : vector<16x128xf32>
    %219 = arith.addf %215, %218 : vector<16x128xf32>
    %c38 = arith.constant 38 : index
    %220 = memref.load %arg1[%c38] : memref<128xf32, #tpu.memory_space<smem>>
    %221 = vector.broadcast %220 : f32 to vector<16x128xf32>
    %222 = arith.mulf %221, %4 : vector<16x128xf32>
    %223 = arith.addf %219, %222 : vector<16x128xf32>
    %c39 = arith.constant 39 : index
    %224 = memref.load %arg1[%c39] : memref<128xf32, #tpu.memory_space<smem>>
    %225 = vector.broadcast %224 : f32 to vector<16x128xf32>
    %226 = arith.mulf %225, %5 : vector<16x128xf32>
    %227 = arith.addf %223, %226 : vector<16x128xf32>
    %cst_46 = arith.constant dense<0xFF800000> : vector<128xf32>
    %228 = vector.multi_reduction <maximumf>, %227, %cst_46 [0] : vector<16x128xf32> to vector<128xf32>
    %229 = vector.shape_cast %228 : vector<128xf32> to vector<1x128xf32>
    %c9_47 = arith.constant 9 : index
    %230 = memref.load %arg2[%c9_47] : memref<32xf32, #tpu.memory_space<smem>>
    %231 = vector.broadcast %230 : f32 to vector<1x128xf32>
    %232 = arith.addf %229, %231 : vector<1x128xf32>
    %cst_48 = arith.constant 0.000000e+00 : f32
    %233 = vector.broadcast %cst_48 : f32 to vector<1x128xf32>
    %234 = arith.maximumf %232, %233 : vector<1x128xf32>
    %c9_49 = arith.constant 9 : index
    %c0_50 = arith.constant 0 : index
    %235 = vector.load %arg4[%c9_49, %c0_50] : memref<32x128xf32, #tpu.memory_space<vmem>>, vector<1x128xf32>
    tpu.vector_store %arg4[%c9_49, %c0_50], %234 {strides = array<i32>} : memref<32x128xf32, #tpu.memory_space<vmem>>, vector<1x128xf32>,
    %c40 = arith.constant 40 : index
    %236 = memref.load %arg1[%c40] : memref<128xf32, #tpu.memory_space<smem>>
    %237 = vector.broadcast %236 : f32 to vector<16x128xf32>
    %238 = arith.mulf %237, %2 : vector<16x128xf32>
    %c41 = arith.constant 41 : index
    %239 = memref.load %arg1[%c41] : memref<128xf32, #tpu.memory_space<smem>>
    %240 = vector.broadcast %239 : f32 to vector<16x128xf32>
    %241 = arith.mulf %240, %3 : vector<16x128xf32>
    %242 = arith.addf %238, %241 : vector<16x128xf32>
    %c42 = arith.constant 42 : index
    %243 = memref.load %arg1[%c42] : memref<128xf32, #tpu.memory_space<smem>>
    %244 = vector.broadcast %243 : f32 to vector<16x128xf32>
    %245 = arith.mulf %244, %4 : vector<16x128xf32>
    %246 = arith.addf %242, %245 : vector<16x128xf32>
    %c43 = arith.constant 43 : index
    %247 = memref.load %arg1[%c43] : memref<128xf32, #tpu.memory_space<smem>>
    %248 = vector.broadcast %247 : f32 to vector<16x128xf32>
    %249 = arith.mulf %248, %5 : vector<16x128xf32>
    %250 = arith.addf %246, %249 : vector<16x128xf32>
    %cst_51 = arith.constant dense<0xFF800000> : vector<128xf32>
    %251 = vector.multi_reduction <maximumf>, %250, %cst_51 [0] : vector<16x128xf32> to vector<128xf32>
    %252 = vector.shape_cast %251 : vector<128xf32> to vector<1x128xf32>
    %c10_52 = arith.constant 10 : index
    %253 = memref.load %arg2[%c10_52] : memref<32xf32, #tpu.memory_space<smem>>
    %254 = vector.broadcast %253 : f32 to vector<1x128xf32>
    %255 = arith.addf %252, %254 : vector<1x128xf32>
    %cst_53 = arith.constant 0.000000e+00 : f32
    %256 = vector.broadcast %cst_53 : f32 to vector<1x128xf32>
    %257 = arith.maximumf %255, %256 : vector<1x128xf32>
    %c10_54 = arith.constant 10 : index
    %c0_55 = arith.constant 0 : index
    %258 = vector.load %arg4[%c10_54, %c0_55] : memref<32x128xf32, #tpu.memory_space<vmem>>, vector<1x128xf32>
    tpu.vector_store %arg4[%c10_54, %c0_55], %257 {strides = array<i32>} : memref<32x128xf32, #tpu.memory_space<vmem>>, vector<1x128xf32>,
    %c44 = arith.constant 44 : index
    %259 = memref.load %arg1[%c44] : memref<128xf32, #tpu.memory_space<smem>>
    %260 = vector.broadcast %259 : f32 to vector<16x128xf32>
    %261 = arith.mulf %260, %2 : vector<16x128xf32>
    %c45 = arith.constant 45 : index
    %262 = memref.load %arg1[%c45] : memref<128xf32, #tpu.memory_space<smem>>
    %263 = vector.broadcast %262 : f32 to vector<16x128xf32>
    %264 = arith.mulf %263, %3 : vector<16x128xf32>
    %265 = arith.addf %261, %264 : vector<16x128xf32>
    %c46 = arith.constant 46 : index
    %266 = memref.load %arg1[%c46] : memref<128xf32, #tpu.memory_space<smem>>
    %267 = vector.broadcast %266 : f32 to vector<16x128xf32>
    %268 = arith.mulf %267, %4 : vector<16x128xf32>
    %269 = arith.addf %265, %268 : vector<16x128xf32>
    %c47 = arith.constant 47 : index
    %270 = memref.load %arg1[%c47] : memref<128xf32, #tpu.memory_space<smem>>
    %271 = vector.broadcast %270 : f32 to vector<16x128xf32>
    %272 = arith.mulf %271, %5 : vector<16x128xf32>
    %273 = arith.addf %269, %272 : vector<16x128xf32>
    %cst_56 = arith.constant dense<0xFF800000> : vector<128xf32>
    %274 = vector.multi_reduction <maximumf>, %273, %cst_56 [0] : vector<16x128xf32> to vector<128xf32>
    %275 = vector.shape_cast %274 : vector<128xf32> to vector<1x128xf32>
    %c11_57 = arith.constant 11 : index
    %276 = memref.load %arg2[%c11_57] : memref<32xf32, #tpu.memory_space<smem>>
    %277 = vector.broadcast %276 : f32 to vector<1x128xf32>
    %278 = arith.addf %275, %277 : vector<1x128xf32>
    %cst_58 = arith.constant 0.000000e+00 : f32
    %279 = vector.broadcast %cst_58 : f32 to vector<1x128xf32>
    %280 = arith.maximumf %278, %279 : vector<1x128xf32>
    %c11_59 = arith.constant 11 : index
    %c0_60 = arith.constant 0 : index
    %281 = vector.load %arg4[%c11_59, %c0_60] : memref<32x128xf32, #tpu.memory_space<vmem>>, vector<1x128xf32>
    tpu.vector_store %arg4[%c11_59, %c0_60], %280 {strides = array<i32>} : memref<32x128xf32, #tpu.memory_space<vmem>>, vector<1x128xf32>,
    %c48 = arith.constant 48 : index
    %282 = memref.load %arg1[%c48] : memref<128xf32, #tpu.memory_space<smem>>
    %283 = vector.broadcast %282 : f32 to vector<16x128xf32>
    %284 = arith.mulf %283, %2 : vector<16x128xf32>
    %c49 = arith.constant 49 : index
    %285 = memref.load %arg1[%c49] : memref<128xf32, #tpu.memory_space<smem>>
    %286 = vector.broadcast %285 : f32 to vector<16x128xf32>
    %287 = arith.mulf %286, %3 : vector<16x128xf32>
    %288 = arith.addf %284, %287 : vector<16x128xf32>
    %c50 = arith.constant 50 : index
    %289 = memref.load %arg1[%c50] : memref<128xf32, #tpu.memory_space<smem>>
    %290 = vector.broadcast %289 : f32 to vector<16x128xf32>
    %291 = arith.mulf %290, %4 : vector<16x128xf32>
    %292 = arith.addf %288, %291 : vector<16x128xf32>
    %c51 = arith.constant 51 : index
    %293 = memref.load %arg1[%c51] : memref<128xf32, #tpu.memory_space<smem>>
    %294 = vector.broadcast %293 : f32 to vector<16x128xf32>
    %295 = arith.mulf %294, %5 : vector<16x128xf32>
    %296 = arith.addf %292, %295 : vector<16x128xf32>
    %cst_61 = arith.constant dense<0xFF800000> : vector<128xf32>
    %297 = vector.multi_reduction <maximumf>, %296, %cst_61 [0] : vector<16x128xf32> to vector<128xf32>
    %298 = vector.shape_cast %297 : vector<128xf32> to vector<1x128xf32>
    %c12_62 = arith.constant 12 : index
    %299 = memref.load %arg2[%c12_62] : memref<32xf32, #tpu.memory_space<smem>>
    %300 = vector.broadcast %299 : f32 to vector<1x128xf32>
    %301 = arith.addf %298, %300 : vector<1x128xf32>
    %cst_63 = arith.constant 0.000000e+00 : f32
    %302 = vector.broadcast %cst_63 : f32 to vector<1x128xf32>
    %303 = arith.maximumf %301, %302 : vector<1x128xf32>
    %c12_64 = arith.constant 12 : index
    %c0_65 = arith.constant 0 : index
    %304 = vector.load %arg4[%c12_64, %c0_65] : memref<32x128xf32, #tpu.memory_space<vmem>>, vector<1x128xf32>
    tpu.vector_store %arg4[%c12_64, %c0_65], %303 {strides = array<i32>} : memref<32x128xf32, #tpu.memory_space<vmem>>, vector<1x128xf32>,
    %c52 = arith.constant 52 : index
    %305 = memref.load %arg1[%c52] : memref<128xf32, #tpu.memory_space<smem>>
    %306 = vector.broadcast %305 : f32 to vector<16x128xf32>
    %307 = arith.mulf %306, %2 : vector<16x128xf32>
    %c53 = arith.constant 53 : index
    %308 = memref.load %arg1[%c53] : memref<128xf32, #tpu.memory_space<smem>>
    %309 = vector.broadcast %308 : f32 to vector<16x128xf32>
    %310 = arith.mulf %309, %3 : vector<16x128xf32>
    %311 = arith.addf %307, %310 : vector<16x128xf32>
    %c54 = arith.constant 54 : index
    %312 = memref.load %arg1[%c54] : memref<128xf32, #tpu.memory_space<smem>>
    %313 = vector.broadcast %312 : f32 to vector<16x128xf32>
    %314 = arith.mulf %313, %4 : vector<16x128xf32>
    %315 = arith.addf %311, %314 : vector<16x128xf32>
    %c55 = arith.constant 55 : index
    %316 = memref.load %arg1[%c55] : memref<128xf32, #tpu.memory_space<smem>>
    %317 = vector.broadcast %316 : f32 to vector<16x128xf32>
    %318 = arith.mulf %317, %5 : vector<16x128xf32>
    %319 = arith.addf %315, %318 : vector<16x128xf32>
    %cst_66 = arith.constant dense<0xFF800000> : vector<128xf32>
    %320 = vector.multi_reduction <maximumf>, %319, %cst_66 [0] : vector<16x128xf32> to vector<128xf32>
    %321 = vector.shape_cast %320 : vector<128xf32> to vector<1x128xf32>
    %c13_67 = arith.constant 13 : index
    %322 = memref.load %arg2[%c13_67] : memref<32xf32, #tpu.memory_space<smem>>
    %323 = vector.broadcast %322 : f32 to vector<1x128xf32>
    %324 = arith.addf %321, %323 : vector<1x128xf32>
    %cst_68 = arith.constant 0.000000e+00 : f32
    %325 = vector.broadcast %cst_68 : f32 to vector<1x128xf32>
    %326 = arith.maximumf %324, %325 : vector<1x128xf32>
    %c13_69 = arith.constant 13 : index
    %c0_70 = arith.constant 0 : index
    %327 = vector.load %arg4[%c13_69, %c0_70] : memref<32x128xf32, #tpu.memory_space<vmem>>, vector<1x128xf32>
    tpu.vector_store %arg4[%c13_69, %c0_70], %326 {strides = array<i32>} : memref<32x128xf32, #tpu.memory_space<vmem>>, vector<1x128xf32>,
    %c56 = arith.constant 56 : index
    %328 = memref.load %arg1[%c56] : memref<128xf32, #tpu.memory_space<smem>>
    %329 = vector.broadcast %328 : f32 to vector<16x128xf32>
    %330 = arith.mulf %329, %2 : vector<16x128xf32>
    %c57 = arith.constant 57 : index
    %331 = memref.load %arg1[%c57] : memref<128xf32, #tpu.memory_space<smem>>
    %332 = vector.broadcast %331 : f32 to vector<16x128xf32>
    %333 = arith.mulf %332, %3 : vector<16x128xf32>
    %334 = arith.addf %330, %333 : vector<16x128xf32>
    %c58 = arith.constant 58 : index
    %335 = memref.load %arg1[%c58] : memref<128xf32, #tpu.memory_space<smem>>
    %336 = vector.broadcast %335 : f32 to vector<16x128xf32>
    %337 = arith.mulf %336, %4 : vector<16x128xf32>
    %338 = arith.addf %334, %337 : vector<16x128xf32>
    %c59 = arith.constant 59 : index
    %339 = memref.load %arg1[%c59] : memref<128xf32, #tpu.memory_space<smem>>
    %340 = vector.broadcast %339 : f32 to vector<16x128xf32>
    %341 = arith.mulf %340, %5 : vector<16x128xf32>
    %342 = arith.addf %338, %341 : vector<16x128xf32>
    %cst_71 = arith.constant dense<0xFF800000> : vector<128xf32>
    %343 = vector.multi_reduction <maximumf>, %342, %cst_71 [0] : vector<16x128xf32> to vector<128xf32>
    %344 = vector.shape_cast %343 : vector<128xf32> to vector<1x128xf32>
    %c14_72 = arith.constant 14 : index
    %345 = memref.load %arg2[%c14_72] : memref<32xf32, #tpu.memory_space<smem>>
    %346 = vector.broadcast %345 : f32 to vector<1x128xf32>
    %347 = arith.addf %344, %346 : vector<1x128xf32>
    %cst_73 = arith.constant 0.000000e+00 : f32
    %348 = vector.broadcast %cst_73 : f32 to vector<1x128xf32>
    %349 = arith.maximumf %347, %348 : vector<1x128xf32>
    %c14_74 = arith.constant 14 : index
    %c0_75 = arith.constant 0 : index
    %350 = vector.load %arg4[%c14_74, %c0_75] : memref<32x128xf32, #tpu.memory_space<vmem>>, vector<1x128xf32>
    tpu.vector_store %arg4[%c14_74, %c0_75], %349 {strides = array<i32>} : memref<32x128xf32, #tpu.memory_space<vmem>>, vector<1x128xf32>,
    %c60 = arith.constant 60 : index
    %351 = memref.load %arg1[%c60] : memref<128xf32, #tpu.memory_space<smem>>
    %352 = vector.broadcast %351 : f32 to vector<16x128xf32>
    %353 = arith.mulf %352, %2 : vector<16x128xf32>
    %c61 = arith.constant 61 : index
    %354 = memref.load %arg1[%c61] : memref<128xf32, #tpu.memory_space<smem>>
    %355 = vector.broadcast %354 : f32 to vector<16x128xf32>
    %356 = arith.mulf %355, %3 : vector<16x128xf32>
    %357 = arith.addf %353, %356 : vector<16x128xf32>
    %c62 = arith.constant 62 : index
    %358 = memref.load %arg1[%c62] : memref<128xf32, #tpu.memory_space<smem>>
    %359 = vector.broadcast %358 : f32 to vector<16x128xf32>
    %360 = arith.mulf %359, %4 : vector<16x128xf32>
    %361 = arith.addf %357, %360 : vector<16x128xf32>
    %c63 = arith.constant 63 : index
    %362 = memref.load %arg1[%c63] : memref<128xf32, #tpu.memory_space<smem>>
    %363 = vector.broadcast %362 : f32 to vector<16x128xf32>
    %364 = arith.mulf %363, %5 : vector<16x128xf32>
    %365 = arith.addf %361, %364 : vector<16x128xf32>
    %cst_76 = arith.constant dense<0xFF800000> : vector<128xf32>
    %366 = vector.multi_reduction <maximumf>, %365, %cst_76 [0] : vector<16x128xf32> to vector<128xf32>
    %367 = vector.shape_cast %366 : vector<128xf32> to vector<1x128xf32>
    %c15_77 = arith.constant 15 : index
    %368 = memref.load %arg2[%c15_77] : memref<32xf32, #tpu.memory_space<smem>>
    %369 = vector.broadcast %368 : f32 to vector<1x128xf32>
    %370 = arith.addf %367, %369 : vector<1x128xf32>
    %cst_78 = arith.constant 0.000000e+00 : f32
    %371 = vector.broadcast %cst_78 : f32 to vector<1x128xf32>
    %372 = arith.maximumf %370, %371 : vector<1x128xf32>
    %c15_79 = arith.constant 15 : index
    %c0_80 = arith.constant 0 : index
    %373 = vector.load %arg4[%c15_79, %c0_80] : memref<32x128xf32, #tpu.memory_space<vmem>>, vector<1x128xf32>
    tpu.vector_store %arg4[%c15_79, %c0_80], %372 {strides = array<i32>} : memref<32x128xf32, #tpu.memory_space<vmem>>, vector<1x128xf32>,
    %c64 = arith.constant 64 : index
    %374 = memref.load %arg1[%c64] : memref<128xf32, #tpu.memory_space<smem>>
    %375 = vector.broadcast %374 : f32 to vector<16x128xf32>
    %376 = arith.mulf %375, %2 : vector<16x128xf32>
    %c65 = arith.constant 65 : index
    %377 = memref.load %arg1[%c65] : memref<128xf32, #tpu.memory_space<smem>>
    %378 = vector.broadcast %377 : f32 to vector<16x128xf32>
    %379 = arith.mulf %378, %3 : vector<16x128xf32>
    %380 = arith.addf %376, %379 : vector<16x128xf32>
    %c66 = arith.constant 66 : index
    %381 = memref.load %arg1[%c66] : memref<128xf32, #tpu.memory_space<smem>>
    %382 = vector.broadcast %381 : f32 to vector<16x128xf32>
    %383 = arith.mulf %382, %4 : vector<16x128xf32>
    %384 = arith.addf %380, %383 : vector<16x128xf32>
    %c67 = arith.constant 67 : index
    %385 = memref.load %arg1[%c67] : memref<128xf32, #tpu.memory_space<smem>>
    %386 = vector.broadcast %385 : f32 to vector<16x128xf32>
    %387 = arith.mulf %386, %5 : vector<16x128xf32>
    %388 = arith.addf %384, %387 : vector<16x128xf32>
    %cst_81 = arith.constant dense<0xFF800000> : vector<128xf32>
    %389 = vector.multi_reduction <maximumf>, %388, %cst_81 [0] : vector<16x128xf32> to vector<128xf32>
    %390 = vector.shape_cast %389 : vector<128xf32> to vector<1x128xf32>
    %c16_82 = arith.constant 16 : index
    %391 = memref.load %arg2[%c16_82] : memref<32xf32, #tpu.memory_space<smem>>
    %392 = vector.broadcast %391 : f32 to vector<1x128xf32>
    %393 = arith.addf %390, %392 : vector<1x128xf32>
    %cst_83 = arith.constant 0.000000e+00 : f32
    %394 = vector.broadcast %cst_83 : f32 to vector<1x128xf32>
    %395 = arith.maximumf %393, %394 : vector<1x128xf32>
    %c16_84 = arith.constant 16 : index
    %c0_85 = arith.constant 0 : index
    %396 = vector.load %arg4[%c16_84, %c0_85] : memref<32x128xf32, #tpu.memory_space<vmem>>, vector<1x128xf32>
    tpu.vector_store %arg4[%c16_84, %c0_85], %395 {strides = array<i32>} : memref<32x128xf32, #tpu.memory_space<vmem>>, vector<1x128xf32>,
    %c68 = arith.constant 68 : index
    %397 = memref.load %arg1[%c68] : memref<128xf32, #tpu.memory_space<smem>>
    %398 = vector.broadcast %397 : f32 to vector<16x128xf32>
    %399 = arith.mulf %398, %2 : vector<16x128xf32>
    %c69 = arith.constant 69 : index
    %400 = memref.load %arg1[%c69] : memref<128xf32, #tpu.memory_space<smem>>
    %401 = vector.broadcast %400 : f32 to vector<16x128xf32>
    %402 = arith.mulf %401, %3 : vector<16x128xf32>
    %403 = arith.addf %399, %402 : vector<16x128xf32>
    %c70 = arith.constant 70 : index
    %404 = memref.load %arg1[%c70] : memref<128xf32, #tpu.memory_space<smem>>
    %405 = vector.broadcast %404 : f32 to vector<16x128xf32>
    %406 = arith.mulf %405, %4 : vector<16x128xf32>
    %407 = arith.addf %403, %406 : vector<16x128xf32>
    %c71 = arith.constant 71 : index
    %408 = memref.load %arg1[%c71] : memref<128xf32, #tpu.memory_space<smem>>
    %409 = vector.broadcast %408 : f32 to vector<16x128xf32>
    %410 = arith.mulf %409, %5 : vector<16x128xf32>
    %411 = arith.addf %407, %410 : vector<16x128xf32>
    %cst_86 = arith.constant dense<0xFF800000> : vector<128xf32>
    %412 = vector.multi_reduction <maximumf>, %411, %cst_86 [0] : vector<16x128xf32> to vector<128xf32>
    %413 = vector.shape_cast %412 : vector<128xf32> to vector<1x128xf32>
    %c17_87 = arith.constant 17 : index
    %414 = memref.load %arg2[%c17_87] : memref<32xf32, #tpu.memory_space<smem>>
    %415 = vector.broadcast %414 : f32 to vector<1x128xf32>
    %416 = arith.addf %413, %415 : vector<1x128xf32>
    %cst_88 = arith.constant 0.000000e+00 : f32
    %417 = vector.broadcast %cst_88 : f32 to vector<1x128xf32>
    %418 = arith.maximumf %416, %417 : vector<1x128xf32>
    %c17_89 = arith.constant 17 : index
    %c0_90 = arith.constant 0 : index
    %419 = vector.load %arg4[%c17_89, %c0_90] : memref<32x128xf32, #tpu.memory_space<vmem>>, vector<1x128xf32>
    tpu.vector_store %arg4[%c17_89, %c0_90], %418 {strides = array<i32>} : memref<32x128xf32, #tpu.memory_space<vmem>>, vector<1x128xf32>,
    %c72 = arith.constant 72 : index
    %420 = memref.load %arg1[%c72] : memref<128xf32, #tpu.memory_space<smem>>
    %421 = vector.broadcast %420 : f32 to vector<16x128xf32>
    %422 = arith.mulf %421, %2 : vector<16x128xf32>
    %c73 = arith.constant 73 : index
    %423 = memref.load %arg1[%c73] : memref<128xf32, #tpu.memory_space<smem>>
    %424 = vector.broadcast %423 : f32 to vector<16x128xf32>
    %425 = arith.mulf %424, %3 : vector<16x128xf32>
    %426 = arith.addf %422, %425 : vector<16x128xf32>
    %c74 = arith.constant 74 : index
    %427 = memref.load %arg1[%c74] : memref<128xf32, #tpu.memory_space<smem>>
    %428 = vector.broadcast %427 : f32 to vector<16x128xf32>
    %429 = arith.mulf %428, %4 : vector<16x128xf32>
    %430 = arith.addf %426, %429 : vector<16x128xf32>
    %c75 = arith.constant 75 : index
    %431 = memref.load %arg1[%c75] : memref<128xf32, #tpu.memory_space<smem>>
    %432 = vector.broadcast %431 : f32 to vector<16x128xf32>
    %433 = arith.mulf %432, %5 : vector<16x128xf32>
    %434 = arith.addf %430, %433 : vector<16x128xf32>
    %cst_91 = arith.constant dense<0xFF800000> : vector<128xf32>
    %435 = vector.multi_reduction <maximumf>, %434, %cst_91 [0] : vector<16x128xf32> to vector<128xf32>
    %436 = vector.shape_cast %435 : vector<128xf32> to vector<1x128xf32>
    %c18_92 = arith.constant 18 : index
    %437 = memref.load %arg2[%c18_92] : memref<32xf32, #tpu.memory_space<smem>>
    %438 = vector.broadcast %437 : f32 to vector<1x128xf32>
    %439 = arith.addf %436, %438 : vector<1x128xf32>
    %cst_93 = arith.constant 0.000000e+00 : f32
    %440 = vector.broadcast %cst_93 : f32 to vector<1x128xf32>
    %441 = arith.maximumf %439, %440 : vector<1x128xf32>
    %c18_94 = arith.constant 18 : index
    %c0_95 = arith.constant 0 : index
    %442 = vector.load %arg4[%c18_94, %c0_95] : memref<32x128xf32, #tpu.memory_space<vmem>>, vector<1x128xf32>
    tpu.vector_store %arg4[%c18_94, %c0_95], %441 {strides = array<i32>} : memref<32x128xf32, #tpu.memory_space<vmem>>, vector<1x128xf32>,
    %c76 = arith.constant 76 : index
    %443 = memref.load %arg1[%c76] : memref<128xf32, #tpu.memory_space<smem>>
    %444 = vector.broadcast %443 : f32 to vector<16x128xf32>
    %445 = arith.mulf %444, %2 : vector<16x128xf32>
    %c77 = arith.constant 77 : index
    %446 = memref.load %arg1[%c77] : memref<128xf32, #tpu.memory_space<smem>>
    %447 = vector.broadcast %446 : f32 to vector<16x128xf32>
    %448 = arith.mulf %447, %3 : vector<16x128xf32>
    %449 = arith.addf %445, %448 : vector<16x128xf32>
    %c78 = arith.constant 78 : index
    %450 = memref.load %arg1[%c78] : memref<128xf32, #tpu.memory_space<smem>>
    %451 = vector.broadcast %450 : f32 to vector<16x128xf32>
    %452 = arith.mulf %451, %4 : vector<16x128xf32>
    %453 = arith.addf %449, %452 : vector<16x128xf32>
    %c79 = arith.constant 79 : index
    %454 = memref.load %arg1[%c79] : memref<128xf32, #tpu.memory_space<smem>>
    %455 = vector.broadcast %454 : f32 to vector<16x128xf32>
    %456 = arith.mulf %455, %5 : vector<16x128xf32>
    %457 = arith.addf %453, %456 : vector<16x128xf32>
    %cst_96 = arith.constant dense<0xFF800000> : vector<128xf32>
    %458 = vector.multi_reduction <maximumf>, %457, %cst_96 [0] : vector<16x128xf32> to vector<128xf32>
    %459 = vector.shape_cast %458 : vector<128xf32> to vector<1x128xf32>
    %c19_97 = arith.constant 19 : index
    %460 = memref.load %arg2[%c19_97] : memref<32xf32, #tpu.memory_space<smem>>
    %461 = vector.broadcast %460 : f32 to vector<1x128xf32>
    %462 = arith.addf %459, %461 : vector<1x128xf32>
    %cst_98 = arith.constant 0.000000e+00 : f32
    %463 = vector.broadcast %cst_98 : f32 to vector<1x128xf32>
    %464 = arith.maximumf %462, %463 : vector<1x128xf32>
    %c19_99 = arith.constant 19 : index
    %c0_100 = arith.constant 0 : index
    %465 = vector.load %arg4[%c19_99, %c0_100] : memref<32x128xf32, #tpu.memory_space<vmem>>, vector<1x128xf32>
    tpu.vector_store %arg4[%c19_99, %c0_100], %464 {strides = array<i32>} : memref<32x128xf32, #tpu.memory_space<vmem>>, vector<1x128xf32>,
    %c80 = arith.constant 80 : index
    %466 = memref.load %arg1[%c80] : memref<128xf32, #tpu.memory_space<smem>>
    %467 = vector.broadcast %466 : f32 to vector<16x128xf32>
    %468 = arith.mulf %467, %2 : vector<16x128xf32>
    %c81 = arith.constant 81 : index
    %469 = memref.load %arg1[%c81] : memref<128xf32, #tpu.memory_space<smem>>
    %470 = vector.broadcast %469 : f32 to vector<16x128xf32>
    %471 = arith.mulf %470, %3 : vector<16x128xf32>
    %472 = arith.addf %468, %471 : vector<16x128xf32>
    %c82 = arith.constant 82 : index
    %473 = memref.load %arg1[%c82] : memref<128xf32, #tpu.memory_space<smem>>
    %474 = vector.broadcast %473 : f32 to vector<16x128xf32>
    %475 = arith.mulf %474, %4 : vector<16x128xf32>
    %476 = arith.addf %472, %475 : vector<16x128xf32>
    %c83 = arith.constant 83 : index
    %477 = memref.load %arg1[%c83] : memref<128xf32, #tpu.memory_space<smem>>
    %478 = vector.broadcast %477 : f32 to vector<16x128xf32>
    %479 = arith.mulf %478, %5 : vector<16x128xf32>
    %480 = arith.addf %476, %479 : vector<16x128xf32>
    %cst_101 = arith.constant dense<0xFF800000> : vector<128xf32>
    %481 = vector.multi_reduction <maximumf>, %480, %cst_101 [0] : vector<16x128xf32> to vector<128xf32>
    %482 = vector.shape_cast %481 : vector<128xf32> to vector<1x128xf32>
    %c20_102 = arith.constant 20 : index
    %483 = memref.load %arg2[%c20_102] : memref<32xf32, #tpu.memory_space<smem>>
    %484 = vector.broadcast %483 : f32 to vector<1x128xf32>
    %485 = arith.addf %482, %484 : vector<1x128xf32>
    %cst_103 = arith.constant 0.000000e+00 : f32
    %486 = vector.broadcast %cst_103 : f32 to vector<1x128xf32>
    %487 = arith.maximumf %485, %486 : vector<1x128xf32>
    %c20_104 = arith.constant 20 : index
    %c0_105 = arith.constant 0 : index
    %488 = vector.load %arg4[%c20_104, %c0_105] : memref<32x128xf32, #tpu.memory_space<vmem>>, vector<1x128xf32>
    tpu.vector_store %arg4[%c20_104, %c0_105], %487 {strides = array<i32>} : memref<32x128xf32, #tpu.memory_space<vmem>>, vector<1x128xf32>,
    %c84 = arith.constant 84 : index
    %489 = memref.load %arg1[%c84] : memref<128xf32, #tpu.memory_space<smem>>
    %490 = vector.broadcast %489 : f32 to vector<16x128xf32>
    %491 = arith.mulf %490, %2 : vector<16x128xf32>
    %c85 = arith.constant 85 : index
    %492 = memref.load %arg1[%c85] : memref<128xf32, #tpu.memory_space<smem>>
    %493 = vector.broadcast %492 : f32 to vector<16x128xf32>
    %494 = arith.mulf %493, %3 : vector<16x128xf32>
    %495 = arith.addf %491, %494 : vector<16x128xf32>
    %c86 = arith.constant 86 : index
    %496 = memref.load %arg1[%c86] : memref<128xf32, #tpu.memory_space<smem>>
    %497 = vector.broadcast %496 : f32 to vector<16x128xf32>
    %498 = arith.mulf %497, %4 : vector<16x128xf32>
    %499 = arith.addf %495, %498 : vector<16x128xf32>
    %c87 = arith.constant 87 : index
    %500 = memref.load %arg1[%c87] : memref<128xf32, #tpu.memory_space<smem>>
    %501 = vector.broadcast %500 : f32 to vector<16x128xf32>
    %502 = arith.mulf %501, %5 : vector<16x128xf32>
    %503 = arith.addf %499, %502 : vector<16x128xf32>
    %cst_106 = arith.constant dense<0xFF800000> : vector<128xf32>
    %504 = vector.multi_reduction <maximumf>, %503, %cst_106 [0] : vector<16x128xf32> to vector<128xf32>
    %505 = vector.shape_cast %504 : vector<128xf32> to vector<1x128xf32>
    %c21_107 = arith.constant 21 : index
    %506 = memref.load %arg2[%c21_107] : memref<32xf32, #tpu.memory_space<smem>>
    %507 = vector.broadcast %506 : f32 to vector<1x128xf32>
    %508 = arith.addf %505, %507 : vector<1x128xf32>
    %cst_108 = arith.constant 0.000000e+00 : f32
    %509 = vector.broadcast %cst_108 : f32 to vector<1x128xf32>
    %510 = arith.maximumf %508, %509 : vector<1x128xf32>
    %c21_109 = arith.constant 21 : index
    %c0_110 = arith.constant 0 : index
    %511 = vector.load %arg4[%c21_109, %c0_110] : memref<32x128xf32, #tpu.memory_space<vmem>>, vector<1x128xf32>
    tpu.vector_store %arg4[%c21_109, %c0_110], %510 {strides = array<i32>} : memref<32x128xf32, #tpu.memory_space<vmem>>, vector<1x128xf32>,
    %c88 = arith.constant 88 : index
    %512 = memref.load %arg1[%c88] : memref<128xf32, #tpu.memory_space<smem>>
    %513 = vector.broadcast %512 : f32 to vector<16x128xf32>
    %514 = arith.mulf %513, %2 : vector<16x128xf32>
    %c89 = arith.constant 89 : index
    %515 = memref.load %arg1[%c89] : memref<128xf32, #tpu.memory_space<smem>>
    %516 = vector.broadcast %515 : f32 to vector<16x128xf32>
    %517 = arith.mulf %516, %3 : vector<16x128xf32>
    %518 = arith.addf %514, %517 : vector<16x128xf32>
    %c90 = arith.constant 90 : index
    %519 = memref.load %arg1[%c90] : memref<128xf32, #tpu.memory_space<smem>>
    %520 = vector.broadcast %519 : f32 to vector<16x128xf32>
    %521 = arith.mulf %520, %4 : vector<16x128xf32>
    %522 = arith.addf %518, %521 : vector<16x128xf32>
    %c91 = arith.constant 91 : index
    %523 = memref.load %arg1[%c91] : memref<128xf32, #tpu.memory_space<smem>>
    %524 = vector.broadcast %523 : f32 to vector<16x128xf32>
    %525 = arith.mulf %524, %5 : vector<16x128xf32>
    %526 = arith.addf %522, %525 : vector<16x128xf32>
    %cst_111 = arith.constant dense<0xFF800000> : vector<128xf32>
    %527 = vector.multi_reduction <maximumf>, %526, %cst_111 [0] : vector<16x128xf32> to vector<128xf32>
    %528 = vector.shape_cast %527 : vector<128xf32> to vector<1x128xf32>
    %c22_112 = arith.constant 22 : index
    %529 = memref.load %arg2[%c22_112] : memref<32xf32, #tpu.memory_space<smem>>
    %530 = vector.broadcast %529 : f32 to vector<1x128xf32>
    %531 = arith.addf %528, %530 : vector<1x128xf32>
    %cst_113 = arith.constant 0.000000e+00 : f32
    %532 = vector.broadcast %cst_113 : f32 to vector<1x128xf32>
    %533 = arith.maximumf %531, %532 : vector<1x128xf32>
    %c22_114 = arith.constant 22 : index
    %c0_115 = arith.constant 0 : index
    %534 = vector.load %arg4[%c22_114, %c0_115] : memref<32x128xf32, #tpu.memory_space<vmem>>, vector<1x128xf32>
    tpu.vector_store %arg4[%c22_114, %c0_115], %533 {strides = array<i32>} : memref<32x128xf32, #tpu.memory_space<vmem>>, vector<1x128xf32>,
    %c92 = arith.constant 92 : index
    %535 = memref.load %arg1[%c92] : memref<128xf32, #tpu.memory_space<smem>>
    %536 = vector.broadcast %535 : f32 to vector<16x128xf32>
    %537 = arith.mulf %536, %2 : vector<16x128xf32>
    %c93 = arith.constant 93 : index
    %538 = memref.load %arg1[%c93] : memref<128xf32, #tpu.memory_space<smem>>
    %539 = vector.broadcast %538 : f32 to vector<16x128xf32>
    %540 = arith.mulf %539, %3 : vector<16x128xf32>
    %541 = arith.addf %537, %540 : vector<16x128xf32>
    %c94 = arith.constant 94 : index
    %542 = memref.load %arg1[%c94] : memref<128xf32, #tpu.memory_space<smem>>
    %543 = vector.broadcast %542 : f32 to vector<16x128xf32>
    %544 = arith.mulf %543, %4 : vector<16x128xf32>
    %545 = arith.addf %541, %544 : vector<16x128xf32>
    %c95 = arith.constant 95 : index
    %546 = memref.load %arg1[%c95] : memref<128xf32, #tpu.memory_space<smem>>
    %547 = vector.broadcast %546 : f32 to vector<16x128xf32>
    %548 = arith.mulf %547, %5 : vector<16x128xf32>
    %549 = arith.addf %545, %548 : vector<16x128xf32>
    %cst_116 = arith.constant dense<0xFF800000> : vector<128xf32>
    %550 = vector.multi_reduction <maximumf>, %549, %cst_116 [0] : vector<16x128xf32> to vector<128xf32>
    %551 = vector.shape_cast %550 : vector<128xf32> to vector<1x128xf32>
    %c23_117 = arith.constant 23 : index
    %552 = memref.load %arg2[%c23_117] : memref<32xf32, #tpu.memory_space<smem>>
    %553 = vector.broadcast %552 : f32 to vector<1x128xf32>
    %554 = arith.addf %551, %553 : vector<1x128xf32>
    %cst_118 = arith.constant 0.000000e+00 : f32
    %555 = vector.broadcast %cst_118 : f32 to vector<1x128xf32>
    %556 = arith.maximumf %554, %555 : vector<1x128xf32>
    %c23_119 = arith.constant 23 : index
    %c0_120 = arith.constant 0 : index
    %557 = vector.load %arg4[%c23_119, %c0_120] : memref<32x128xf32, #tpu.memory_space<vmem>>, vector<1x128xf32>
    tpu.vector_store %arg4[%c23_119, %c0_120], %556 {strides = array<i32>} : memref<32x128xf32, #tpu.memory_space<vmem>>, vector<1x128xf32>,
    %c96 = arith.constant 96 : index
    %558 = memref.load %arg1[%c96] : memref<128xf32, #tpu.memory_space<smem>>
    %559 = vector.broadcast %558 : f32 to vector<16x128xf32>
    %560 = arith.mulf %559, %2 : vector<16x128xf32>
    %c97 = arith.constant 97 : index
    %561 = memref.load %arg1[%c97] : memref<128xf32, #tpu.memory_space<smem>>
    %562 = vector.broadcast %561 : f32 to vector<16x128xf32>
    %563 = arith.mulf %562, %3 : vector<16x128xf32>
    %564 = arith.addf %560, %563 : vector<16x128xf32>
    %c98 = arith.constant 98 : index
    %565 = memref.load %arg1[%c98] : memref<128xf32, #tpu.memory_space<smem>>
    %566 = vector.broadcast %565 : f32 to vector<16x128xf32>
    %567 = arith.mulf %566, %4 : vector<16x128xf32>
    %568 = arith.addf %564, %567 : vector<16x128xf32>
    %c99 = arith.constant 99 : index
    %569 = memref.load %arg1[%c99] : memref<128xf32, #tpu.memory_space<smem>>
    %570 = vector.broadcast %569 : f32 to vector<16x128xf32>
    %571 = arith.mulf %570, %5 : vector<16x128xf32>
    %572 = arith.addf %568, %571 : vector<16x128xf32>
    %cst_121 = arith.constant dense<0xFF800000> : vector<128xf32>
    %573 = vector.multi_reduction <maximumf>, %572, %cst_121 [0] : vector<16x128xf32> to vector<128xf32>
    %574 = vector.shape_cast %573 : vector<128xf32> to vector<1x128xf32>
    %c24_122 = arith.constant 24 : index
    %575 = memref.load %arg2[%c24_122] : memref<32xf32, #tpu.memory_space<smem>>
    %576 = vector.broadcast %575 : f32 to vector<1x128xf32>
    %577 = arith.addf %574, %576 : vector<1x128xf32>
    %cst_123 = arith.constant 0.000000e+00 : f32
    %578 = vector.broadcast %cst_123 : f32 to vector<1x128xf32>
    %579 = arith.maximumf %577, %578 : vector<1x128xf32>
    %c24_124 = arith.constant 24 : index
    %c0_125 = arith.constant 0 : index
    %580 = vector.load %arg4[%c24_124, %c0_125] : memref<32x128xf32, #tpu.memory_space<vmem>>, vector<1x128xf32>
    tpu.vector_store %arg4[%c24_124, %c0_125], %579 {strides = array<i32>} : memref<32x128xf32, #tpu.memory_space<vmem>>, vector<1x128xf32>,
    %c100 = arith.constant 100 : index
    %581 = memref.load %arg1[%c100] : memref<128xf32, #tpu.memory_space<smem>>
    %582 = vector.broadcast %581 : f32 to vector<16x128xf32>
    %583 = arith.mulf %582, %2 : vector<16x128xf32>
    %c101 = arith.constant 101 : index
    %584 = memref.load %arg1[%c101] : memref<128xf32, #tpu.memory_space<smem>>
    %585 = vector.broadcast %584 : f32 to vector<16x128xf32>
    %586 = arith.mulf %585, %3 : vector<16x128xf32>
    %587 = arith.addf %583, %586 : vector<16x128xf32>
    %c102 = arith.constant 102 : index
    %588 = memref.load %arg1[%c102] : memref<128xf32, #tpu.memory_space<smem>>
    %589 = vector.broadcast %588 : f32 to vector<16x128xf32>
    %590 = arith.mulf %589, %4 : vector<16x128xf32>
    %591 = arith.addf %587, %590 : vector<16x128xf32>
    %c103 = arith.constant 103 : index
    %592 = memref.load %arg1[%c103] : memref<128xf32, #tpu.memory_space<smem>>
    %593 = vector.broadcast %592 : f32 to vector<16x128xf32>
    %594 = arith.mulf %593, %5 : vector<16x128xf32>
    %595 = arith.addf %591, %594 : vector<16x128xf32>
    %cst_126 = arith.constant dense<0xFF800000> : vector<128xf32>
    %596 = vector.multi_reduction <maximumf>, %595, %cst_126 [0] : vector<16x128xf32> to vector<128xf32>
    %597 = vector.shape_cast %596 : vector<128xf32> to vector<1x128xf32>
    %c25_127 = arith.constant 25 : index
    %598 = memref.load %arg2[%c25_127] : memref<32xf32, #tpu.memory_space<smem>>
    %599 = vector.broadcast %598 : f32 to vector<1x128xf32>
    %600 = arith.addf %597, %599 : vector<1x128xf32>
    %cst_128 = arith.constant 0.000000e+00 : f32
    %601 = vector.broadcast %cst_128 : f32 to vector<1x128xf32>
    %602 = arith.maximumf %600, %601 : vector<1x128xf32>
    %c25_129 = arith.constant 25 : index
    %c0_130 = arith.constant 0 : index
    %603 = vector.load %arg4[%c25_129, %c0_130] : memref<32x128xf32, #tpu.memory_space<vmem>>, vector<1x128xf32>
    tpu.vector_store %arg4[%c25_129, %c0_130], %602 {strides = array<i32>} : memref<32x128xf32, #tpu.memory_space<vmem>>, vector<1x128xf32>,
    %c104 = arith.constant 104 : index
    %604 = memref.load %arg1[%c104] : memref<128xf32, #tpu.memory_space<smem>>
    %605 = vector.broadcast %604 : f32 to vector<16x128xf32>
    %606 = arith.mulf %605, %2 : vector<16x128xf32>
    %c105 = arith.constant 105 : index
    %607 = memref.load %arg1[%c105] : memref<128xf32, #tpu.memory_space<smem>>
    %608 = vector.broadcast %607 : f32 to vector<16x128xf32>
    %609 = arith.mulf %608, %3 : vector<16x128xf32>
    %610 = arith.addf %606, %609 : vector<16x128xf32>
    %c106 = arith.constant 106 : index
    %611 = memref.load %arg1[%c106] : memref<128xf32, #tpu.memory_space<smem>>
    %612 = vector.broadcast %611 : f32 to vector<16x128xf32>
    %613 = arith.mulf %612, %4 : vector<16x128xf32>
    %614 = arith.addf %610, %613 : vector<16x128xf32>
    %c107 = arith.constant 107 : index
    %615 = memref.load %arg1[%c107] : memref<128xf32, #tpu.memory_space<smem>>
    %616 = vector.broadcast %615 : f32 to vector<16x128xf32>
    %617 = arith.mulf %616, %5 : vector<16x128xf32>
    %618 = arith.addf %614, %617 : vector<16x128xf32>
    %cst_131 = arith.constant dense<0xFF800000> : vector<128xf32>
    %619 = vector.multi_reduction <maximumf>, %618, %cst_131 [0] : vector<16x128xf32> to vector<128xf32>
    %620 = vector.shape_cast %619 : vector<128xf32> to vector<1x128xf32>
    %c26_132 = arith.constant 26 : index
    %621 = memref.load %arg2[%c26_132] : memref<32xf32, #tpu.memory_space<smem>>
    %622 = vector.broadcast %621 : f32 to vector<1x128xf32>
    %623 = arith.addf %620, %622 : vector<1x128xf32>
    %cst_133 = arith.constant 0.000000e+00 : f32
    %624 = vector.broadcast %cst_133 : f32 to vector<1x128xf32>
    %625 = arith.maximumf %623, %624 : vector<1x128xf32>
    %c26_134 = arith.constant 26 : index
    %c0_135 = arith.constant 0 : index
    %626 = vector.load %arg4[%c26_134, %c0_135] : memref<32x128xf32, #tpu.memory_space<vmem>>, vector<1x128xf32>
    tpu.vector_store %arg4[%c26_134, %c0_135], %625 {strides = array<i32>} : memref<32x128xf32, #tpu.memory_space<vmem>>, vector<1x128xf32>,
    %c108 = arith.constant 108 : index
    %627 = memref.load %arg1[%c108] : memref<128xf32, #tpu.memory_space<smem>>
    %628 = vector.broadcast %627 : f32 to vector<16x128xf32>
    %629 = arith.mulf %628, %2 : vector<16x128xf32>
    %c109 = arith.constant 109 : index
    %630 = memref.load %arg1[%c109] : memref<128xf32, #tpu.memory_space<smem>>
    %631 = vector.broadcast %630 : f32 to vector<16x128xf32>
    %632 = arith.mulf %631, %3 : vector<16x128xf32>
    %633 = arith.addf %629, %632 : vector<16x128xf32>
    %c110 = arith.constant 110 : index
    %634 = memref.load %arg1[%c110] : memref<128xf32, #tpu.memory_space<smem>>
    %635 = vector.broadcast %634 : f32 to vector<16x128xf32>
    %636 = arith.mulf %635, %4 : vector<16x128xf32>
    %637 = arith.addf %633, %636 : vector<16x128xf32>
    %c111 = arith.constant 111 : index
    %638 = memref.load %arg1[%c111] : memref<128xf32, #tpu.memory_space<smem>>
    %639 = vector.broadcast %638 : f32 to vector<16x128xf32>
    %640 = arith.mulf %639, %5 : vector<16x128xf32>
    %641 = arith.addf %637, %640 : vector<16x128xf32>
    %cst_136 = arith.constant dense<0xFF800000> : vector<128xf32>
    %642 = vector.multi_reduction <maximumf>, %641, %cst_136 [0] : vector<16x128xf32> to vector<128xf32>
    %643 = vector.shape_cast %642 : vector<128xf32> to vector<1x128xf32>
    %c27_137 = arith.constant 27 : index
    %644 = memref.load %arg2[%c27_137] : memref<32xf32, #tpu.memory_space<smem>>
    %645 = vector.broadcast %644 : f32 to vector<1x128xf32>
    %646 = arith.addf %643, %645 : vector<1x128xf32>
    %cst_138 = arith.constant 0.000000e+00 : f32
    %647 = vector.broadcast %cst_138 : f32 to vector<1x128xf32>
    %648 = arith.maximumf %646, %647 : vector<1x128xf32>
    %c27_139 = arith.constant 27 : index
    %c0_140 = arith.constant 0 : index
    %649 = vector.load %arg4[%c27_139, %c0_140] : memref<32x128xf32, #tpu.memory_space<vmem>>, vector<1x128xf32>
    tpu.vector_store %arg4[%c27_139, %c0_140], %648 {strides = array<i32>} : memref<32x128xf32, #tpu.memory_space<vmem>>, vector<1x128xf32>,
    %c112 = arith.constant 112 : index
    %650 = memref.load %arg1[%c112] : memref<128xf32, #tpu.memory_space<smem>>
    %651 = vector.broadcast %650 : f32 to vector<16x128xf32>
    %652 = arith.mulf %651, %2 : vector<16x128xf32>
    %c113 = arith.constant 113 : index
    %653 = memref.load %arg1[%c113] : memref<128xf32, #tpu.memory_space<smem>>
    %654 = vector.broadcast %653 : f32 to vector<16x128xf32>
    %655 = arith.mulf %654, %3 : vector<16x128xf32>
    %656 = arith.addf %652, %655 : vector<16x128xf32>
    %c114 = arith.constant 114 : index
    %657 = memref.load %arg1[%c114] : memref<128xf32, #tpu.memory_space<smem>>
    %658 = vector.broadcast %657 : f32 to vector<16x128xf32>
    %659 = arith.mulf %658, %4 : vector<16x128xf32>
    %660 = arith.addf %656, %659 : vector<16x128xf32>
    %c115 = arith.constant 115 : index
    %661 = memref.load %arg1[%c115] : memref<128xf32, #tpu.memory_space<smem>>
    %662 = vector.broadcast %661 : f32 to vector<16x128xf32>
    %663 = arith.mulf %662, %5 : vector<16x128xf32>
    %664 = arith.addf %660, %663 : vector<16x128xf32>
    %cst_141 = arith.constant dense<0xFF800000> : vector<128xf32>
    %665 = vector.multi_reduction <maximumf>, %664, %cst_141 [0] : vector<16x128xf32> to vector<128xf32>
    %666 = vector.shape_cast %665 : vector<128xf32> to vector<1x128xf32>
    %c28_142 = arith.constant 28 : index
    %667 = memref.load %arg2[%c28_142] : memref<32xf32, #tpu.memory_space<smem>>
    %668 = vector.broadcast %667 : f32 to vector<1x128xf32>
    %669 = arith.addf %666, %668 : vector<1x128xf32>
    %cst_143 = arith.constant 0.000000e+00 : f32
    %670 = vector.broadcast %cst_143 : f32 to vector<1x128xf32>
    %671 = arith.maximumf %669, %670 : vector<1x128xf32>
    %c28_144 = arith.constant 28 : index
    %c0_145 = arith.constant 0 : index
    %672 = vector.load %arg4[%c28_144, %c0_145] : memref<32x128xf32, #tpu.memory_space<vmem>>, vector<1x128xf32>
    tpu.vector_store %arg4[%c28_144, %c0_145], %671 {strides = array<i32>} : memref<32x128xf32, #tpu.memory_space<vmem>>, vector<1x128xf32>,
    %c116 = arith.constant 116 : index
    %673 = memref.load %arg1[%c116] : memref<128xf32, #tpu.memory_space<smem>>
    %674 = vector.broadcast %673 : f32 to vector<16x128xf32>
    %675 = arith.mulf %674, %2 : vector<16x128xf32>
    %c117 = arith.constant 117 : index
    %676 = memref.load %arg1[%c117] : memref<128xf32, #tpu.memory_space<smem>>
    %677 = vector.broadcast %676 : f32 to vector<16x128xf32>
    %678 = arith.mulf %677, %3 : vector<16x128xf32>
    %679 = arith.addf %675, %678 : vector<16x128xf32>
    %c118 = arith.constant 118 : index
    %680 = memref.load %arg1[%c118] : memref<128xf32, #tpu.memory_space<smem>>
    %681 = vector.broadcast %680 : f32 to vector<16x128xf32>
    %682 = arith.mulf %681, %4 : vector<16x128xf32>
    %683 = arith.addf %679, %682 : vector<16x128xf32>
    %c119 = arith.constant 119 : index
    %684 = memref.load %arg1[%c119] : memref<128xf32, #tpu.memory_space<smem>>
    %685 = vector.broadcast %684 : f32 to vector<16x128xf32>
    %686 = arith.mulf %685, %5 : vector<16x128xf32>
    %687 = arith.addf %683, %686 : vector<16x128xf32>
    %cst_146 = arith.constant dense<0xFF800000> : vector<128xf32>
    %688 = vector.multi_reduction <maximumf>, %687, %cst_146 [0] : vector<16x128xf32> to vector<128xf32>
    %689 = vector.shape_cast %688 : vector<128xf32> to vector<1x128xf32>
    %c29_147 = arith.constant 29 : index
    %690 = memref.load %arg2[%c29_147] : memref<32xf32, #tpu.memory_space<smem>>
    %691 = vector.broadcast %690 : f32 to vector<1x128xf32>
    %692 = arith.addf %689, %691 : vector<1x128xf32>
    %cst_148 = arith.constant 0.000000e+00 : f32
    %693 = vector.broadcast %cst_148 : f32 to vector<1x128xf32>
    %694 = arith.maximumf %692, %693 : vector<1x128xf32>
    %c29_149 = arith.constant 29 : index
    %c0_150 = arith.constant 0 : index
    %695 = vector.load %arg4[%c29_149, %c0_150] : memref<32x128xf32, #tpu.memory_space<vmem>>, vector<1x128xf32>
    tpu.vector_store %arg4[%c29_149, %c0_150], %694 {strides = array<i32>} : memref<32x128xf32, #tpu.memory_space<vmem>>, vector<1x128xf32>,
    %c120 = arith.constant 120 : index
    %696 = memref.load %arg1[%c120] : memref<128xf32, #tpu.memory_space<smem>>
    %697 = vector.broadcast %696 : f32 to vector<16x128xf32>
    %698 = arith.mulf %697, %2 : vector<16x128xf32>
    %c121 = arith.constant 121 : index
    %699 = memref.load %arg1[%c121] : memref<128xf32, #tpu.memory_space<smem>>
    %700 = vector.broadcast %699 : f32 to vector<16x128xf32>
    %701 = arith.mulf %700, %3 : vector<16x128xf32>
    %702 = arith.addf %698, %701 : vector<16x128xf32>
    %c122 = arith.constant 122 : index
    %703 = memref.load %arg1[%c122] : memref<128xf32, #tpu.memory_space<smem>>
    %704 = vector.broadcast %703 : f32 to vector<16x128xf32>
    %705 = arith.mulf %704, %4 : vector<16x128xf32>
    %706 = arith.addf %702, %705 : vector<16x128xf32>
    %c123 = arith.constant 123 : index
    %707 = memref.load %arg1[%c123] : memref<128xf32, #tpu.memory_space<smem>>
    %708 = vector.broadcast %707 : f32 to vector<16x128xf32>
    %709 = arith.mulf %708, %5 : vector<16x128xf32>
    %710 = arith.addf %706, %709 : vector<16x128xf32>
    %cst_151 = arith.constant dense<0xFF800000> : vector<128xf32>
    %711 = vector.multi_reduction <maximumf>, %710, %cst_151 [0] : vector<16x128xf32> to vector<128xf32>
    %712 = vector.shape_cast %711 : vector<128xf32> to vector<1x128xf32>
    %c30_152 = arith.constant 30 : index
    %713 = memref.load %arg2[%c30_152] : memref<32xf32, #tpu.memory_space<smem>>
    %714 = vector.broadcast %713 : f32 to vector<1x128xf32>
    %715 = arith.addf %712, %714 : vector<1x128xf32>
    %cst_153 = arith.constant 0.000000e+00 : f32
    %716 = vector.broadcast %cst_153 : f32 to vector<1x128xf32>
    %717 = arith.maximumf %715, %716 : vector<1x128xf32>
    %c30_154 = arith.constant 30 : index
    %c0_155 = arith.constant 0 : index
    %718 = vector.load %arg4[%c30_154, %c0_155] : memref<32x128xf32, #tpu.memory_space<vmem>>, vector<1x128xf32>
    tpu.vector_store %arg4[%c30_154, %c0_155], %717 {strides = array<i32>} : memref<32x128xf32, #tpu.memory_space<vmem>>, vector<1x128xf32>,
    %c124 = arith.constant 124 : index
    %719 = memref.load %arg1[%c124] : memref<128xf32, #tpu.memory_space<smem>>
    %720 = vector.broadcast %719 : f32 to vector<16x128xf32>
    %721 = arith.mulf %720, %2 : vector<16x128xf32>
    %c125 = arith.constant 125 : index
    %722 = memref.load %arg1[%c125] : memref<128xf32, #tpu.memory_space<smem>>
    %723 = vector.broadcast %722 : f32 to vector<16x128xf32>
    %724 = arith.mulf %723, %3 : vector<16x128xf32>
    %725 = arith.addf %721, %724 : vector<16x128xf32>
    %c126 = arith.constant 126 : index
    %726 = memref.load %arg1[%c126] : memref<128xf32, #tpu.memory_space<smem>>
    %727 = vector.broadcast %726 : f32 to vector<16x128xf32>
    %728 = arith.mulf %727, %4 : vector<16x128xf32>
    %729 = arith.addf %725, %728 : vector<16x128xf32>
    %c127 = arith.constant 127 : index
    %730 = memref.load %arg1[%c127] : memref<128xf32, #tpu.memory_space<smem>>
    %731 = vector.broadcast %730 : f32 to vector<16x128xf32>
    %732 = arith.mulf %731, %5 : vector<16x128xf32>
    %733 = arith.addf %729, %732 : vector<16x128xf32>
    %cst_156 = arith.constant dense<0xFF800000> : vector<128xf32>
    %734 = vector.multi_reduction <maximumf>, %733, %cst_156 [0] : vector<16x128xf32> to vector<128xf32>
    %735 = vector.shape_cast %734 : vector<128xf32> to vector<1x128xf32>
    %c31_157 = arith.constant 31 : index
    %736 = memref.load %arg2[%c31_157] : memref<32xf32, #tpu.memory_space<smem>>
    %737 = vector.broadcast %736 : f32 to vector<1x128xf32>
    %738 = arith.addf %735, %737 : vector<1x128xf32>
    %cst_158 = arith.constant 0.000000e+00 : f32
    %739 = vector.broadcast %cst_158 : f32 to vector<1x128xf32>
    %740 = arith.maximumf %738, %739 : vector<1x128xf32>
    %c31_159 = arith.constant 31 : index
    %c0_160 = arith.constant 0 : index
    %741 = vector.load %arg4[%c31_159, %c0_160] : memref<32x128xf32, #tpu.memory_space<vmem>>, vector<1x128xf32>
    tpu.vector_store %arg4[%c31_159, %c0_160], %740 {strides = array<i32>} : memref<32x128xf32, #tpu.memory_space<vmem>>, vector<1x128xf32>,
    return
  }
  func.func @transform_0(%arg0: i32) -> i32 {
    %c0_i32 = arith.constant 0 : i32
    %c0_i32_0 = arith.constant 0 : i32
    return %c0_i32 : i32
  }
  func.func @transform_1(%arg0: i32) -> i32 {
    %c0_i32 = arith.constant 0 : i32
    %c0_i32_0 = arith.constant 0 : i32
    return %c0_i32 : i32
  }
  func.func @transform_2(%arg0: i32) -> (i32, i32) {
    %c0_i32 = arith.constant 0 : i32
    %c0_i32_0 = arith.constant 0 : i32
    return %arg0, %c0_i32 : i32, i32
  }
  func.func @transform_3(%arg0: i32) -> (i32, i32) {
    %c0_i32 = arith.constant 0 : i32
    %c0_i32_0 = arith.constant 0 : i32
    return %c0_i32, %arg0 : i32, i32
  }
}

</mosaic_0001>

<bundles_post_ra>
// kernel: tpu_custom_call.1
= control target key start
LH: loop header
LB: loop body
LE: loop exit
PB: predicated region body
PF: predicated region fallthrough
CT: control target
= control target key end

     0   :  { %s2671_s0 = inlined_call_operand.vmem [shape: f32[128], index: 0, kind: input, shape index: {}]   ;;  %s2672_s1 = inlined_call_operand.vmem [shape: f32[32], index: 1, kind: input, shape index: {}]   ;;  %s2673_s2 = inlined_call_operand.vmem [shape: f32[128,64], index: 2, kind: input, shape index: {}]   ;;  %s2674_s3 = inlined_call_operand.hbm [shape: f32[32,128], index: 3, kind: output, shape index: {}]  }
   0x1   :  { %2804 = sst [smem:[#allocation111_spill]] %s2674_s3 }
   0x2   :  { %8 = vsyncpa [#allocation4], 0 }
   0x3   :  { %9 = vsyncpa [#allocation6], 0 }
   0x4   :  { %10 = vsyncpa [#allocation3], 0  ;;  %s17_s14 = sshll.u32 %s2671_s0, 4  ;;  %s27_s17 = sshll.u32 %s2672_s1, 4  ;;  %s18_s14 = int_to_ptr.vmem [resolvable:$true] %s17_s14  ;;  %s28_s17 = int_to_ptr.vmem [resolvable:$true] %s27_s17 }
   0x5   :  { %s1357_s18 = scalar_lea.vmem %s18_s14, 16  ;;  %p1362_p1 = scmp.lt.s32.totalorder %s18_s14, %s18_s14 }
   0x6   :  { %p1358_p0 = scmp.ne.s32.totalorder %s18_s14, %s1357_s18  ;;  %p1363_p2 = scmp.lt.s32.totalorder %s1357_s18, %s1357_s18 }
   0x8   :  { %p1364_p3 = por %p1363_p2, %p1362_p1 }
   0xa   :  { %p1365_p4 = pnand %p1364_p3, %p1358_p0 }
   0xc   :  { %1368 = shalt.err (!%p1365_p4)
}
   0xd   :  { %s1407_s19 = smov [#allocation2]   ;;  %s1369_s20 = scalar_lea.vmem %s28_s17, 16 }
   0xe   :  { %20 = dma.vmem_to_smem %s18_s14, 16, %s1407_s19, [#allocation4]  }
   0xf   :  { %p1370_p5 = scmp.ne.s32.totalorder %s28_s17, %s1369_s20  ;;  %p1374_p6 = scmp.lt.s32.totalorder %s28_s17, %s28_s17 }
  0x10   :  { %p1375_p7 = scmp.lt.s32.totalorder %s1369_s20, %s1369_s20 }
  0x12   :  { %p1376_p8 = por %p1375_p7, %p1374_p6 }
  0x14   :  { %p1377_p9 = pnand %p1376_p8, %p1370_p5 }
  0x16   :  { %1380 = shalt.err (!%p1377_p9)
}
  0x17   :  { %s1408_s0 = smov [#allocation5]  }
  0x18   :  { %30 = dma.vmem_to_smem %s28_s17, 16, %s1408_s0, [#allocation6]  }
  0x19   :  { %1401 = dma.done.wait [#allocation4], 16  }
  0x1a   :  { %1402 = vsyncadd [#allocation4], 4294967280 }
  0x1b   :  { %1403 = dma.done.wait [#allocation6], 16  }
  0x1c   :  { %1404 = vsyncadd [#allocation6], 4294967280 }
  0x1d   :  { %39 = sfence }
  0x1e   :  { %v40_v0 = vld [vmem:[%s2673_s2] sm:$0xff]  ;;  %v41_v1 = vld [vmem:[%s2673_s2 + $0x8] sm:$0xff]  ;;  %v42_v2 = vld [vmem:[%s2673_s2 + $0x10] sm:$0xff]  ;;  %s1453_s30 = sld [smem:[#allocation2]] }
  0x1f   :  { %56 = vxpose.xlu0.b32.start [1/16] (narrow) %v40_v0, 64  ;;  %v43_v3 = vld [vmem:[%s2673_s2 + $0x18] sm:$0xff]  ;;  %v44_v4 = vld [vmem:[%s2673_s2 + $0x20] sm:$0xff]  ;;  %s1455_s4 = sld [smem:[#allocation2 + $0x1]]  ;;  %v45_v5 = vld [vmem:[%s2673_s2 + $0x28] sm:$0xff] }
  0x20   :  { %s1457_s5 = sld [smem:[#allocation2 + $0x4]]  ;;  %v46_v6 = vld [vmem:[%s2673_s2 + $0x30] sm:$0xff]  ;;  %v47_v7 = vld [vmem:[%s2673_s2 + $0x38] sm:$0xff]  ;;  %v48_v8 = vld [vmem:[%s2673_s2 + $0x40] sm:$0xff] }
  0x21   :  { %s1459_s6 = sld [smem:[#allocation2 + $0x5]]  ;;  %v49_v9 = vld [vmem:[%s2673_s2 + $0x48] sm:$0xff]  ;;  %v50_v10 = vld [vmem:[%s2673_s2 + $0x50] sm:$0xff]  ;;  %v51_v11 = vld [vmem:[%s2673_s2 + $0x58] sm:$0xff] }
  0x22   :  { %s1464_s9 = sld [smem:[#allocation2 + $0x8]]  ;;  %v52_v12 = vld [vmem:[%s2673_s2 + $0x60] sm:$0xff]  ;;  %v53_v13 = vld [vmem:[%s2673_s2 + $0x68] sm:$0xff]  ;;  %v54_v14 = vld [vmem:[%s2673_s2 + $0x70] sm:$0xff] }
  0x23   :  { %57 = vxpose.xlu0.b32.cont [2/16] (narrow) %v41_v1, 64  ;;  %s1466_s10 = sld [smem:[#allocation2 + $0x9]]  ;;  %v55_v15 = vld [vmem:[%s2673_s2 + $0x78] sm:$0xff] }
  0x24   :  { %2805 = sst [smem:[#allocation11_spill]] %s1453_s30  ;;  %v89_v16 = vstv %s1453_s30 }
  0x25   :  { %2806 = sst [smem:[#allocation12_spill]] %s1455_s4  ;;  %v93_v17 = vstv %s1455_s4 }
  0x26   :  { %2807 = sst [smem:[#allocation13_spill]] %s1457_s5  ;;  %v123_v18 = vstv %s1457_s5 }
  0x27   :  { %58 = vxpose.xlu0.b32.cont [3/16] (narrow) %v42_v2, 64  ;;  %2808 = sst [smem:[#allocation14_spill]] %s1459_s6  ;;  %v127_v19 = vstv %s1459_s6 }
  0x28   :  { %2809 = sst [smem:[#allocation15_spill]] %s1464_s9  ;;  %v157_v20 = vstv %s1464_s9 }
  0x29   :  { %2810 = sst [smem:[#allocation16_spill]] %s1466_s10  ;;  %v161_v23 = vstv %s1466_s10 }
  0x2a   :  { %s1468_s11 = sld [smem:[#allocation2 + $0xc]] }
  0x2b   :  { %59 = vxpose.xlu0.b32.cont [4/16] (narrow) %v43_v3, 64  ;;  %s1470_s12 = sld [smem:[#allocation2 + $0x2]] }
  0x2c   :  { %s1475_s15 = sld [smem:[#allocation2 + $0x6]] }
  0x2d   :  { %s1477_s16 = sld [smem:[#allocation2 + $0xa]] }
  0x2e   :  { %s1479_s17 = sld [smem:[#allocation2 + $0xd]] }
  0x2f   :  { %60 = vxpose.xlu0.b32.cont [5/16] (narrow) %v44_v4, 64  ;;  %s1481_s18 = sld [smem:[#allocation2 + $0xe]] }
  0x30   :  { %2811 = sst [smem:[#allocation17_spill]] %s1468_s11  ;;  %v191_v24 = vstv %s1468_s11 }
  0x31   :  { %2812 = sst [smem:[#allocation18_spill]] %s1470_s12  ;;  %v99_v21 = vstv %s1470_s12 }
  0x32   :  { %2813 = sst [smem:[#allocation19_spill]] %s1475_s15  ;;  %v133_v22 = vstv %s1475_s15 }
  0x33   :  { %61 = vxpose.xlu0.b32.cont [6/16] (narrow) %v45_v5, 64  ;;  %2814 = sst [smem:[#allocation20_spill]] %s1477_s16 }
  0x34   :  { %2815 = sst [smem:[#allocation21_spill]] %s1479_s17  ;;  %v195_v26 = vstv %s1479_s17 }
  0x35   :  { %2816 = sst [smem:[#allocation22_spill]] %s1481_s18 }
  0x36   :  { %s1486_s0 = sld [smem:[#allocation2 + $0x10]] }
  0x37   :  { %62 = vxpose.xlu0.b32.cont [7/16] (narrow) %v46_v6, 64  ;;  %s1488_s1 = sld [smem:[#allocation2 + $0x11]] }
  0x38   :  { %s1490_s21 = sld [smem:[#allocation2 + $0x12]] }
  0x39   :  { %s1492_s22 = sld [smem:[#allocation2 + $0x3]] }
  0x3a   :  { %s1497_s25 = sld [smem:[#allocation2 + $0x7]] }
  0x3b   :  { %63 = vxpose.xlu0.b32.cont [8/16] (narrow) %v47_v7, 64  ;;  %s1499_s26 = sld [smem:[#allocation2 + $0xb]] }
  0x3c   :  { %2817 = sst [smem:[#allocation23_spill]] %s1486_s0  ;;  %v225_v28 = vstv %s1486_s0 }
  0x3d   :  { %2818 = sst [smem:[#allocation24_spill]] %s1488_s1  ;;  %v229_v31 = vstv %s1488_s1 }
  0x3e   :  { %2819 = sst [smem:[#allocation25_spill]] %s1490_s21 }
  0x3f   :  { %2820 = sst [smem:[#allocation26_spill]] %s1492_s22  ;;  %64 = vxpose.xlu0.b32.cont [9/16] (narrow) %v48_v8, 64 }
  0x40   :  { %2821 = sst [smem:[#allocation27_spill]] %s1497_s25 }
  0x41   :  { %2822 = sst [smem:[#allocation28_spill]] %s1499_s26 }
  0x42   :  { %s1501_s27 = sld [smem:[#allocation2 + $0xf]] }
  0x43   :  { %s1503_s28 = sld [smem:[#allocation2 + $0x13]]  ;;  %65 = vxpose.xlu0.b32.cont [10/16] (narrow) %v49_v9, 64 }
  0x44   :  { %s1508_s8 = sld [smem:[#allocation2 + $0x14]] }
  0x45   :  { %s1510_s13 = sld [smem:[#allocation2 + $0x15]] }
  0x46   :  { %s1512_s14 = sld [smem:[#allocation2 + $0x16]] }
  0x47   :  { %s1514_s19 = sld [smem:[#allocation2 + $0x17]]  ;;  %66 = vxpose.xlu0.b32.cont [11/16] (narrow) %v50_v10, 64 }
  0x48   :  { %2823 = sst [smem:[#allocation29_spill]] %s1501_s27 }
  0x49   :  { %2824 = sst [smem:[#allocation30_spill]] %s1503_s28 }
  0x4a   :  { %2825 = sst [smem:[#allocation31_spill]] %s1508_s8 }
  0x4b   :  { %2826 = sst [smem:[#allocation32_spill]] %s1510_s13  ;;  %67 = vxpose.xlu0.b32.cont [12/16] (narrow) %v51_v11, 64 }
  0x4c   :  { %2827 = sst [smem:[#allocation33_spill]] %s1512_s14 }
  0x4d   :  { %2828 = sst [smem:[#allocation34_spill]] %s1514_s19 }
  0x4e   :  { %s1519_s24 = sld [smem:[#allocation2 + $0x18]] }
  0x4f   :  { %s1521_s3 = sld [smem:[#allocation2 + $0x19]]  ;;  %68 = vxpose.xlu0.b32.cont [13/16] (narrow) %v52_v12, 64 }
  0x50   :  { %s1523_s28 = sld [smem:[#allocation2 + $0x1a]] }
  0x51   :  { %s1525_s29 = sld [smem:[#allocation2 + $0x1b]] }
  0x52   :  { %s1530_s14 = sld [smem:[#allocation2 + $0x1c]] }
  0x53   :  { %s1532_s19 = sld [smem:[#allocation2 + $0x1d]]  ;;  %69 = vxpose.xlu0.b32.cont [14/16] (narrow) %v53_v13, 64 }
  0x54   :  { %2829 = sst [smem:[#allocation35_spill]] %s1519_s24 }
  0x55   :  { %2830 = sst [smem:[#allocation36_spill]] %s1521_s3 }
  0x56   :  { %2831 = sst [smem:[#allocation37_spill]] %s1523_s28 }
  0x57   :  { %2832 = sst [smem:[#allocation38_spill]] %s1525_s29  ;;  %70 = vxpose.xlu0.b32.cont [15/16] (narrow) %v54_v14, 64 }
  0x58   :  { %2833 = sst [smem:[#allocation39_spill]] %s1530_s14 }
  0x59   :  { %2834 = sst [smem:[#allocation40_spill]] %s1532_s19 }
  0x5a   :  { %s1534_s8 = sld [smem:[#allocation2 + $0x1e]] }
  0x5b   :  { %s1536_s20 = sld [smem:[#allocation2 + $0x1f]]  ;;  %71 = vxpose.xlu0.b32.end [16/16] (narrow) %v55_v15, 64 }
  0x5c   :  { %s1541_s28 = sld [smem:[#allocation2 + $0x20]] }
  0x5d   :  { %s1543_s29 = sld [smem:[#allocation2 + $0x21]] }
  0x5e   :  { %s1545_s24 = sld [smem:[#allocation2 + $0x24]] }
  0x5f   :  { %s1547_s13 = sld [smem:[#allocation2 + $0x28]] }
  0x60   :  { %2835 = sst [smem:[#allocation41_spill]] %s1534_s8 }
  0x61   :  { %2836 = sst [smem:[#allocation42_spill]] %s1536_s20 }
  0x62   :  { %2837 = sst [smem:[#allocation43_spill]] %s1541_s28 }
  0x63   :  { %2838 = sst [smem:[#allocation44_spill]] %s1543_s29 }
  0x64   :  { %2839 = sst [smem:[#allocation45_spill]] %s1545_s24 }
  0x65   :  { %2840 = sst [smem:[#allocation46_spill]] %s1547_s13 }
  0x66   :  { %s1552_s8 = sld [smem:[#allocation5]] }
  0x67   :  { %s1554_s20 = sld [smem:[#allocation5 + $0x1]] }
  0x68   :  { %s1556_s14 = sld [smem:[#allocation5 + $0x2]] }
  0x69   :  { %s1558_s3 = sld [smem:[#allocation5 + $0x3]] }
  0x6a   :  { %s1563_s24 = sld [smem:[#allocation5 + $0x4]] }
  0x6b   :  { %s1565_s13 = sld [smem:[#allocation5 + $0x5]] }
  0x6c   :  { %2841 = sst [smem:[#allocation47_spill]] %s1552_s8 }
  0x6d   :  { %2842 = sst [smem:[#allocation48_spill]] %s1554_s20 }
  0x6e   :  { %2843 = sst [smem:[#allocation49_spill]] %s1556_s14 }
  0x6f   :  { %2844 = sst [smem:[#allocation50_spill]] %s1558_s3 }
  0x70   :  { %2845 = sst [smem:[#allocation51_spill]] %s1563_s24 }
  0x71   :  { %2846 = sst [smem:[#allocation52_spill]] %s1565_s13 }
  0x72   :  { %s1567_s28 = sld [smem:[#allocation5 + $0x6]] }
  0x73   :  { %s1569_s19 = sld [smem:[#allocation5 + $0x7]] }
  0x74   :  { %s1574_s14 = sld [smem:[#allocation2 + $0x25]] }
  0x75   :  { %s1576_s3 = sld [smem:[#allocation2 + $0x29]] }
  0x76   :  { %s1578_s8 = sld [smem:[#allocation2 + $0x2c]] }
  0x77   :  { %s1580_s29 = sld [smem:[#allocation2 + $0x2d]] }
  0x78   :  { %2847 = sst [smem:[#allocation53_spill]] %s1567_s28 }
  0x79   :  { %2848 = sst [smem:[#allocation54_spill]] %s1569_s19 }
  0x7a   :  { %2849 = sst [smem:[#allocation55_spill]] %s1574_s14 }
  0x7b   :  { %2850 = sst [smem:[#allocation56_spill]] %s1576_s3 }
  0x7c   :  { %2851 = sst [smem:[#allocation57_spill]] %s1578_s8 }
  0x7d   :  { %2852 = sst [smem:[#allocation58_spill]] %s1580_s29 }
  0x7e   :  { %s1582_s23 = sld [smem:[#allocation2 + $0x22]] }
  0x7f   :  { %s1584_s13 = sld [smem:[#allocation2 + $0x26]] }
  0x80   :  { %s1586_s28 = sld [smem:[#allocation2 + $0x30]] }
  0x81   :  { %s1588_s19 = sld [smem:[#allocation2 + $0x23]] }
  0x82   :  { %s1590_s24 = sld [smem:[#allocation2 + $0x2a]] }
  0x83   :  { %s1592_s2 = sld [smem:[#allocation2 + $0x31]] }
  0x84   :  { %2853 = sst [smem:[#allocation59_spill]] %s1582_s23 }
  0x85   :  { %2854 = sst [smem:[#allocation60_spill]] %s1584_s13 }
  0x86   :  { %2855 = sst [smem:[#allocation61_spill]] %s1586_s28 }
  0x87   :  { %2856 = sst [smem:[#allocation62_spill]] %s1588_s19 }
  0x88   :  { %2857 = sst [smem:[#allocation63_spill]] %s1590_s24 }
  0x89   :  { %2858 = sst [smem:[#allocation64_spill]] %s1592_s2 }
  0x8a   :  { %s1594_s20 = sld [smem:[#allocation2 + $0x34]] }
  0x8b   :  { %s1596_s7 = sld [smem:[#allocation2 + $0x35]] }
  0x8c   :  { %s1598_s8 = sld [smem:[#allocation2 + $0x2e]] }
  0x8d   :  { %s1600_s3 = sld [smem:[#allocation2 + $0x27]] }
  0x8e   :  { %s1602_s29 = sld [smem:[#allocation2 + $0x38]] }
  0x8f   :  { %s1604_s23 = sld [smem:[#allocation2 + $0x39]] }
  0x90   :  { %2859 = sst [smem:[#allocation65_spill]] %s1594_s20 }
  0x91   :  { %2860 = sst [smem:[#allocation66_spill]] %s1596_s7 }
  0x92   :  { %2861 = sst [smem:[#allocation67_spill]] %s1598_s8 }
  0x93   :  { %2862 = sst [smem:[#allocation68_spill]] %s1600_s3 }
  0x94   :  { %2863 = sst [smem:[#allocation69_spill]] %s1602_s29 }
  0x95   :  { %2864 = sst [smem:[#allocation70_spill]] %s1604_s23 }
  0x96   :  { %s1606_s13 = sld [smem:[#allocation2 + $0x2b]] }
  0x97   :  { %s1608_s28 = sld [smem:[#allocation2 + $0x32]] }
  0x98   :  { %s1610_s19 = sld [smem:[#allocation2 + $0x3c]] }
  0x99   :  { %s1612_s24 = sld [smem:[#allocation2 + $0x40]] }
  0x9a   :  { %s1614_s2 = sld [smem:[#allocation2 + $0x2f]] }
  0x9b   :  { %s1616_s20 = sld [smem:[#allocation2 + $0x36]]  ;;  %v1797_v13 = vpop.trf.xlu0 }
  0x9c   :  { %2865 = sst [smem:[#allocation71_spill]] %s1606_s13  ;;  %2983 = vst [vmem:[#allocation107_spill] sm:$0xff] %v1797_v13  ;;  %v90_v5 = vmul.f32 %v89_v16, %v1797_v13  ;;  %v124_v9 = vmul.f32 %v123_v18, %v1797_v13  ;;  %v158_v62 = vmul.f32 %v157_v20, %v1797_v13  ;;  %v192_v6 = vmul.f32 %v191_v24, %v1797_v13 }
  0x9d   :  { %2866 = sst [smem:[#allocation72_spill]] %s1608_s28  ;;  %v226_v12 = vmul.f32 %v225_v28, %v1797_v13 }
  0x9e   :  { %2867 = sst [smem:[#allocation73_spill]] %s1610_s19 }
  0x9f   :  { %2868 = sst [smem:[#allocation74_spill]] %s1612_s24  ;;  %v1847_v1 = vpop.trf.xlu0 }
  0xa0   :  { %2869 = sst [smem:[#allocation75_spill]] %s1614_s2  ;;  %2989 = vst [vmem:[#allocation108_spill] sm:$0xff] %v1847_v1  ;;  %v91_v57 = vmul.f32 %v89_v16, %v1847_v1  ;;  %v125_v56 = vmul.f32 %v123_v18, %v1847_v1  ;;  %v159_v55 = vmul.f32 %v157_v20, %v1847_v1  ;;  %v193_v54 = vmul.f32 %v191_v24, %v1847_v1 }
  0xa1   :  { %2870 = sst [smem:[#allocation76_spill]] %s1616_s20  ;;  %v227_v53 = vmul.f32 %v225_v28, %v1847_v1 }
  0xa2   :  { %s1618_s7 = sld [smem:[#allocation5 + $0x8]] }
  0xa3   :  { %s1620_s8 = sld [smem:[#allocation2 + $0x33]]  ;;  %v1913_v49 = vpop.trf.xlu0 }
  0xa4   :  { %s1622_s3 = sld [smem:[#allocation2 + $0x3d]]  ;;  %v128_v47 = vmul.f32 %v127_v19, %v1913_v49 }
  0xa5   :  { %s1624_s29 = sld [smem:[#allocation5 + $0x9]] }
  0xa6   :  { %s1626_s23 = sld [smem:[#allocation5 + $0xa]]  ;;  %v130_v34 = vadd.f32 %v128_v47, %v124_v9 }
  0xa7   :  { %s1628_s28 = sld [smem:[#allocation2 + $0x37]]  ;;  %v1959_v29 = vpop.trf.xlu0 }
  0xa8   :  { %2871 = sst [smem:[#allocation77_spill]] %s1618_s7  ;;  %v95_v27 = vmul.f32 %v93_v17, %v1959_v29  ;;  %v129_v25 = vmul.f32 %v127_v19, %v1959_v29  ;;  %v197_v47 = vmul.f32 %v195_v26, %v1959_v29 }
  0xa9   :  { %2872 = sst [smem:[#allocation78_spill]] %s1620_s8 }
  0xaa   :  { %2873 = sst [smem:[#allocation79_spill]] %s1622_s3 }
  0xab   :  { %2874 = sst [smem:[#allocation80_spill]] %s1624_s29 }
  0xac   :  { %2875 = sst [smem:[#allocation81_spill]] %s1626_s23 }
  0xad   :  { %2876 = sst [smem:[#allocation82_spill]] %s1628_s28 }
  0xae   :  { %s1630_s19 = sld [smem:[#allocation2 + $0x3a]] }
  0xaf   :  { %s1632_s24 = sld [smem:[#allocation5 + $0xb]] }
  0xb0   :  { %s1634_s20 = sld [smem:[#allocation2 + $0x3e]] }
  0xb1   :  { %s1636_s8 = sld [smem:[#allocation2 + $0x44]] }
  0xb2   :  { %s1638_s3 = sld [smem:[#allocation2 + $0x48]] }
  0xb3   :  { %s1640_s29 = sld [smem:[#allocation5 + $0xc]] }
  0xb4   :  { %2877 = sst [smem:[#allocation83_spill]] %s1630_s19 }
  0xb5   :  { %2878 = sst [smem:[#allocation84_spill]] %s1632_s24 }
  0xb6   :  { %2879 = sst [smem:[#allocation85_spill]] %s1634_s20 }
  0xb7   :  { %2880 = sst [smem:[#allocation86_spill]] %s1636_s8 }
  0xb8   :  { %2881 = sst [smem:[#allocation87_spill]] %s1638_s3 }
  0xb9   :  { %s1642_s23 = sld [smem:[#allocation2 + $0x3b]] }
  0xba   :  { %s1644_s28 = sld [smem:[#allocation2 + $0x41]] }
  0xbb   :  { %s1646_s19 = sld [smem:[#allocation2 + $0x3f]] }
  0xbc   :  { %s1648_s24 = sld [smem:[#allocation5 + $0xd]] }
  0xbd   :  { %s1650_s20 = sld [smem:[#allocation2 + $0x45]] }
  0xbe   :  { %s1652_s8 = sld [smem:[#allocation2 + $0x4c]] }
  0xbf   :  { %2882 = sst [smem:[#allocation88_spill]] %s1642_s23 }
  0xc0   :  { %2883 = sst [smem:[#allocation89_spill]] %s1644_s28 }
  0xc1   :  { %s1654_s3 = sld [smem:[#allocation2 + $0x42]] }
  0xc2   :  { %2884 = sst [smem:[#allocation90_spill]] %s1648_s24 }
  0xc3   :  { %2885 = sst [smem:[#allocation91_spill]] %s1650_s20 }
  0xc4   :  { %2886 = sst [smem:[#allocation92_spill]] %s1652_s8 }
  0xc5   :  { %s1657_s23 = sld [smem:[#allocation2 + $0x50]] }
  0xc6   :  { %s1663_s24 = sld [smem:[#allocation5 + $0xe]] }
  0xc7   :  { %2887 = sst [smem:[#allocation93_spill]] %s1654_s3 }
  0xc8   :  { %s2891_s20 = sld [smem:[#allocation31_spill]] }
  0xc9   :  { %s1669_s30 = sld [smem:[#allocation2 + $0x49]] }
  0xca   :  { %s2896_s6 = sld [smem:[#allocation35_spill]] }
  0xcb   :  { %2888 = sst [smem:[#allocation94_spill]] %s1657_s23 }
  0xcc   :  { %2889 = sst [smem:[#allocation95_spill]] %s1663_s24 }
  0xcd   :  { %s2893_s23 = sld [smem:[#allocation32_spill]] }
  0xce   :  { %s1675_s9 = sld [smem:[#allocation2 + $0x46]]  ;;  %v259_v36 = vstv %s2891_s20 }
  0xcf   :  { %2892 = sst [smem:[#allocation96_spill]] %s1669_s30  ;;  %v260_v0 = vmul.f32 %v259_v36, %v1797_v13  ;;  %v261_v16 = vmul.f32 %v259_v36, %v1847_v1 }
  0xd0   :  { %s2898_s24 = sld [smem:[#allocation36_spill]]  ;;  %v293_v40 = vstv %s2896_s6 }
  0xd1   :  { %s2901_s10 = sld [smem:[#allocation39_spill]]  ;;  %v294_v3 = vmul.f32 %v293_v40, %v1797_v13  ;;  %v295_v18 = vmul.f32 %v293_v40, %v1847_v1 }
  0xd2   :  { %s1681_s11 = sld [smem:[#allocation5 + $0xf]] }
  0xd3   :  { %s2903_s30 = sld [smem:[#allocation40_spill]]  ;;  %v263_v37 = vstv %s2893_s23 }
  0xd4   :  { %2897 = sst [smem:[#allocation97_spill]] %s1675_s9 }
  0xd5   :  { %s2906_s18 = sld [smem:[#allocation43_spill]] }
  0xd6   :  { %s1687_s0 = sld [smem:[#allocation2 + $0x43]]  ;;  %v297_v41 = vstv %s2898_s24 }
  0xd7   :  { %s2910_s25 = sld [smem:[#allocation45_spill]]  ;;  %v327_v44 = vstv %s2901_s10  ;;  %v298_v43 = vmul.f32 %v297_v41, %v1913_v49 }
  0xd8   :  { %2902 = sst [smem:[#allocation98_spill]] %s1681_s11  ;;  %v328_v10 = vmul.f32 %v327_v44, %v1797_v13  ;;  %v329_v20 = vmul.f32 %v327_v44, %v1847_v1 }
  0xd9   :  { %s2911_s1 = sld [smem:[#allocation46_spill]]  ;;  %v331_v45 = vstv %s2903_s30  ;;  %v300_v38 = vadd.f32 %v298_v43, %v294_v3  ;;  %v1985_v3 = vpop.trf.xlu0 }
  0xda   :  { %s1693_s21 = sld [smem:[#allocation2 + $0x4d]]  ;;  %v332_v39 = vmul.f32 %v331_v45, %v1913_v49  ;;  %v333_v19 = vmul.f32 %v331_v45, %v1959_v29 }
  0xdb   :  { %s1699_s20 = sld [smem:[#allocation2 + $0x4a]]  ;;  %v361_v48 = vstv %s2906_s18 }
  0xdc   :  { %2907 = sst [smem:[#allocation99_spill]] %s1687_s0  ;;  %v1830_v14 = vmul.f32 %v361_v48, %v1797_v13  ;;  %v1896_v24 = vmul.f32 %v361_v48, %v1847_v1  ;;  %v334_v32 = vadd.f32 %v332_v39, %v328_v10  ;;  %v265_v39 = vmul.f32 %v263_v37, %v1959_v29 }
  0xdd   :  { %s1705_s5 = sld [smem:[#allocation2 + $0x54]]  ;;  %v395_v51 = vstv %s2910_s25  ;;  %v100_v10 = vmul.f32 %v99_v21, %v1985_v3 }
  0xde   :  { %s2924_s12 = sld [smem:[#allocation57_spill]]  ;;  %v1835_v8 = vmul.f32 %v395_v51, %v1797_v13  ;;  %v1901_v28 = vmul.f32 %v395_v51, %v1847_v1 }
  0xdf   :  { %v429_v52 = vstv %s2911_s1  ;;  %s1711_s10 = sld [smem:[#allocation5 + $0x10]] }
  0xe0   :  { %2912 = sst [smem:[#allocation100_spill]] %s1693_s21  ;;  %v1840_v2 = vmul.f32 %v429_v52, %v1797_v13  ;;  %v1906_v36 = vmul.f32 %v429_v52, %v1847_v1 }
  0xe1   :  { %2917 = sst [smem:[#allocation101_spill]] %s1699_s20 }
  0xe2   :  { %s2930_s17 = sld [smem:[#allocation61_spill]] }
  0xe3   :  { %2921 = sst [smem:[#allocation102_spill]] %s1705_s5 }
  0xe4   :  { %s1717_s18 = sld [smem:[#allocation2 + $0x47]]  ;;  %v463_v63 = vstv %s2924_s12 }
  0xe5   :  { %2926 = sst [smem:[#allocation103_spill]] %s1711_s10  ;;  %v1845_v60 = vmul.f32 %v463_v63, %v1797_v13  ;;  %v1911_v40 = vmul.f32 %v463_v63, %v1847_v1  ;;  %v94_v63 = vmul.f32 %v93_v17, %v1913_v49  ;;  %v299_v17 = vmul.f32 %v297_v41, %v1959_v29 }
  0xe6   :  { %s2933_s22 = sld [smem:[#allocation65_spill]]  ;;  %v134_v41 = vmul.f32 %v133_v22, %v1985_v3 }
  0xe7   :  { %s1723_s1 = sld [smem:[#allocation2 + $0x58]]  ;;  %v96_v35 = vadd.f32 %v94_v63, %v90_v5  ;;  %v163_v5 = vmul.f32 %v161_v23, %v1959_v29  ;;  %v301_v9 = vadd.f32 %v299_v17, %v295_v18 }
  0xe8   :  { %s2937_s26 = sld [smem:[#allocation69_spill]]  ;;  %v497_v4 = vstv %s2930_s17 }
  0xe9   :  { %s1729_s8 = sld [smem:[#allocation2 + $0x51]]  ;;  %v1852_v61 = vmul.f32 %v497_v4, %v1797_v13  ;;  %v1918_v44 = vmul.f32 %v497_v4, %v1847_v1  ;;  %v162_v4 = vmul.f32 %v161_v23, %v1913_v49  ;;  %v97_v23 = vadd.f32 %v95_v27, %v91_v57 }
  0xea   :  { %s2941_s23 = sld [smem:[#allocation73_spill]]  ;;  %v165_v43 = vadd.f32 %v163_v5, %v159_v55  ;;  %v102_v63 = vadd.f32 %v100_v10, %v96_v35 }
  0xeb   :  { %s1735_s14 = sld [smem:[#allocation2 + $0x4e]]  ;;  %v164_v33 = vadd.f32 %v162_v4, %v158_v62  ;;  %v231_v62 = vmul.f32 %v229_v31, %v1959_v29  ;;  %v136_v4 = vadd.f32 %v134_v41, %v130_v34 }
  0xec   :  { %v531_v7 = vstv %s2933_s22  ;;  %s1741_s15 = sld [smem:[#allocation5 + $0x11]] }
  0xed   :  { %2935 = sst [smem:[#allocation104_spill]] %s1723_s1  ;;  %v1857_v50 = vmul.f32 %v531_v7, %v1797_v13  ;;  %v1923_v48 = vmul.f32 %v531_v7, %v1847_v1  ;;  %v196_v7 = vmul.f32 %v195_v26, %v1913_v49  ;;  %v131_v26 = vadd.f32 %v129_v25, %v125_v56 }
  0xee   :  { %s2949_s30 = sld [smem:[#allocation82_spill]]  ;;  %v565_v11 = vstv %s2937_s26 }
  0xef   :  { %2939 = sst [smem:[#allocation105_spill]] %s1729_s8  ;;  %v1862_v59 = vmul.f32 %v565_v11, %v1797_v13  ;;  %v1928_v51 = vmul.f32 %v565_v11, %v1847_v1  ;;  %v230_v11 = vmul.f32 %v229_v31, %v1913_v49  ;;  %v198_v30 = vadd.f32 %v196_v7, %v192_v6 }
  0xf0   :  { %s1747_s17 = sld [smem:[#allocation2 + $0x4b]]  ;;  %v599_v15 = vstv %s2941_s23  ;;  %v233_v31 = vadd.f32 %v231_v62, %v227_v53  ;;  %v267_v6 = vadd.f32 %v265_v39, %v261_v16 }
  0xf1   :  { %s2951_s8 = sld [smem:[#allocation84_spill]]  ;;  %v1867_v58 = vmul.f32 %v599_v15, %v1797_v13  ;;  %v1933_v52 = vmul.f32 %v599_v15, %v1847_v1  ;;  %v264_v15 = vmul.f32 %v263_v37, %v1913_v49  ;;  %v232_v46 = vadd.f32 %v230_v11, %v226_v12 }
  0xf2   :  { %2946 = sst [smem:[#allocation106_spill]] %s1741_s15  ;;  %v335_v37 = vadd.f32 %v333_v19, %v329_v20 }
  0xf3   :  { %s2952_s5 = sld [smem:[#allocation85_spill]]  ;;  %2990 = vst [vmem:[#allocation109_spill] sm:$0xff] %v1867_v58  ;;  %2999 = vst [vmem:[#allocation110_spill] sm:$0xff] %v1933_v52  ;;  %v266_v42 = vadd.f32 %v264_v15, %v260_v0  ;;  %v199_v0 = vadd.f32 %v197_v47, %v193_v54  ;;  %v2011_v15 = vpop.trf.xlu0 }
  0xf4   :  { %s1753_s25 = sld [smem:[#allocation2 + $0x5c]]  ;;  %v101_v17 = vmul.f32 %v99_v21, %v2011_v15  ;;  %v135_v19 = vmul.f32 %v133_v22, %v2011_v15 }
  0xf5   :  { %s2956_s10 = sld [smem:[#allocation88_spill]] }
  0xf6   :  { %s1759_s13 = sld [smem:[#allocation2 + $0x55]]  ;;  %v103_v41 = vadd.f32 %v101_v17, %v97_v23 }
  0xf7   :  { %s1765_s26 = sld [smem:[#allocation2 + $0x52]] }
  0xf8   :  { %s2970_s22 = sld [smem:[#allocation105_spill]] }
  0xf9   :  { %s3002_s11 = sld [smem:[#allocation20_spill]] }
  0xfa   :  { %2955 = sst [smem:[#allocation82_spill]] %s1753_s25 }
  0xfb   :  { %s1771_s25 = sld [smem:[#allocation2 + $0x4f]] }
  0xfc   :  { %2958 = sst [smem:[#allocation84_spill]] %s1759_s13 }
  0xfd   :  { %s3003_s12 = sld [smem:[#allocation22_spill]] }
  0xfe   :  { %s3004_s9 = sld [smem:[#allocation25_spill]] }
  0xff   :  { %s3005_s15 = sld [smem:[#allocation33_spill]]  ;;  %v3008_v45 = vstv %s3002_s11 }
 0x100   :  { %s3006_s16 = sld [smem:[#allocation37_spill]]  ;;  %v168_v27 = vmul.f32 %v3008_v45, %v1985_v3  ;;  %v169_v35 = vmul.f32 %v3008_v45, %v2011_v15 }
 0x101   :  { %s3007_s1 = sld [smem:[#allocation41_spill]] }
 0x102   :  { %v170_v7 = vadd.f32 %v168_v27, %v164_v33  ;;  %s3014_s21 = sld [smem:[#allocation26_spill]]  ;;  %v137_v27 = vadd.f32 %v135_v19, %v131_v26 }
 0x103   :  { %v3009_v25 = vstv %s3003_s12  ;;  %s3016_s24 = sld [smem:[#allocation27_spill]] }
 0x104   :  { %v202_v54 = vmul.f32 %v3009_v25, %v1985_v3  ;;  %v3010_v55 = vstv %s3004_s9  ;;  %v3015_v34 = vmov %v3009_v25  ;;  %s3018_s13 = sld [smem:[#allocation28_spill]]  ;;  %v171_v25 = vadd.f32 %v169_v35, %v165_v43 }
 0x105   :  { %v236_v53 = vmul.f32 %v3010_v55, %v1985_v3  ;;  %v3011_v56 = vstv %s3005_s15  ;;  %v3017_v33 = vmov %v3010_v55  ;;  %s3020_s23 = sld [smem:[#allocation29_spill]]  ;;  %v2037_v55 = vpop.trf.xlu0 }
 0x106   :  { %v270_v57 = vmul.f32 %v3011_v56, %v1985_v3  ;;  %v3012_v12 = vstv %s3006_s16  ;;  %v204_v11 = vadd.f32 %v202_v54, %v198_v30  ;;  %v203_v30 = vmul.f32 %v3015_v34, %v2011_v15  ;;  %s3022_s20 = sld [smem:[#allocation30_spill]] }
 0x107   :  { %v304_v16 = vmul.f32 %v3012_v12, %v1985_v3  ;;  %v3013_v18 = vstv %s3007_s1  ;;  %v238_v5 = vadd.f32 %v236_v53, %v232_v46  ;;  %v3021_v21 = vmov %v3012_v12  ;;  %s3024_s7 = sld [smem:[#allocation34_spill]] }
 0x108   :  { %v338_v20 = vmul.f32 %v3013_v18, %v1985_v3  ;;  %v272_v47 = vadd.f32 %v270_v57, %v266_v42  ;;  %v237_v42 = vmul.f32 %v3017_v33, %v2011_v15  ;;  %v305_v22 = vmul.f32 %v3021_v21, %v2011_v15  ;;  %s3025_s28 = sld [smem:[#allocation38_spill]] }
 0x109   :  { %v306_v62 = vadd.f32 %v304_v16, %v300_v38  ;;  %v3023_v46 = vmov %v3013_v18  ;;  %s3026_s27 = sld [smem:[#allocation42_spill]]  ;;  %v205_v54 = vadd.f32 %v203_v30, %v199_v0  ;;  %v3027_v16 = vstv %s3014_s21 }
 0x10a   :  { %v340_v39 = vadd.f32 %v338_v20, %v334_v32  ;;  %v3019_v32 = vmov %v3011_v56  ;;  %v339_v10 = vmul.f32 %v3023_v46, %v2011_v15  ;;  %v239_v53 = vadd.f32 %v237_v42, %v233_v31  ;;  %s3042_s3 = sld [smem:[#allocation47_spill]] }
 0x10b   :  { %v271_v38 = vmul.f32 %v3019_v32, %v2011_v15  ;;  %v307_v57 = vadd.f32 %v305_v22, %v301_v9  ;;  %v106_v18 = vmul.f32 %v3027_v16, %v2037_v55  ;;  %v3028_v20 = vstv %s3016_s24  ;;  %s3043_s0 = sld [smem:[#allocation48_spill]] }
 0x10c   :  { %v341_v12 = vadd.f32 %v339_v10, %v335_v37  ;;  %v140_v45 = vmul.f32 %v3028_v20, %v2037_v55  ;;  %v3029_v34 = vstv %s3018_s13  ;;  %v3030_v26 = vstv %s3020_s23  ;;  %s3044_s2 = sld [smem:[#allocation49_spill]] }
 0x10d   :  { %v273_v56 = vadd.f32 %v271_v38, %v267_v6  ;;  %v174_v23 = vmul.f32 %v3029_v34, %v2037_v55  ;;  %v208_v43 = vmul.f32 %v3030_v26, %v2037_v55  ;;  %v3031_v0 = vstv %s3022_s20  ;;  %v2063_v38 = vpop.trf.xlu0  ;;  %s3045_s4 = sld [smem:[#allocation50_spill]] }
 0x10e   :  { %v242_v31 = vmul.f32 %v3031_v0, %v2037_v55  ;;  %v3032_v6 = vstv %s3024_s7  ;;  %v3033_v37 = vstv %s3025_s28  ;;  %v108_v30 = vadd.f32 %v106_v18, %v102_v63  ;;  %s3046_s6 = sld [smem:[#allocation51_spill]] }
 0x10f   :  { %v276_v9 = vmul.f32 %v3032_v6, %v2037_v55  ;;  %v310_v17 = vmul.f32 %v3033_v37, %v2037_v55  ;;  %v3034_v19 = vstv %s3026_s27  ;;  %v142_v33 = vadd.f32 %v140_v45, %v136_v4  ;;  %s3047_s11 = sld [smem:[#allocation52_spill]] }
 0x110   :  { %v344_v35 = vmul.f32 %v3034_v19, %v2037_v55  ;;  %v176_v42 = vadd.f32 %v174_v23, %v170_v7  ;;  %v210_v32 = vadd.f32 %v208_v43, %v204_v11  ;;  %v244_v21 = vadd.f32 %v242_v31, %v238_v5  ;;  %s3048_s12 = sld [smem:[#allocation53_spill]] }
 0x111   :  { %v278_v22 = vadd.f32 %v276_v9, %v272_v47  ;;  %v312_v46 = vadd.f32 %v310_v17, %v306_v62  ;;  %v107_v20 = vmul.f32 %v3027_v16, %v2063_v38  ;;  %v3035_v34 = vstv %s3016_s24  ;;  %s3049_s9 = sld [smem:[#allocation54_spill]] }
 0x112   :  { %v346_v10 = vadd.f32 %v344_v35, %v340_v39  ;;  %v141_v26 = vmul.f32 %v3035_v34, %v2063_v38  ;;  %v3036_v0 = vstv %s3018_s13  ;;  %v3037_v63 = vstv %s3020_s23  ;;  %s3056_s15 = sld [smem:[#allocation44_spill]] }
 0x113   :  { %v175_v6 = vmul.f32 %v3036_v0, %v2063_v38  ;;  %v209_v4 = vmul.f32 %v3037_v63, %v2063_v38  ;;  %v3038_v7 = vstv %s3022_s20  ;;  %v3039_v5 = vstv %s3024_s7  ;;  %s3059_s16 = sld [smem:[#allocation59_spill]] }
 0x114   :  { %v243_v11 = vmul.f32 %v3038_v7, %v2063_v38  ;;  %v277_v47 = vmul.f32 %v3039_v5, %v2063_v38  ;;  %v3040_v62 = vmov %v3033_v37  ;;  %v3041_v18 = vmov %v3034_v19  ;;  %s3060_s1 = sld [smem:[#allocation62_spill]] }
 0x115   :  { %v311_v39 = vmul.f32 %v3040_v62, %v2063_v38  ;;  %v345_v45 = vmul.f32 %v3041_v18, %v2063_v38  ;;  %v109_v23 = vadd.f32 %v107_v20, %v103_v41  ;;  %v143_v43 = vadd.f32 %v141_v26, %v137_v27  ;;  %s3061_s21 = sld [smem:[#allocation55_spill]] }
 0x116   :  { %v177_v31 = vadd.f32 %v175_v6, %v171_v25  ;;  %v211_v9 = vadd.f32 %v209_v4, %v205_v54  ;;  %v245_v37 = vadd.f32 %v243_v11, %v239_v53  ;;  %v279_v17 = vadd.f32 %v277_v47, %v273_v56  ;;  %s3062_s24 = sld [smem:[#allocation60_spill]] }
 0x117   :  { %v313_v19 = vadd.f32 %v311_v39, %v307_v57  ;;  %v347_v35 = vadd.f32 %v345_v45, %v341_v12  ;;  %v110_v16 = vmax.f32 %v108_v30, %v109_v23  ;;  %v144_v34 = vmax.f32 %v142_v33, %v143_v43  ;;  %s3067_s13 = sld [smem:[#allocation68_spill]] }
 0x118   :  { %v178_v0 = vmax.f32 %v176_v42, %v177_v31  ;;  %v212_v63 = vmax.f32 %v210_v32, %v211_v9  ;;  %v246_v7 = vmax.f32 %v244_v21, %v245_v37  ;;  %v280_v5 = vmax.f32 %v278_v22, %v279_v17  ;;  %s3068_s23 = sld [smem:[#allocation56_spill]] }
 0x119   :  { %v314_v1 = vmax.f32 %v312_v46, %v313_v19  ;;  %v348_v13 = vmax.f32 %v346_v10, %v347_v35  ;;  %v111_v62 = vrot.slane %v110_v16, 4  ;;  %v145_v52 = vrot.slane %v144_v34, 4  ;;  %s3073_s20 = sld [smem:[#allocation63_spill]] }
 0x11a   :  { %v179_v58 = vrot.slane %v178_v0, 4  ;;  %v213_v18 = vrot.slane %v212_v63, 4  ;;  %v247_v41 = vrot.slane %v246_v7, 4  ;;  %v281_v27 = vrot.slane %v280_v5, 4  ;;  %s3078_s7 = sld [smem:[#allocation71_spill]] }
 0x11b   :  { %v315_v25 = vrot.slane %v314_v1, 4  ;;  %v349_v54 = vrot.slane %v348_v13, 4  ;;  %v112_v53 = vmax.f32 %v110_v16, %v111_v62  ;;  %v146_v56 = vmax.f32 %v144_v34, %v145_v52  ;;  %s3081_s28 = sld [smem:[#allocation58_spill]] }
 0x11c   :  { %v180_v57 = vmax.f32 %v178_v0, %v179_v58  ;;  %v214_v12 = vmax.f32 %v212_v63, %v213_v18  ;;  %v248_v30 = vmax.f32 %v246_v7, %v247_v41  ;;  %v282_v33 = vmax.f32 %v280_v5, %v281_v27  ;;  %s3084_s27 = sld [smem:[#allocation67_spill]] }
 0x11d   :  { %v316_v42 = vmax.f32 %v314_v1, %v315_v25  ;;  %v350_v32 = vmax.f32 %v348_v13, %v349_v54  ;;  %v113_v21 = vrot.slane %v112_v53, 2  ;;  %v147_v22 = vrot.slane %v146_v56, 2 }
 0x11e   :  { %v181_v46 = vrot.slane %v180_v57, 2  ;;  %v215_v10 = vrot.slane %v214_v12, 2  ;;  %v249_v20 = vrot.slane %v248_v30, 2  ;;  %v283_v26 = vrot.slane %v282_v33, 2 }
 0x11f   :  { %v317_v6 = vrot.slane %v316_v42, 2  ;;  %v351_v4 = vrot.slane %v350_v32, 2  ;;  %v114_v11 = vmax.f32 %v112_v53, %v113_v21  ;;  %v148_v47 = vmax.f32 %v146_v56, %v147_v22 }
 0x120   :  { %v182_v39 = vmax.f32 %v180_v57, %v181_v46  ;;  %v216_v45 = vmax.f32 %v214_v12, %v215_v10  ;;  %v250_v23 = vmax.f32 %v248_v30, %v249_v20  ;;  %v284_v52 = vmax.f32 %v282_v33, %v283_v26 }
 0x121   :  { %v318_v58 = vmax.f32 %v316_v42, %v317_v6  ;;  %v352_v43 = vmax.f32 %v350_v32, %v351_v4  ;;  %v115_v31 = vrot.slane %v114_v11, 1  ;;  %v149_v1 = vrot.slane %v148_v47, 1 }
 0x122   :  { %v183_v13 = vrot.slane %v182_v39, 1  ;;  %v217_v9 = vrot.slane %v216_v45, 1  ;;  %v251_v37 = vrot.slane %v250_v23, 1  ;;  %v285_v17 = vrot.slane %v284_v52, 1 }
 0x123   :  { %v319_v19 = vrot.slane %v318_v58, 1  ;;  %v353_v35 = vrot.slane %v352_v43, 1  ;;  %v116_v16 = vmax.f32 %v114_v11, %v115_v31  ;;  %v150_v34 = vmax.f32 %v148_v47, %v149_v1 }
 0x124   :  { %v184_v0 = vmax.f32 %v182_v39, %v183_v13  ;;  %v218_v63 = vmax.f32 %v216_v45, %v217_v9  ;;  %v252_v7 = vmax.f32 %v250_v23, %v251_v37  ;;  %v286_v5 = vmax.f32 %v284_v52, %v285_v17 }
 0x125   :  { %v320_v62 = vmax.f32 %v318_v58, %v319_v19  ;;  %v354_v18 = vmax.f32 %v352_v43, %v353_v35  ;;  %v3050_v41 = vstv %s3042_s3  ;;  %v3051_v25 = vstv %s3043_s0  ;;  %s3087_s3 = sld [smem:[#allocation75_spill]] }
 0x126   :  { %v119_v27 = vadd.f32 %v3050_v41, %v116_v16  ;;  %v153_v54 = vadd.f32 %v3051_v25, %v150_v34  ;;  %v3052_v53 = vstv %s3044_s2  ;;  %v3053_v57 = vstv %s3045_s4  ;;  %s3089_s0 = sld [smem:[#allocation64_spill]] }
 0x127   :  { %v187_v56 = vadd.f32 %v3052_v53, %v184_v0  ;;  %v221_v12 = vadd.f32 %v3053_v57, %v218_v63  ;;  %v3054_v30 = vstv %s3046_s6  ;;  %v3055_v42 = vstv %s3047_s11  ;;  %s3093_s2 = sld [smem:[#allocation72_spill]] }
 0x128   :  { %v255_v33 = vadd.f32 %v3054_v30, %v252_v7  ;;  %v289_v32 = vadd.f32 %v3055_v42, %v286_v5  ;;  %v3057_v21 = vstv %s3048_s12  ;;  %v3058_v46 = vstv %s3049_s9  ;;  %s3097_s4 = sld [smem:[#allocation78_spill]] }
 0x129   :  { %v323_v22 = vadd.f32 %v3057_v21, %v320_v62  ;;  %v357_v10 = vadd.f32 %v3058_v46, %v354_v18  ;;  %v120_v20 = vmax.f32 %v119_v27, 0.0  ;;  %v154_v26 = vmax.f32 %v153_v54, 0.0  ;;  %s3100_s6 = sld [smem:[#allocation66_spill]] }
 0x12a   :  { %v188_v6 = vmax.f32 %v187_v56, 0.0  ;;  %v222_v4 = vmax.f32 %v221_v12, 0.0  ;;  %v256_v11 = vmax.f32 %v255_v33, 0.0  ;;  %v290_v47 = vmax.f32 %v289_v32, 0.0  ;;  %s3103_s11 = sld [smem:[#allocation76_spill]] }
 0x12b   :  { %v324_v39 = vmax.f32 %v323_v22, 0.0  ;;  %v358_v45 = vmax.f32 %v357_v10, 0.0  ;;  %121 = vst [vmem:[#allocation7] sm:$0x1] %v120_v20  ;;  %155 = vst [vmem:[#allocation7 + $0x1] sm:$0x1] %v154_v26  ;;  %v3063_v23 = vstv %s3056_s15  ;;  %v3065_v31 = vstv %s3059_s16 }
 0x12c   :  { %189 = vst [vmem:[#allocation7 + $0x2] sm:$0x1] %v188_v6  ;;  %223 = vst [vmem:[#allocation7 + $0x3] sm:$0x1] %v222_v4  ;;  %v366_v52 = vmul.f32 %v3063_v23, %v1913_v49  ;;  %v3064_v58 = vmov %v3063_v23  ;;  %v372_v1 = vmul.f32 %v3065_v31, %v1985_v3  ;;  %v3066_v13 = vmov %v3065_v31  ;;  %s3105_s12 = sld [smem:[#allocation77_spill]] }
 0x12d   :  { %v367_v43 = vmul.f32 %v3064_v58, %v1959_v29  ;;  %v373_v9 = vmul.f32 %v3066_v13, %v2011_v15  ;;  %257 = vst [vmem:[#allocation7 + $0x4] sm:$0x1] %v256_v11  ;;  %291 = vst [vmem:[#allocation7 + $0x5] sm:$0x1] %v290_v47  ;;  %v3069_v37 = vstv %s3060_s1  ;;  %v3071_v16 = vstv %s3061_s21  ;;  %s3107_s9 = sld [smem:[#allocation80_spill]] }
 0x12e   :  { %325 = vst [vmem:[#allocation7 + $0x6] sm:$0x1] %v324_v39  ;;  %359 = vst [vmem:[#allocation7 + $0x7] sm:$0x1] %v358_v45  ;;  %v378_v17 = vmul.f32 %v3069_v37, %v2037_v55  ;;  %v3070_v19 = vmov %v3069_v37  ;;  %v400_v34 = vmul.f32 %v3071_v16, %v1913_v49  ;;  %v3072_v0 = vmov %v3071_v16  ;;  %s3112_s15 = sld [smem:[#allocation81_spill]] }
 0x12f   :  { %v379_v35 = vmul.f32 %v3070_v19, %v2063_v38  ;;  %v401_v63 = vmul.f32 %v3072_v0, %v1959_v29  ;;  %v368_v7 = vadd.f32 %v366_v52, %v1830_v14  ;;  %v369_v5 = vadd.f32 %v367_v43, %v1896_v24  ;;  %s3114_s16 = sld [smem:[#allocation70_spill]] }
 0x130   :  { %v3074_v62 = vstv %s3062_s24  ;;  %v402_v25 = vadd.f32 %v400_v34, %v1835_v8  ;;  %v3076_v53 = vstv %s3067_s13  ;;  %v3079_v30 = vstv %s3068_s23  ;;  %s3116_s1 = sld [smem:[#allocation83_spill]] }
 0x131   :  { %v406_v18 = vmul.f32 %v3074_v62, %v1985_v3  ;;  %v3075_v41 = vmov %v3074_v62  ;;  %v403_v54 = vadd.f32 %v401_v63, %v1901_v28  ;;  %v412_v56 = vmul.f32 %v3076_v53, %v2037_v55  ;;  %s3136_s21 = sld [smem:[#allocation93_spill]] }
 0x132   :  { %v407_v27 = vmul.f32 %v3075_v41, %v2011_v15  ;;  %v3077_v57 = vmov %v3076_v53  ;;  %v374_v14 = vadd.f32 %v372_v1, %v368_v7  ;;  %v375_v24 = vadd.f32 %v373_v9, %v369_v5  ;;  %s3144_s24 = sld [smem:[#allocation86_spill]] }
 0x133   :  { %v413_v12 = vmul.f32 %v3077_v57, %v2063_v38  ;;  %v434_v33 = vmul.f32 %v3079_v30, %v1913_v49  ;;  %v3080_v42 = vmov %v3079_v30  ;;  %v408_v8 = vadd.f32 %v406_v18, %v402_v25  ;;  %s3152_s13 = sld [smem:[#allocation97_spill]] }
 0x134   :  { %v435_v32 = vmul.f32 %v3080_v42, %v1959_v29  ;;  %v409_v21 = vadd.f32 %v407_v27, %v403_v54  ;;  %v3082_v28 = vstv %s3073_s20  ;;  %v380_v20 = vadd.f32 %v378_v17, %v374_v14  ;;  %s3159_s23 = sld [smem:[#allocation87_spill]] }
 0x135   :  { %v440_v22 = vmul.f32 %v3082_v28, %v1985_v3  ;;  %v3083_v46 = vmov %v3082_v28  ;;  %v381_v26 = vadd.f32 %v379_v35, %v375_v24  ;;  %v436_v6 = vadd.f32 %v434_v33, %v1840_v2  ;;  %s3161_s20 = sld [smem:[#allocation95_spill]] }
 0x136   :  { %v441_v10 = vmul.f32 %v3083_v46, %v2011_v15  ;;  %v437_v4 = vadd.f32 %v435_v32, %v1906_v36  ;;  %v414_v11 = vadd.f32 %v412_v56, %v408_v8  ;;  %v415_v47 = vadd.f32 %v413_v12, %v409_v21 }
 0x137   :  { %v3085_v39 = vstv %s3078_s7  ;;  %v382_v58 = vmax.f32 %v380_v20, %v381_v26  ;;  %v442_v43 = vadd.f32 %v440_v22, %v436_v6  ;;  %v3088_v1 = vstv %s3081_s28  ;;  %s3162_s7 = sld [smem:[#allocation96_spill]] }
 0x138   :  { %v446_v45 = vmul.f32 %v3085_v39, %v2037_v55  ;;  %v3086_v23 = vmov %v3085_v39  ;;  %v443_v31 = vadd.f32 %v441_v10, %v437_v4  ;;  %v468_v13 = vmul.f32 %v3088_v1, %v1913_v49  ;;  %s3165_s28 = sld [smem:[#allocation101_spill]] }
 0x139   :  { %v447_v52 = vmul.f32 %v3086_v23, %v2063_v38  ;;  %v416_v2 = vmax.f32 %v414_v11, %v415_v47  ;;  %v3090_v36 = vmov %v3088_v1  ;;  %v3091_v37 = vstv %s3084_s27  ;;  %s3174_s27 = sld [smem:[#allocation98_spill]] }
 0x13a   :  { %v469_v9 = vmul.f32 %v3090_v36, %v1959_v29  ;;  %v474_v17 = vmul.f32 %v3091_v37, %v1985_v3  ;;  %v3092_v19 = vmov %v3091_v37  ;;  %v383_v16 = vrot.slane %v382_v58, 4 }
 0x13b   :  { %v475_v35 = vmul.f32 %v3092_v19, %v2011_v15  ;;  %v448_v34 = vadd.f32 %v446_v45, %v442_v43  ;;  %v449_v0 = vadd.f32 %v447_v52, %v443_v31  ;;  %v470_v63 = vadd.f32 %v468_v13, %v1845_v60 }
 0x13c   :  { %v417_v7 = vrot.slane %v416_v2, 4  ;;  %v471_v5 = vadd.f32 %v469_v9, %v1911_v40  ;;  %v3094_v62 = vstv %s3087_s3  ;;  %v384_v25 = vmax.f32 %v382_v58, %v383_v16  ;;  %s2345_s3 = sld [smem:[#allocation5 + $0x12]] }
 0x13d   :  { %v480_v18 = vmul.f32 %v3094_v62, %v2037_v55  ;;  %v3095_v41 = vmov %v3094_v62  ;;  %v450_v54 = vmax.f32 %v448_v34, %v449_v0  ;;  %v476_v53 = vadd.f32 %v474_v17, %v470_v63 }
 0x13e   :  { %v481_v27 = vmul.f32 %v3095_v41, %v2063_v38  ;;  %v3096_v56 = vstv %s3089_s0  ;;  %v418_v12 = vmax.f32 %v416_v2, %v417_v7  ;;  %v477_v14 = vadd.f32 %v475_v35, %v471_v5  ;;  %s3176_s0 = sld [smem:[#allocation100_spill]] }
 0x13f   :  { %v502_v57 = vmul.f32 %v3096_v56, %v1913_v49  ;;  %v3098_v60 = vmov %v3096_v56  ;;  %v3099_v40 = vstv %s3093_s2  ;;  %v385_v33 = vrot.slane %v384_v25, 2  ;;  %s3185_s2 = sld [smem:[#allocation103_spill]] }
 0x140   :  { %v503_v24 = vmul.f32 %v3098_v60, %v1959_v29  ;;  %v508_v30 = vmul.f32 %v3099_v40, %v1985_v3  ;;  %v451_v42 = vrot.slane %v450_v54, 4  ;;  %v482_v32 = vadd.f32 %v480_v18, %v476_v53 }
 0x141   :  { %v504_v8 = vadd.f32 %v502_v57, %v1852_v61  ;;  %v419_v21 = vrot.slane %v418_v12, 2  ;;  %v483_v28 = vadd.f32 %v481_v27, %v477_v14  ;;  %v3101_v46 = vmov %v3099_v40 }
 0x142   :  { %v505_v22 = vadd.f32 %v503_v24, %v1918_v44  ;;  %v509_v10 = vmul.f32 %v3101_v46, %v2011_v15  ;;  %v386_v20 = vmax.f32 %v384_v25, %v385_v33  ;;  %v452_v26 = vmax.f32 %v450_v54, %v451_v42 }
 0x143   :  { %v510_v6 = vadd.f32 %v508_v30, %v504_v8  ;;  %v3102_v4 = vstv %s3097_s4  ;;  %v420_v47 = vmax.f32 %v418_v12, %v419_v21  ;;  %v484_v39 = vmax.f32 %v482_v32, %v483_v28  ;;  %s2372_s4 = sld [smem:[#allocation2 + $0x53]] }
 0x144   :  { %v514_v11 = vmul.f32 %v3102_v4, %v2037_v55  ;;  %v511_v45 = vadd.f32 %v509_v10, %v505_v22  ;;  %v3104_v61 = vmov %v3102_v4  ;;  %v387_v52 = vrot.slane %v386_v20, 1 }
 0x145   :  { %v515_v23 = vmul.f32 %v3104_v61, %v2063_v38  ;;  %v453_v44 = vrot.slane %v452_v26, 2  ;;  %v3106_v43 = vstv %s3100_s6  ;;  %v421_v1 = vrot.slane %v420_v47, 1  ;;  %s3186_s6 = sld [smem:[#allocation94_spill]] }
 0x146   :  { %v516_v58 = vadd.f32 %v514_v11, %v510_v6  ;;  %v536_v31 = vmul.f32 %v3106_v43, %v1913_v49  ;;  %v485_v13 = vrot.slane %v484_v39, 4  ;;  %v3108_v36 = vmov %v3106_v43 }
 0x147   :  { %v517_v2 = vadd.f32 %v515_v23, %v511_v45  ;;  %v537_v9 = vmul.f32 %v3108_v36, %v1959_v29  ;;  %v388_v37 = vmax.f32 %v386_v20, %v387_v52  ;;  %v454_v17 = vmax.f32 %v452_v26, %v453_v44 }
 0x148   :  { %v538_v19 = vadd.f32 %v536_v31, %v1857_v50  ;;  %v3109_v35 = vstv %s3103_s11  ;;  %v422_v34 = vmax.f32 %v420_v47, %v421_v1  ;;  %v486_v0 = vmax.f32 %v484_v39, %v485_v13  ;;  %s3196_s11 = sld [smem:[#allocation106_spill]] }
 0x149   :  { %v542_v16 = vmul.f32 %v3109_v35, %v1985_v3  ;;  %v518_v63 = vmax.f32 %v516_v58, %v517_v2  ;;  %v539_v7 = vadd.f32 %v537_v9, %v1923_v48  ;;  %v3110_v5 = vstv %s3105_s12  ;;  %s3198_s12 = sld [smem:[#allocation102_spill]] }
 0x14a   :  { %v391_v62 = vadd.f32 %v3110_v5, %v388_v37  ;;  %v455_v18 = vrot.slane %v454_v17, 1  ;;  %v3111_v41 = vmov %v3109_v35  ;;  %v3113_v54 = vstv %s3107_s9  ;;  %s2408_s9 = sld [smem:[#allocation5 + $0x13]] }
 0x14b   :  { %v543_v27 = vmul.f32 %v3111_v41, %v2011_v15  ;;  %v544_v25 = vadd.f32 %v542_v16, %v538_v19  ;;  %v425_v50 = vadd.f32 %v3113_v54, %v422_v34  ;;  %v487_v53 = vrot.slane %v486_v0, 2 }
 0x14c   :  { %v519_v56 = vrot.slane %v518_v63, 4  ;;  %v3115_v57 = vstv %s2949_s30  ;;  %v392_v14 = vmax.f32 %v391_v62, 0.0  ;;  %v456_v48 = vmax.f32 %v454_v17, %v455_v18  ;;  %s3121_s30 = sld [smem:[#allocation79_spill]]  ;;  %v3131_v62 = vld [vmem:[#allocation109_spill] sm:$0xff] }
 0x14d   :  { %v548_v12 = vmul.f32 %v3115_v57, %v2037_v55  ;;  %v545_v60 = vadd.f32 %v543_v27, %v539_v7  ;;  %v3117_v24 = vmov %v3115_v57  ;;  %v426_v30 = vmax.f32 %v425_v50, 0.0 }
 0x14e   :  { %v549_v40 = vmul.f32 %v3117_v24, %v2063_v38  ;;  %v488_v33 = vmax.f32 %v486_v0, %v487_v53  ;;  %v520_v42 = vmax.f32 %v518_v63, %v519_v56  ;;  %393 = vst [vmem:[#allocation7 + $0x8] sm:$0x1] %v392_v14  ;;  %v3118_v8 = vstv %s3112_s15  ;;  %s2413_s15 = sld [smem:[#allocation2 + $0x59]] }
 0x14f   :  { %v550_v32 = vadd.f32 %v548_v12, %v544_v25  ;;  %v459_v21 = vadd.f32 %v3118_v8, %v456_v48  ;;  %v3119_v22 = vstv %s3114_s16  ;;  %427 = vst [vmem:[#allocation7 + $0x9] sm:$0x1] %v426_v30  ;;  %v3122_v4 = vstv %s3116_s1  ;;  %v3132_v25 = vld [vmem:[#allocation110_spill] sm:$0xff]  ;;  %s2426_s16 = sld [smem:[#allocation2 + $0x5a]] }
 0x150   :  { %v551_v28 = vadd.f32 %v549_v40, %v545_v60  ;;  %v570_v46 = vmul.f32 %v3119_v22, %v1913_v49  ;;  %v3120_v10 = vmov %v3119_v22  ;;  %v489_v26 = vrot.slane %v488_v33, 1  ;;  %s2434_s1 = sld [smem:[#allocation2 + $0x5b]] }
 0x151   :  { %v571_v20 = vmul.f32 %v3120_v10, %v1959_v29  ;;  %v521_v6 = vrot.slane %v520_v42, 2  ;;  %v576_v11 = vmul.f32 %v3122_v4, %v1985_v3  ;;  %v3123_v47 = vmov %v3122_v4 }
 0x152   :  { %v577_v39 = vmul.f32 %v3123_v47, %v2011_v15  ;;  %v460_v45 = vmax.f32 %v459_v21, 0.0  ;;  %v552_v61 = vmax.f32 %v550_v32, %v551_v28  ;;  %v572_v23 = vadd.f32 %v570_v46, %v1862_v59  ;;  %v3142_v46 = vld [vmem:[#allocation108_spill] sm:$0xff] }
 0x153   :  { %v573_v52 = vadd.f32 %v571_v20, %v1928_v51  ;;  %v490_v44 = vmax.f32 %v488_v33, %v489_v26  ;;  %v522_v58 = vmax.f32 %v520_v42, %v521_v6  ;;  %v3124_v43 = vstv %s2956_s10  ;;  %s3130_s10 = sld [smem:[#allocation74_spill]]  ;;  %v3139_v42 = vld [vmem:[#allocation107_spill] sm:$0xff] }
 0x154   :  { %v582_v31 = vmul.f32 %v3124_v43, %v2037_v55  ;;  %v3125_v1 = vmov %v3124_v43  ;;  %461 = vst [vmem:[#allocation7 + $0xa] sm:$0x1] %v460_v45  ;;  %v553_v2 = vrot.slane %v552_v61, 4  ;;  %v578_v36 = vadd.f32 %v576_v11, %v572_v23 }
 0x155   :  { %v583_v13 = vmul.f32 %v3125_v1, %v2063_v38  ;;  %v579_v9 = vadd.f32 %v577_v39, %v573_v52  ;;  %v3126_v37 = vstv %s3121_s30  ;;  %v3127_v19 = vstv %s2951_s8  ;;  %s3134_s8 = sld [smem:[#allocation89_spill]] }
 0x156   :  { %v604_v17 = vmul.f32 %v3126_v37, %v1913_v49  ;;  %v493_v59 = vadd.f32 %v3127_v19, %v490_v44  ;;  %v523_v51 = vrot.slane %v522_v58, 1  ;;  %v3128_v35 = vmov %v3126_v37  ;;  %s3205_s30 = sld [smem:[#allocation104_spill]] }
 0x157   :  { %v605_v16 = vmul.f32 %v3128_v35, %v1959_v29  ;;  %v3129_v34 = vstv %s2952_s5  ;;  %v554_v63 = vmax.f32 %v552_v61, %v553_v2  ;;  %v584_v7 = vadd.f32 %v582_v31, %v578_v36  ;;  %s3141_s5 = sld [smem:[#allocation99_spill]] }
 0x158   :  { %v610_v0 = vmul.f32 %v3129_v34, %v1985_v3  ;;  %v585_v5 = vadd.f32 %v583_v13, %v579_v9  ;;  %v606_v18 = vadd.f32 %v604_v17, %v3131_v62  ;;  %v494_v41 = vmax.f32 %v493_v59, 0.0 }
 0x159   :  { %v524_v27 = vmax.f32 %v522_v58, %v523_v51  ;;  %v607_v54 = vadd.f32 %v605_v16, %v3132_v25  ;;  %v3133_v50 = vmov %v3129_v34  ;;  %v555_v56 = vrot.slane %v554_v63, 2 }
 0x15a   :  { %v611_v53 = vmul.f32 %v3133_v50, %v2011_v15  ;;  %v586_v57 = vmax.f32 %v584_v7, %v585_v5  ;;  %v612_v12 = vadd.f32 %v610_v0, %v606_v18  ;;  %v3135_v14 = vstv %s1646_s19  ;;  %495 = vst [vmem:[#allocation7 + $0xb] sm:$0x1] %v494_v41  ;;  %s3148_s19 = sld [smem:[#allocation90_spill]] }
 0x15b   :  { %v616_v48 = vmul.f32 %v3135_v14, %v2037_v55  ;;  %v3137_v60 = vstv %s1640_s29  ;;  %v3138_v30 = vmov %v3135_v14  ;;  %v3140_v32 = vstv %s3130_s10  ;;  %s3150_s29 = sld [smem:[#allocation91_spill]] }
 0x15c   :  { %v527_v24 = vadd.f32 %v3137_v60, %v524_v27  ;;  %v613_v40 = vadd.f32 %v611_v53, %v607_v54  ;;  %v617_v33 = vmul.f32 %v3138_v30, %v2063_v38  ;;  %v634_v8 = vmul.f32 %v3140_v32, %v3139_v42  ;;  %s2441_s10 = sld [smem:[#allocation2 + $0x5d]] }
 0x15d   :  { %v556_v21 = vmax.f32 %v554_v63, %v555_v56  ;;  %v587_v28 = vrot.slane %v586_v57, 4  ;;  %v618_v22 = vadd.f32 %v616_v48, %v612_v12  ;;  %v3143_v10 = vmov %v3140_v32 }
 0x15e   :  { %v635_v20 = vmul.f32 %v3143_v10, %v3142_v46  ;;  %v528_v26 = vmax.f32 %v527_v24, 0.0  ;;  %v619_v6 = vadd.f32 %v617_v33, %v613_v40  ;;  %v3145_v4 = vstv %s3134_s8  ;;  %s2445_s8 = sld [smem:[#allocation2 + $0x5e]] }
 0x15f   :  { %v638_v11 = vmul.f32 %v3145_v4, %v1913_v49  ;;  %v3146_v47 = vmov %v3145_v4  ;;  %v557_v45 = vrot.slane %v556_v21, 1  ;;  %v588_v61 = vmax.f32 %v586_v57, %v587_v28 }
 0x160   :  { %v639_v39 = vmul.f32 %v3146_v47, %v1959_v29  ;;  %v3147_v23 = vstv %s3136_s21  ;;  %529 = vst [vmem:[#allocation7 + $0xc] sm:$0x1] %v528_v26  ;;  %v620_v43 = vmax.f32 %v618_v22, %v619_v6  ;;  %v3151_v13 = vstv %s3141_s5  ;;  %s2450_s21 = sld [smem:[#allocation2 + $0x5f]] }
 0x161   :  { %v644_v52 = vmul.f32 %v3147_v23, %v1985_v3  ;;  %v3149_v44 = vmov %v3147_v23  ;;  %v640_v31 = vadd.f32 %v638_v11, %v634_v8  ;;  %v650_v2 = vmul.f32 %v3151_v13, %v2037_v55  ;;  %s3208_s5 = sld [smem:[#allocation82_spill]] }
 0x162   :  { %v645_v58 = vmul.f32 %v3149_v44, %v2011_v15  ;;  %v641_v1 = vadd.f32 %v639_v39, %v635_v20  ;;  %v558_v36 = vmax.f32 %v556_v21, %v557_v45  ;;  %v589_v9 = vrot.slane %v588_v61, 2 }
 0x163   :  { %v3153_v37 = vmov %v3151_v13  ;;  %v3154_v19 = vstv %s3144_s24  ;;  %v621_v51 = vrot.slane %v620_v43, 4  ;;  %v646_v35 = vadd.f32 %v644_v52, %v640_v31  ;;  %s2461_s24 = sld [smem:[#allocation5 + $0x15]] }
 0x164   :  { %v651_v17 = vmul.f32 %v3153_v37, %v2063_v38  ;;  %v668_v59 = vmul.f32 %v3154_v19, %v3139_v42  ;;  %v647_v16 = vadd.f32 %v645_v58, %v641_v1  ;;  %v3155_v34 = vmov %v3154_v19 }
 0x165   :  { %v669_v0 = vmul.f32 %v3155_v34, %v3142_v46  ;;  %v3156_v63 = vstv %s3148_s19  ;;  %v590_v5 = vmax.f32 %v588_v61, %v589_v9  ;;  %v3157_v62 = vstv %s3150_s29  ;;  %s2470_s19 = sld [smem:[#allocation2 + $0x61]] }
 0x166   :  { %v561_v7 = vadd.f32 %v3156_v63, %v558_v36  ;;  %v672_v18 = vmul.f32 %v3157_v62, %v1913_v49  ;;  %v3158_v41 = vmov %v3157_v62  ;;  %v622_v25 = vmax.f32 %v620_v43, %v621_v51  ;;  %s2475_s29 = sld [smem:[#allocation2 + $0x62]] }
 0x167   :  { %v673_v27 = vmul.f32 %v3158_v41, %v1959_v29  ;;  %v652_v54 = vadd.f32 %v650_v2, %v646_v35  ;;  %v653_v50 = vadd.f32 %v651_v17, %v647_v16  ;;  %v3160_v53 = vstv %s3152_s13  ;;  %s2480_s13 = sld [smem:[#allocation2 + $0x63]] }
 0x168   :  { %v678_v56 = vmul.f32 %v3160_v53, %v1985_v3  ;;  %v562_v57 = vmax.f32 %v561_v7, 0.0  ;;  %v591_v12 = vrot.slane %v590_v5, 1  ;;  %v674_v14 = vadd.f32 %v672_v18, %v668_v59 }
 0x169   :  { %v675_v48 = vadd.f32 %v673_v27, %v669_v0  ;;  %v623_v60 = vrot.slane %v622_v25, 2  ;;  %v654_v24 = vmax.f32 %v652_v54, %v653_v50  ;;  %v3163_v40 = vmov %v3160_v53 }
 0x16a   :  { %v679_v30 = vmul.f32 %v3163_v40, %v2011_v15  ;;  %v3164_v33 = vstv %s1717_s18  ;;  %563 = vst [vmem:[#allocation7 + $0xd] sm:$0x1] %v562_v57  ;;  %v592_v8 = vmax.f32 %v590_v5, %v591_v12  ;;  %v680_v21 = vadd.f32 %v678_v56, %v674_v14  ;;  %s3172_s18 = sld [smem:[#allocation92_spill]] }
 0x16b   :  { %v684_v32 = vmul.f32 %v3164_v33, %v2037_v55  ;;  %v3166_v28 = vmov %v3164_v33  ;;  %v3167_v10 = vstv %s3159_s23  ;;  %v624_v26 = vmax.f32 %v622_v25, %v623_v60  ;;  %s2486_s23 = sld [smem:[#allocation5 + $0x16]] }
 0x16c   :  { %v685_v22 = vmul.f32 %v3166_v28, %v2063_v38  ;;  %v702_v20 = vmul.f32 %v3167_v10, %v3139_v42  ;;  %v655_v6 = vrot.slane %v654_v24, 4  ;;  %v681_v4 = vadd.f32 %v679_v30, %v675_v48 }
 0x16d   :  { %v3168_v11 = vmov %v3167_v10  ;;  %v3169_v39 = vstv %s3161_s20  ;;  %v686_v61 = vadd.f32 %v684_v32, %v680_v21  ;;  %v3170_v23 = vstv %s3162_s7  ;;  %s2491_s20 = sld [smem:[#allocation2 + $0x64]] }
 0x16e   :  { %v703_v47 = vmul.f32 %v3168_v11, %v3142_v46  ;;  %v595_v45 = vadd.f32 %v3169_v39, %v592_v8  ;;  %v706_v52 = vmul.f32 %v3170_v23, %v1913_v49  ;;  %v3171_v44 = vmov %v3170_v23  ;;  %s2496_s7 = sld [smem:[#allocation2 + $0x65]] }
 0x16f   :  { %v707_v58 = vmul.f32 %v3171_v44, %v1959_v29  ;;  %v625_v43 = vrot.slane %v624_v26, 1  ;;  %v656_v31 = vmax.f32 %v654_v24, %v655_v6  ;;  %v687_v1 = vadd.f32 %v685_v22, %v681_v4 }
 0x170   :  { %v3173_v13 = vstv %s3165_s28  ;;  %v596_v36 = vmax.f32 %v595_v45, 0.0  ;;  %v708_v9 = vadd.f32 %v706_v52, %v702_v20  ;;  %v3177_v16 = vstv %s1747_s17  ;;  %s2367_s17 = sld [smem:[#allocation2 + $0x60]] }
 0x171   :  { %v712_v2 = vmul.f32 %v3173_v13, %v1985_v3  ;;  %v709_v37 = vadd.f32 %v707_v58, %v703_v47  ;;  %v3175_v17 = vmov %v3173_v13  ;;  %v626_v59 = vmax.f32 %v624_v26, %v625_v43  ;;  %s2502_s28 = sld [smem:[#allocation2 + $0x66]] }
 0x172   :  { %v713_v19 = vmul.f32 %v3175_v17, %v2011_v15  ;;  %v657_v51 = vrot.slane %v656_v31, 2  ;;  %v688_v35 = vmax.f32 %v686_v61, %v687_v1  ;;  %v718_v34 = vmul.f32 %v3177_v16, %v2037_v55  ;;  %597 = vst [vmem:[#allocation7 + $0xe] sm:$0x1] %v596_v36 }
 0x173   :  { %v714_v0 = vadd.f32 %v712_v2, %v708_v9  ;;  %v3178_v7 = vmov %v3177_v16  ;;  %v3179_v62 = vstv %s3172_s18  ;;  %v3180_v41 = vstv %s3174_s27  ;;  %s2508_s18 = sld [smem:[#allocation2 + $0x67]] }
 0x174   :  { %v715_v63 = vadd.f32 %v713_v19, %v709_v37  ;;  %v719_v5 = vmul.f32 %v3178_v7, %v2063_v38  ;;  %v736_v18 = vmul.f32 %v3179_v62, %v3139_v42  ;;  %v629_v27 = vadd.f32 %v3180_v41, %v626_v59  ;;  %s2511_s27 = sld [smem:[#allocation5 + $0x17]] }
 0x175   :  { %v658_v25 = vmax.f32 %v656_v31, %v657_v51  ;;  %v689_v54 = vrot.slane %v688_v35, 4  ;;  %v3181_v50 = vmov %v3179_v62  ;;  %v720_v56 = vadd.f32 %v718_v34, %v714_v0 }
 0x176   :  { %v737_v53 = vmul.f32 %v3181_v50, %v3142_v46  ;;  %v721_v57 = vadd.f32 %v719_v5, %v715_v63  ;;  %v3182_v12 = vstv %s3176_s0  ;;  %v630_v24 = vmax.f32 %v629_v27, 0.0  ;;  %s2520_s0 = sld [smem:[#allocation2 + $0x69]] }
 0x177   :  { %v740_v14 = vmul.f32 %v3182_v12, %v1913_v49  ;;  %v3183_v48 = vmov %v3182_v12  ;;  %v659_v40 = vrot.slane %v658_v25, 1  ;;  %v690_v30 = vmax.f32 %v688_v35, %v689_v54 }
 0x178   :  { %v741_v60 = vmul.f32 %v3183_v48, %v1959_v29  ;;  %v3184_v33 = vstv %s1735_s14  ;;  %v722_v8 = vmax.f32 %v720_v56, %v721_v57  ;;  %631 = vst [vmem:[#allocation7 + $0xf] sm:$0x1] %v630_v24  ;;  %v3188_v6 = vstv %s1771_s25  ;;  %s2392_s14 = sld [smem:[#allocation2 + $0x56]] }
 0x179   :  { %v746_v32 = vmul.f32 %v3184_v33, %v1985_v3  ;;  %v742_v21 = vadd.f32 %v740_v14, %v736_v18  ;;  %v3187_v22 = vmov %v3184_v33  ;;  %v660_v20 = vmax.f32 %v658_v25, %v659_v40  ;;  %s2397_s25 = sld [smem:[#allocation2 + $0x57]] }
 0x17a   :  { %v743_v28 = vadd.f32 %v741_v60, %v737_v53  ;;  %v747_v10 = vmul.f32 %v3187_v22, %v2011_v15  ;;  %v691_v26 = vrot.slane %v690_v30, 2  ;;  %v752_v4 = vmul.f32 %v3188_v6, %v2037_v55 }
 0x17b   :  { %v3189_v11 = vmov %v3188_v6  ;;  %v723_v39 = vrot.slane %v722_v8, 4  ;;  %v730_v45 = vstv %s2345_s3  ;;  %v748_v61 = vadd.f32 %v746_v32, %v742_v21  ;;  %s2517_s3 = sld [smem:[#allocation2 + $0x68]] }
 0x17c   :  { %v753_v47 = vmul.f32 %v3189_v11, %v2063_v38  ;;  %v749_v23 = vadd.f32 %v747_v10, %v743_v28  ;;  %v3190_v52 = vstv %s3185_s2  ;;  %v692_v58 = vmax.f32 %v690_v30, %v691_v26  ;;  %s2531_s2 = sld [smem:[#allocation2 + $0x6b]] }
 0x17d   :  { %v663_v44 = vadd.f32 %v3190_v52, %v660_v20  ;;  %v3191_v43 = vstv %s3186_s6  ;;  %v724_v2 = vmax.f32 %v722_v8, %v723_v39  ;;  %v754_v36 = vadd.f32 %v752_v4, %v748_v61  ;;  %s2537_s6 = sld [smem:[#allocation5 + $0x18]] }
 0x17e   :  { %v770_v31 = vmul.f32 %v3191_v43, %v3139_v42  ;;  %v3192_v1 = vmov %v3191_v43  ;;  %v755_v9 = vadd.f32 %v753_v47, %v749_v23  ;;  %v3193_v37 = vstv %s2970_s22  ;;  %s3199_s22 = sld [smem:[#allocation84_spill]] }
 0x17f   :  { %v771_v13 = vmul.f32 %v3192_v1, %v3142_v46  ;;  %v774_v17 = vmul.f32 %v3193_v37, %v1913_v49  ;;  %v664_v19 = vmax.f32 %v663_v44, 0.0  ;;  %v693_v59 = vrot.slane %v692_v58, 1 }
 0x180   :  { %v3194_v51 = vmov %v3193_v37  ;;  %v3195_v16 = vstv %s1765_s26  ;;  %v725_v0 = vrot.slane %v724_v2, 2  ;;  %v756_v63 = vmax.f32 %v754_v36, %v755_v9  ;;  %s2418_s26 = sld [smem:[#allocation5 + $0x14]] }
 0x181   :  { %v775_v35 = vmul.f32 %v3194_v51, %v1959_v29  ;;  %v780_v34 = vmul.f32 %v3195_v16, %v1985_v3  ;;  %v776_v7 = vadd.f32 %v774_v17, %v770_v31  ;;  %v3197_v5 = vmov %v3195_v16  ;;  %665 = vst [vmem:[#allocation7 + $0x10] sm:$0x1] %v664_v19 }
 0x182   :  { %v781_v62 = vmul.f32 %v3197_v5, %v2011_v15  ;;  %v694_v18 = vmax.f32 %v692_v58, %v693_v59  ;;  %v785_v27 = vstv %s2372_s4  ;;  %v905_v25 = vstv %s2367_s17  ;;  %s2524_s17 = sld [smem:[#allocation2 + $0x6a]] }
 0x183   :  { %v777_v41 = vadd.f32 %v775_v35, %v771_v13  ;;  %v726_v54 = vmax.f32 %v724_v2, %v725_v0  ;;  %v757_v50 = vrot.slane %v756_v63, 4  ;;  %v782_v53 = vadd.f32 %v780_v34, %v776_v7  ;;  %s2535_s4 = sld [smem:[#allocation2 + $0x6c]] }
 0x184   :  { %v786_v56 = vmul.f32 %v785_v27, %v2037_v55  ;;  %v3200_v57 = vstv %s3196_s11  ;;  %v787_v48 = vmul.f32 %v785_v27, %v2063_v38  ;;  %v3201_v60 = vstv %s3198_s12  ;;  %s2553_s11 = sld [smem:[#allocation2 + $0x70]] }
 0x185   :  { %v697_v12 = vadd.f32 %v3200_v57, %v694_v18  ;;  %v783_v14 = vadd.f32 %v781_v62, %v777_v41  ;;  %v804_v24 = vmul.f32 %v3201_v60, %v3139_v42  ;;  %v727_v40 = vrot.slane %v726_v54, 1  ;;  %s2558_s12 = sld [smem:[#allocation2 + $0x6f]] }
 0x186   :  { %v758_v30 = vmax.f32 %v756_v63, %v757_v50  ;;  %v788_v33 = vadd.f32 %v786_v56, %v782_v53  ;;  %v3202_v32 = vmov %v3201_v60  ;;  %v3203_v22 = vstv %s3199_s22  ;;  %s2565_s22 = sld [smem:[#allocation2 + $0x71]] }
 0x187   :  { %v805_v8 = vmul.f32 %v3202_v32, %v3142_v46  ;;  %v698_v21 = vmax.f32 %v697_v12, 0.0  ;;  %v789_v28 = vadd.f32 %v787_v48, %v783_v14  ;;  %v808_v10 = vmul.f32 %v3203_v22, %v1913_v49 }
 0x188   :  { %v3204_v20 = vmov %v3203_v22  ;;  %v728_v6 = vmax.f32 %v726_v54, %v727_v40  ;;  %v759_v4 = vrot.slane %v758_v30, 2  ;;  %v813_v11 = vstv %s2392_s14  ;;  %s2542_s14 = sld [smem:[#allocation2 + $0x6d]] }
 0x189   :  { %v809_v26 = vmul.f32 %v3204_v20, %v1959_v29  ;;  %v819_v47 = vstv %s2397_s25  ;;  %699 = vst [vmem:[#allocation7 + $0x11] sm:$0x1] %v698_v21  ;;  %v790_v39 = vmax.f32 %v788_v33, %v789_v28  ;;  %v810_v61 = vadd.f32 %v808_v10, %v804_v24  ;;  %s2545_s25 = sld [smem:[#allocation2 + $0x6e]] }
 0x18a   :  { %v814_v52 = vmul.f32 %v813_v11, %v1985_v3  ;;  %v731_v44 = vadd.f32 %v730_v45, %v728_v6  ;;  %v760_v58 = vmax.f32 %v758_v30, %v759_v4  ;;  %v815_v43 = vmul.f32 %v813_v11, %v2011_v15 }
 0x18b   :  { %v811_v23 = vadd.f32 %v809_v26, %v805_v8  ;;  %v820_v31 = vmul.f32 %v819_v47, %v2037_v55  ;;  %v764_v1 = vstv %s2408_s9  ;;  %v791_v13 = vrot.slane %v790_v39, 4  ;;  %s2560_s9 = sld [smem:[#allocation5 + $0x19]] }
 0x18c   :  { %v816_v2 = vadd.f32 %v814_v52, %v810_v61  ;;  %v821_v36 = vmul.f32 %v819_v47, %v2063_v38  ;;  %v732_v9 = vmax.f32 %v731_v44, 0.0  ;;  %v761_v45 = vrot.slane %v760_v58, 1 }
 0x18d   :  { %v817_v37 = vadd.f32 %v815_v43, %v811_v23  ;;  %v3206_v17 = vstv %s3205_s30  ;;  %v792_v59 = vmax.f32 %v790_v39, %v791_v13  ;;  %v841_v34 = vstv %s2413_s15  ;;  %s2567_s15 = sld [smem:[#allocation2 + $0x72]] }
 0x18e   :  { %v838_v19 = vmul.f32 %v3206_v17, %v3139_v42  ;;  %v822_v51 = vadd.f32 %v820_v31, %v816_v2  ;;  %v3207_v35 = vmov %v3206_v17  ;;  %733 = vst [vmem:[#allocation7 + $0x12] sm:$0x1] %v732_v9  ;;  %v762_v0 = vmax.f32 %v760_v58, %v761_v45  ;;  %s2587_s30 = sld [smem:[#allocation2 + $0x75]] }
 0x18f   :  { %v839_v16 = vmul.f32 %v3207_v35, %v3142_v46  ;;  %v823_v63 = vadd.f32 %v821_v36, %v817_v37  ;;  %v842_v7 = vmul.f32 %v841_v34, %v1913_v49  ;;  %v843_v5 = vmul.f32 %v841_v34, %v1959_v29 }
 0x190   :  { %v793_v62 = vrot.slane %v792_v59, 2  ;;  %v798_v18 = vstv %s2418_s26  ;;  %v847_v41 = vstv %s2426_s16  ;;  %v853_v27 = vstv %s2434_s1  ;;  %s2576_s26 = sld [smem:[#allocation2 + $0x74]] }
 0x191   :  { %v765_v54 = vadd.f32 %v764_v1, %v762_v0  ;;  %v824_v50 = vmax.f32 %v822_v51, %v823_v63  ;;  %v844_v53 = vadd.f32 %v842_v7, %v838_v19  ;;  %v845_v56 = vadd.f32 %v843_v5, %v839_v16  ;;  %s2580_s16 = sld [smem:[#allocation2 + $0x73]] }
 0x192   :  { %v794_v57 = vmax.f32 %v792_v59, %v793_v62  ;;  %v848_v12 = vmul.f32 %v847_v41, %v1985_v3  ;;  %v849_v14 = vmul.f32 %v847_v41, %v2011_v15  ;;  %v854_v48 = vmul.f32 %v853_v27, %v2037_v55  ;;  %s2582_s1 = sld [smem:[#allocation5 + $0x1a]] }
 0x193   :  { %v766_v60 = vmax.f32 %v765_v54, 0.0  ;;  %v825_v24 = vrot.slane %v824_v50, 4  ;;  %v855_v40 = vmul.f32 %v853_v27, %v2063_v38  ;;  %v3209_v30 = vstv %s3208_s5  ;;  %s2605_s5 = sld [smem:[#allocation5 + $0x1b]] }
 0x194   :  { %v872_v33 = vmul.f32 %v3209_v30, %v3139_v42  ;;  %v795_v32 = vrot.slane %v794_v57, 1  ;;  %v850_v8 = vadd.f32 %v848_v12, %v844_v53  ;;  %v851_v21 = vadd.f32 %v849_v14, %v845_v56 }
 0x195   :  { %v3210_v28 = vmov %v3209_v30  ;;  %767 = vst [vmem:[#allocation7 + $0x13] sm:$0x1] %v766_v60  ;;  %v826_v10 = vmax.f32 %v824_v50, %v825_v24  ;;  %v875_v20 = vstv %s2441_s10  ;;  %v881_v26 = vstv %s2445_s8  ;;  %s2590_s10 = sld [smem:[#allocation2 + $0x76]] }
 0x196   :  { %v873_v22 = vmul.f32 %v3210_v28, %v3142_v46  ;;  %v887_v6 = vstv %s2450_s21  ;;  %v796_v4 = vmax.f32 %v794_v57, %v795_v32  ;;  %v856_v11 = vadd.f32 %v854_v48, %v850_v8  ;;  %s2599_s8 = sld [smem:[#allocation2 + $0x78]] }
 0x197   :  { %v857_v47 = vadd.f32 %v855_v40, %v851_v21  ;;  %v876_v39 = vmul.f32 %v875_v20, %v1913_v49  ;;  %v827_v61 = vrot.slane %v826_v10, 2  ;;  %v877_v23 = vmul.f32 %v875_v20, %v1959_v29  ;;  %s2603_s21 = sld [smem:[#allocation2 + $0x77]] }
 0x198   :  { %v882_v52 = vmul.f32 %v881_v26, %v1985_v3  ;;  %v883_v44 = vmul.f32 %v881_v26, %v2011_v15  ;;  %v799_v58 = vadd.f32 %v798_v18, %v796_v4  ;;  %v888_v1 = vmul.f32 %v887_v6, %v2037_v55 }
 0x199   :  { %v858_v43 = vmax.f32 %v856_v11, %v857_v47  ;;  %v878_v31 = vadd.f32 %v876_v39, %v872_v33  ;;  %v828_v13 = vmax.f32 %v826_v10, %v827_v61  ;;  %v832_v2 = vstv %s2461_s24  ;;  %s2610_s24 = sld [smem:[#allocation2 + $0x79]] }
 0x19a   :  { %v879_v36 = vadd.f32 %v877_v23, %v873_v22  ;;  %v889_v9 = vmul.f32 %v887_v6, %v2063_v38  ;;  %v800_v45 = vmax.f32 %v799_v58, 0.0  ;;  %v906_v19 = vmul.f32 %v905_v25, %v3139_v42 }
 0x19b   :  { %v859_v37 = vrot.slane %v858_v43, 4  ;;  %v884_v17 = vadd.f32 %v882_v52, %v878_v31  ;;  %v829_v59 = vrot.slane %v828_v13, 1  ;;  %v907_v35 = vmul.f32 %v905_v25, %v3142_v46 }
 0x19c   :  { %v885_v51 = vadd.f32 %v883_v44, %v879_v36  ;;  %v909_v16 = vstv %s2470_s19  ;;  %801 = vst [vmem:[#allocation7 + $0x14] sm:$0x1] %v800_v45  ;;  %v915_v18 = vstv %s2475_s29  ;;  %v921_v41 = vstv %s2480_s13  ;;  %s2613_s19 = sld [smem:[#allocation2 + $0x7a]] }
 0x19d   :  { %v860_v34 = vmax.f32 %v858_v43, %v859_v37  ;;  %v890_v0 = vadd.f32 %v888_v1, %v884_v17  ;;  %v910_v63 = vmul.f32 %v909_v16, %v1913_v49  ;;  %v911_v7 = vmul.f32 %v909_v16, %v1959_v29  ;;  %s2622_s29 = sld [smem:[#allocation2 + $0x7c]] }
 0x19e   :  { %v830_v5 = vmax.f32 %v828_v13, %v829_v59  ;;  %v891_v62 = vadd.f32 %v889_v9, %v885_v51  ;;  %v916_v50 = vmul.f32 %v915_v18, %v1985_v3  ;;  %v917_v57 = vmul.f32 %v915_v18, %v2011_v15  ;;  %s2626_s13 = sld [smem:[#allocation2 + $0x7b]] }
 0x19f   :  { %v861_v27 = vrot.slane %v860_v34, 2  ;;  %v912_v54 = vadd.f32 %v910_v63, %v906_v19  ;;  %v913_v25 = vadd.f32 %v911_v7, %v907_v35  ;;  %v922_v12 = vmul.f32 %v921_v41, %v2037_v55 }
 0x1a0   :  { %v833_v53 = vadd.f32 %v832_v2, %v830_v5  ;;  %v892_v56 = vmax.f32 %v890_v0, %v891_v62  ;;  %v866_v48 = vstv %s2486_s23  ;;  %v923_v24 = vmul.f32 %v921_v41, %v2063_v38  ;;  %s2628_s23 = sld [smem:[#allocation5 + $0x1c]] }
 0x1a1   :  { %v862_v14 = vmax.f32 %v860_v34, %v861_v27  ;;  %v918_v60 = vadd.f32 %v916_v50, %v912_v54  ;;  %v919_v33 = vadd.f32 %v917_v57, %v913_v25  ;;  %v939_v32 = vstv %s2491_s20  ;;  %s2633_s20 = sld [smem:[#allocation2 + $0x7d]] }
 0x1a2   :  { %v834_v40 = vmax.f32 %v833_v53, 0.0  ;;  %v893_v30 = vrot.slane %v892_v56, 4  ;;  %v940_v28 = vmul.f32 %v939_v32, %v3139_v42  ;;  %v941_v22 = vmul.f32 %v939_v32, %v3142_v46 }
 0x1a3   :  { %v863_v8 = vrot.slane %v862_v14, 1  ;;  %v924_v21 = vadd.f32 %v922_v12, %v918_v60  ;;  %v925_v20 = vadd.f32 %v923_v24, %v919_v33  ;;  %v943_v26 = vstv %s2496_s7  ;;  %s2636_s7 = sld [smem:[#allocation2 + $0x7e]] }
 0x1a4   :  { %835 = vst [vmem:[#allocation7 + $0x15] sm:$0x1] %v834_v40  ;;  %v894_v10 = vmax.f32 %v892_v56, %v893_v30  ;;  %v949_v6 = vstv %s2502_s28  ;;  %v944_v11 = vmul.f32 %v943_v26, %v1913_v49  ;;  %v945_v47 = vmul.f32 %v943_v26, %v1959_v29  ;;  %s2647_s28 = sld [smem:[#allocation2 + $0x7f]] }
 0x1a5   :  { %v864_v4 = vmax.f32 %v862_v14, %v863_v8  ;;  %v950_v39 = vmul.f32 %v949_v6, %v1985_v3  ;;  %v926_v23 = vmax.f32 %v924_v21, %v925_v20  ;;  %v951_v52 = vmul.f32 %v949_v6, %v2011_v15 }
 0x1a6   :  { %v895_v61 = vrot.slane %v894_v10, 2  ;;  %v955_v44 = vstv %s2508_s18  ;;  %v946_v43 = vadd.f32 %v944_v11, %v940_v28  ;;  %v947_v31 = vadd.f32 %v945_v47, %v941_v22  ;;  %s2653_s18 = sld [smem:[#allocation5 + $0x1d]] }
 0x1a7   :  { %v867_v58 = vadd.f32 %v866_v48, %v864_v4  ;;  %v956_v1 = vmul.f32 %v955_v44, %v2037_v55  ;;  %v900_v2 = vstv %s2511_s27  ;;  %v927_v36 = vrot.slane %v926_v23, 4  ;;  %s1346_s27 = sld [smem:[#allocation5 + $0x1e]] }
 0x1a8   :  { %v896_v13 = vmax.f32 %v894_v10, %v895_v61  ;;  %v957_v9 = vmul.f32 %v955_v44, %v2063_v38  ;;  %v952_v37 = vadd.f32 %v950_v39, %v946_v43  ;;  %v953_v17 = vadd.f32 %v951_v52, %v947_v31 }
 0x1a9   :  { %v868_v45 = vmax.f32 %v867_v58, 0.0  ;;  %v973_v19 = vstv %s2517_s3  ;;  %v928_v51 = vmax.f32 %v926_v23, %v927_v36  ;;  %v977_v63 = vstv %s2520_s0  ;;  %s1351_s3 = sld [smem:[#allocation5 + $0x1f]]  ;;  %s1409_s0 = smov [#allocation7]  }
 0x1aa   :  { %v897_v59 = vrot.slane %v896_v13, 1  ;;  %v974_v35 = vmul.f32 %v973_v19, %v3139_v42  ;;  %v975_v16 = vmul.f32 %v973_v19, %v3142_v46  ;;  %v958_v34 = vadd.f32 %v956_v1, %v952_v37 }
 0x1ab   :  { %869 = vst [vmem:[#allocation7 + $0x16] sm:$0x1] %v868_v45  ;;  %v959_v0 = vadd.f32 %v957_v9, %v953_v17  ;;  %v983_v7 = vstv %s2524_s17  ;;  %v929_v62 = vrot.slane %v928_v51, 2  ;;  %v978_v18 = vmul.f32 %v977_v63, %v1913_v49  ;;  %s1181_s17 = sshll.u32 %s1409_s0, 4  ;;  %s1182_s17 = int_to_ptr.vmem [resolvable:$true] %s1181_s17 }
 0x1ac   :  { %v898_v5 = vmax.f32 %v896_v13, %v897_v59  ;;  %v979_v41 = vmul.f32 %v977_v63, %v1959_v29  ;;  %v984_v54 = vmul.f32 %v983_v7, %v1985_v3  ;;  %v985_v25 = vmul.f32 %v983_v7, %v2011_v15  ;;  %p1386_p11 = scmp.lt.s32.totalorder %s1182_s17, %s1182_s17 }
 0x1ad   :  { %v960_v27 = vmax.f32 %v958_v34, %v959_v0  ;;  %v989_v50 = vstv %s2531_s2  ;;  %v930_v56 = vmax.f32 %v928_v51, %v929_v62  ;;  %v980_v57 = vadd.f32 %v978_v18, %v974_v35  ;;  %s1381_s2 = scalar_lea.vmem %s1182_s17, 512 }
 0x1ae   :  { %v901_v53 = vadd.f32 %v900_v2, %v898_v5  ;;  %v981_v12 = vadd.f32 %v979_v41, %v975_v16  ;;  %v934_v14 = vstv %s2537_s6  ;;  %v990_v60 = vmul.f32 %v989_v50, %v2037_v55  ;;  %p1382_p10 = scmp.ne.s32.totalorder %s1182_s17, %s1381_s2  ;;  %p1387_p12 = scmp.lt.s32.totalorder %s1381_s2, %s1381_s2 }
 0x1af   :  { %v961_v48 = vrot.slane %v960_v27, 4  ;;  %v991_v24 = vmul.f32 %v989_v50, %v2063_v38  ;;  %v931_v30 = vrot.slane %v930_v56, 1  ;;  %v986_v33 = vadd.f32 %v984_v54, %v980_v57 }
 0x1b0   :  { %v902_v40 = vmax.f32 %v901_v53, 0.0  ;;  %v987_v32 = vadd.f32 %v985_v25, %v981_v12  ;;  %v1007_v21 = vstv %s2535_s4  ;;  %v1011_v28 = vstv %s2542_s14  ;;  %p1388_p13 = por %p1387_p12, %p1386_p11 }
 0x1b1   :  { %v962_v8 = vmax.f32 %v960_v27, %v961_v48  ;;  %v1017_v22 = vstv %s2545_s25  ;;  %v932_v10 = vmax.f32 %v930_v56, %v931_v30  ;;  %v992_v20 = vadd.f32 %v990_v60, %v986_v33 }
 0x1b2   :  { %903 = vst [vmem:[#allocation7 + $0x17] sm:$0x1] %v902_v40  ;;  %v993_v26 = vadd.f32 %v991_v24, %v987_v32  ;;  %v1008_v6 = vmul.f32 %v1007_v21, %v3139_v42  ;;  %v1009_v11 = vmul.f32 %v1007_v21, %v3142_v46  ;;  %v1012_v47 = vmul.f32 %v1011_v28, %v1913_v49  ;;  %p1389_p0 = pnand %p1388_p13, %p1382_p10 }
 0x1b3   :  { %v963_v4 = vrot.slane %v962_v8, 2  ;;  %v1013_v39 = vmul.f32 %v1011_v28, %v1959_v29  ;;  %v935_v61 = vadd.f32 %v934_v14, %v932_v10  ;;  %v1018_v52 = vmul.f32 %v1017_v22, %v1985_v3 }
 0x1b4   :  { %v994_v23 = vmax.f32 %v992_v20, %v993_v26  ;;  %v1019_v44 = vmul.f32 %v1017_v22, %v2011_v15  ;;  %v1014_v43 = vadd.f32 %v1012_v47, %v1008_v6  ;;  %v1023_v1 = vstv %s2558_s12 }
 0x1b5   :  { %v964_v58 = vmax.f32 %v962_v8, %v963_v4  ;;  %v1015_v31 = vadd.f32 %v1013_v39, %v1009_v11  ;;  %v936_v13 = vmax.f32 %v935_v61, 0.0  ;;  %v1024_v36 = vmul.f32 %v1023_v1, %v2037_v55 }
 0x1b6   :  { %v995_v2 = vrot.slane %v994_v23, 4  ;;  %v1025_v9 = vmul.f32 %v1023_v1, %v2063_v38  ;;  %v968_v37 = vstv %s2560_s9  ;;  %v1020_v17 = vadd.f32 %v1018_v52, %v1014_v43 }
 0x1b7   :  { %v965_v45 = vrot.slane %v964_v58, 1  ;;  %v1021_v19 = vadd.f32 %v1019_v44, %v1015_v31  ;;  %937 = vst [vmem:[#allocation7 + $0x18] sm:$0x1] %v936_v13  ;;  %v1041_v51 = vstv %s2553_s11  ;;  %v1045_v35 = vstv %s2565_s22 }
 0x1b8   :  { %v996_v59 = vmax.f32 %v994_v23, %v995_v2  ;;  %v1051_v16 = vstv %s2567_s15  ;;  %v1026_v0 = vadd.f32 %v1024_v36, %v1020_v17  ;;  %v1042_v7 = vmul.f32 %v1041_v51, %v3139_v42 }
 0x1b9   :  { %v966_v34 = vmax.f32 %v964_v58, %v965_v45  ;;  %v1027_v63 = vadd.f32 %v1025_v9, %v1021_v19  ;;  %v1043_v62 = vmul.f32 %v1041_v51, %v3142_v46  ;;  %v1046_v18 = vmul.f32 %v1045_v35, %v1913_v49 }
 0x1ba   :  { %v997_v5 = vrot.slane %v996_v59, 2  ;;  %v1047_v41 = vmul.f32 %v1045_v35, %v1959_v29  ;;  %v1052_v25 = vmul.f32 %v1051_v16, %v1985_v3  ;;  %v1053_v50 = vmul.f32 %v1051_v16, %v2011_v15 }
 0x1bb   :  { %v969_v27 = vadd.f32 %v968_v37, %v966_v34  ;;  %v1028_v54 = vmax.f32 %v1026_v0, %v1027_v63  ;;  %v1048_v56 = vadd.f32 %v1046_v18, %v1042_v7  ;;  %v1057_v12 = vstv %s2580_s16 }
 0x1bc   :  { %v998_v53 = vmax.f32 %v996_v59, %v997_v5  ;;  %v1049_v57 = vadd.f32 %v1047_v41, %v1043_v62  ;;  %v1058_v60 = vmul.f32 %v1057_v12, %v2037_v55  ;;  %v1059_v24 = vmul.f32 %v1057_v12, %v2063_v38 }
 0x1bd   :  { %v970_v14 = vmax.f32 %v969_v27, 0.0  ;;  %v1029_v48 = vrot.slane %v1028_v54, 4  ;;  %v1002_v30 = vstv %s2582_s1  ;;  %v1054_v33 = vadd.f32 %v1052_v25, %v1048_v56 }
 0x1be   :  { %v999_v40 = vrot.slane %v998_v53, 1  ;;  %v1055_v32 = vadd.f32 %v1053_v50, %v1049_v57  ;;  %v1075_v21 = vstv %s2576_s26  ;;  %v1079_v28 = vstv %s2587_s30 }
 0x1bf   :  { %971 = vst [vmem:[#allocation7 + $0x19] sm:$0x1] %v970_v14  ;;  %v1030_v8 = vmax.f32 %v1028_v54, %v1029_v48  ;;  %v1085_v22 = vstv %s2590_s10  ;;  %v1060_v20 = vadd.f32 %v1058_v60, %v1054_v33  ;;  %v1076_v6 = vmul.f32 %v1075_v21, %v3139_v42 }
 0x1c0   :  { %v1000_v10 = vmax.f32 %v998_v53, %v999_v40  ;;  %v1061_v26 = vadd.f32 %v1059_v24, %v1055_v32  ;;  %v1077_v11 = vmul.f32 %v1075_v21, %v3142_v46  ;;  %v1080_v47 = vmul.f32 %v1079_v28, %v1913_v49 }
 0x1c1   :  { %v1031_v4 = vrot.slane %v1030_v8, 2  ;;  %v1081_v39 = vmul.f32 %v1079_v28, %v1959_v29  ;;  %v1086_v52 = vmul.f32 %v1085_v22, %v1985_v3  ;;  %v1087_v44 = vmul.f32 %v1085_v22, %v2011_v15 }
 0x1c2   :  { %v1003_v61 = vadd.f32 %v1002_v30, %v1000_v10  ;;  %v1062_v23 = vmax.f32 %v1060_v20, %v1061_v26  ;;  %v1082_v43 = vadd.f32 %v1080_v47, %v1076_v6  ;;  %v1091_v1 = vstv %s2603_s21 }
 0x1c3   :  { %v1032_v58 = vmax.f32 %v1030_v8, %v1031_v4  ;;  %v1083_v31 = vadd.f32 %v1081_v39, %v1077_v11  ;;  %v1092_v36 = vmul.f32 %v1091_v1, %v2037_v55  ;;  %v1093_v9 = vmul.f32 %v1091_v1, %v2063_v38 }
 0x1c4   :  { %v1004_v13 = vmax.f32 %v1003_v61, 0.0  ;;  %v1063_v2 = vrot.slane %v1062_v23, 4  ;;  %v1036_v37 = vstv %s2605_s5  ;;  %v1088_v17 = vadd.f32 %v1086_v52, %v1082_v43 }
 0x1c5   :  { %v1033_v45 = vrot.slane %v1032_v58, 1  ;;  %v1089_v19 = vadd.f32 %v1087_v44, %v1083_v31  ;;  %v1109_v51 = vstv %s2599_s8  ;;  %v1113_v35 = vstv %s2610_s24 }
 0x1c6   :  { %1005 = vst [vmem:[#allocation7 + $0x1a] sm:$0x1] %v1004_v13  ;;  %v1064_v59 = vmax.f32 %v1062_v23, %v1063_v2  ;;  %v1119_v16 = vstv %s2613_s19  ;;  %v1094_v0 = vadd.f32 %v1092_v36, %v1088_v17  ;;  %v1110_v7 = vmul.f32 %v1109_v51, %v3139_v42 }
 0x1c7   :  { %v1034_v34 = vmax.f32 %v1032_v58, %v1033_v45  ;;  %v1095_v63 = vadd.f32 %v1093_v9, %v1089_v19  ;;  %v1111_v62 = vmul.f32 %v1109_v51, %v3142_v46  ;;  %v1114_v18 = vmul.f32 %v1113_v35, %v1913_v49 }
 0x1c8   :  { %v1065_v5 = vrot.slane %v1064_v59, 2  ;;  %v1115_v41 = vmul.f32 %v1113_v35, %v1959_v29  ;;  %v1120_v25 = vmul.f32 %v1119_v16, %v1985_v3  ;;  %v1121_v50 = vmul.f32 %v1119_v16, %v2011_v15 }
 0x1c9   :  { %v1037_v27 = vadd.f32 %v1036_v37, %v1034_v34  ;;  %v1096_v54 = vmax.f32 %v1094_v0, %v1095_v63  ;;  %v1116_v56 = vadd.f32 %v1114_v18, %v1110_v7  ;;  %v1125_v12 = vstv %s2626_s13 }
 0x1ca   :  { %v1066_v53 = vmax.f32 %v1064_v59, %v1065_v5  ;;  %v1117_v57 = vadd.f32 %v1115_v41, %v1111_v62  ;;  %v1126_v60 = vmul.f32 %v1125_v12, %v2037_v55  ;;  %v1127_v24 = vmul.f32 %v1125_v12, %v2063_v38 }
 0x1cb   :  { %v1038_v14 = vmax.f32 %v1037_v27, 0.0  ;;  %v1097_v48 = vrot.slane %v1096_v54, 4  ;;  %v1070_v30 = vstv %s2628_s23  ;;  %v1122_v33 = vadd.f32 %v1120_v25, %v1116_v56 }
 0x1cc   :  { %v1067_v40 = vrot.slane %v1066_v53, 1  ;;  %v1123_v32 = vadd.f32 %v1121_v50, %v1117_v57  ;;  %v1143_v21 = vstv %s2622_s29  ;;  %v1147_v28 = vstv %s2633_s20 }
 0x1cd   :  { %1039 = vst [vmem:[#allocation7 + $0x1b] sm:$0x1] %v1038_v14  ;;  %v1098_v8 = vmax.f32 %v1096_v54, %v1097_v48  ;;  %v1153_v22 = vstv %s2636_s7  ;;  %v1128_v20 = vadd.f32 %v1126_v60, %v1122_v33  ;;  %v1144_v6 = vmul.f32 %v1143_v21, %v3139_v42 }
 0x1ce   :  { %v1068_v10 = vmax.f32 %v1066_v53, %v1067_v40  ;;  %v1129_v26 = vadd.f32 %v1127_v24, %v1123_v32  ;;  %v1145_v11 = vmul.f32 %v1143_v21, %v3142_v46  ;;  %v1148_v47 = vmul.f32 %v1147_v28, %v1913_v49 }
 0x1cf   :  { %v1099_v4 = vrot.slane %v1098_v8, 2  ;;  %v1149_v39 = vmul.f32 %v1147_v28, %v1959_v29  ;;  %v1154_v52 = vmul.f32 %v1153_v22, %v1985_v3  ;;  %v1155_v44 = vmul.f32 %v1153_v22, %v2011_v15 }
 0x1d0   :  { %v1071_v61 = vadd.f32 %v1070_v30, %v1068_v10  ;;  %v1130_v23 = vmax.f32 %v1128_v20, %v1129_v26  ;;  %v1150_v43 = vadd.f32 %v1148_v47, %v1144_v6  ;;  %v1159_v1 = vstv %s2647_s28 }
 0x1d1   :  { %v1100_v58 = vmax.f32 %v1098_v8, %v1099_v4  ;;  %v1151_v31 = vadd.f32 %v1149_v39, %v1145_v11  ;;  %v1160_v2 = vmul.f32 %v1159_v1, %v2037_v55  ;;  %v1161_v46 = vmul.f32 %v1159_v1, %v2063_v38 }
 0x1d2   :  { %v1072_v13 = vmax.f32 %v1071_v61, 0.0  ;;  %v1131_v42 = vrot.slane %v1130_v23, 4  ;;  %v1156_v29 = vadd.f32 %v1154_v52, %v1150_v43  ;;  %v1104_v9 = vstv %s2653_s18 }
 0x1d3   :  { %v1101_v49 = vrot.slane %v1100_v58, 1  ;;  %v1157_v36 = vadd.f32 %v1155_v44, %v1151_v31  ;;  %v1138_v55 = vstv %s1346_s27  ;;  %v1172_v41 = vstv %s1351_s3 }
 0x1d4   :  { %1073 = vst [vmem:[#allocation7 + $0x1c] sm:$0x1] %v1072_v13  ;;  %v1132_v45 = vmax.f32 %v1130_v23, %v1131_v42  ;;  %v1162_v37 = vadd.f32 %v1160_v2, %v1156_v29 }
 0x1d5   :  { %v1102_v3 = vmax.f32 %v1100_v58, %v1101_v49  ;;  %v1163_v15 = vadd.f32 %v1161_v46, %v1157_v36 }
 0x1d6   :  { %v1133_v17 = vrot.slane %v1132_v45, 2 }
 0x1d7   :  { %v1105_v19 = vadd.f32 %v1104_v9, %v1102_v3  ;;  %v1164_v59 = vmax.f32 %v1162_v37, %v1163_v15 }
 0x1d8   :  { %v1134_v51 = vmax.f32 %v1132_v45, %v1133_v17 }
 0x1d9   :  { %v1106_v35 = vmax.f32 %v1105_v19, 0.0  ;;  %v1165_v16 = vrot.slane %v1164_v59, 4 }
 0x1da   :  { %v1135_v34 = vrot.slane %v1134_v51, 1 }
 0x1db   :  { %1107 = vst [vmem:[#allocation7 + $0x1d] sm:$0x1] %v1106_v35  ;;  %v1166_v38 = vmax.f32 %v1164_v59, %v1165_v16 }
 0x1dc   :  { %v1136_v0 = vmax.f32 %v1134_v51, %v1135_v34 }
 0x1dd   :  { %v1167_v63 = vrot.slane %v1166_v38, 2 }
 0x1de   :  { %v1139_v7 = vadd.f32 %v1138_v55, %v1136_v0 }
 0x1df   :  { %v1168_v5 = vmax.f32 %v1166_v38, %v1167_v63 }
 0x1e0   :  { %v1140_v62 = vmax.f32 %v1139_v7, 0.0 }
 0x1e1   :  { %v1169_v18 = vrot.slane %v1168_v5, 1 }
 0x1e2   :  { %1141 = vst [vmem:[#allocation7 + $0x1e] sm:$0x1] %v1140_v62 }
 0x1e3   :  { %v1170_v27 = vmax.f32 %v1168_v5, %v1169_v18 }
 0x1e5   :  { %v1173_v54 = vadd.f32 %v1172_v41, %v1170_v27 }
 0x1e7   :  { %v1174_v25 = vmax.f32 %v1173_v54, 0.0 }
 0x1e9   :  { %1175 = vst [vmem:[#allocation7 + $0x1f] sm:$0x1] %v1174_v25 }
 0x1ea   :  { %1392 = shalt.err (!%p1389_p0)
}
 0x1eb   :  { %s1410_s4 = smov 128   ;;  %s1411_s6 = smov 8  }
 0x1ec   :  { %s3211_s11 = sld [smem:[#allocation111_spill]] }
 0x1f2   :  { %1187 = dma.vmem_to_hbm [thread:$0]  %s1182_s17, 512, %s3211_s11, [#allocation3], %s1410_s4, %s1410_s4, %s1411_s6  }
 0x1f3   :  { %1405 = dma.done.wait [#allocation3], 512  }
 0x1f4   :  { %1406 = vsyncadd [#allocation3], 4294966784 }
 0x1f5   :  { %1191 = vsyncpa [#allocation3], 1 }
 0x1f6   :  { %1192 = vsyncpa [#allocation4], 1 }
 0x1f7   :  { %1193 = vsyncpa [#allocation6], 1 }

</bundles_post_ra>
